<compile_context>
chip_gen: v6e
topology: v6e:2x2x1
jax: 0.10.0
libtpu: 0.0.40
codegen_flags: <defaults>
</compile_context>

<pallas_src>
import numpy as np
import jax
import jax.numpy as jnp
from jax import lax
from jax.experimental import pallas as pl
from jax.experimental.pallas import tpu as pltpu

NEG_SLOPE = 0.2
IN_EPS = 1e-5


def _leaky(v):
    return jnp.where(v >= 0, v, NEG_SLOPE * v)


def _ds_out(n):  # reflect-pad 1, 3x3 blur, stride 2
    return (n - 1) // 2 + 1


def _make_geometry(H0, W0, in_channels, features):
    """Static per-stage geometry.

    Activations are stored as [C, frame_rows*frame_cols] with valid data at frame
    rows/cols 1..H / 1..W and zeros elsewhere; the zero ring is the conv's padding=1.
    A conv (k4,s1,p1) output at (y,x) lives at core index q = y*Wf + x; the tap
    (dy,dx) read is the flat position q + dy*Wf + dx of the frame.
    """
    chans = [in_channels, features, 2 * features, 4 * features, 8 * features, 1]
    has_in = [False, True, True, True, False]
    has_ds = [True, True, True, False, False]
    stages = []
    H, W = H0, W0
    Wf, L = W0 + 2, (H0 + 2) * (W0 + 2)
    for i in range(5):
        OH, OW = H - 1, W - 1                      # conv k4 s1 p1
        Lc = (OH - 1) * Wf + OW                    # contiguous "core" covering all valid outputs
        st = dict(H=H, W=W, Wf=Wf, L=L, OH=OH, OW=OW, Lc=Lc,
                  cin=chans[i], cout=chans[i + 1],
                  has_in=has_in[i], has_ds=has_ds[i])
        if has_ds[i]:
            HD, WD = _ds_out(OH), _ds_out(OW)
            st["HD"], st["WD"] = HD, WD
            H, W = HD, WD
            Wf, L = WD + 2, (HD + 2) * (WD + 2)    # fresh frame after downsample
        else:
            H, W = OH, OW                          # same frame, smaller valid region
        stages.append(st)
    return stages


def _build_downsample_matrix(st):
    """Constant [Lc, L_next] matrix folding reflect-pad(1) + depthwise 3x3
    [1,2,1]x[1,2,1]/16 blur + stride-2 + re-framing into the next stage's frame.
    Entries are k/16 (k integer <= 16) -> exactly representable in bfloat16."""
    H, W, Wf = st["OH"], st["OW"], st["Wf"]
    HD, WD = st["HD"], st["WD"]
    Wf2 = WD + 2
    L2 = (HD + 2) * Wf2
    f = np.array([1.0, 2.0, 1.0], np.float64)
    D = np.zeros((st["Lc"], L2), np.float32)
    for yo in range(HD):
        for xo in range(WD):
            p_out = (1 + yo) * Wf2 + (1 + xo)
            for a in range(3):
                for b in range(3):
                    i = 2 * yo + a                 # row/col in reflect-padded input
                    j = 2 * xo + b
                    sy = 1 if i == 0 else (H - 2 if i == H + 1 else i - 1)
                    sx = 1 if j == 0 else (W - 2 if j == W + 1 else j - 1)
                    D[sy * Wf + sx, p_out] += float(f[a] * f[b]) / 16.0
    return D


def _build_core_mask(st):
    """[1, Lc] mask: 1.0 at valid conv-output positions of the core range."""
    q = np.arange(st["Lc"])
    return ((q % st["Wf"]) < st["OW"]).astype(np.float32).reshape(1, st["Lc"])


def _make_kernel(stages):
    n_stage = len(stages)

    def kernel(*refs):
        # refs: [x] [w1..w5] [b1..b5] [D_A D_B D_C] [mask2 mask3 mask4] [out]
        x_ref = refs[0]
        w_refs = refs[1:6]
        b_refs = refs[6:11]
        d_refs = refs[11:14]
        m_refs = refs[14:17]
        out_ref = refs[17]

        x = x_ref[0]                                  # (cin0, L0) framed input
        d_idx = 0
        m_idx = 0
        for i, st in enumerate(stages):
            Wf, L, Lc = st["Wf"], st["L"], st["Lc"]
            cout = st["cout"]

            # ---- Conv k4/s1/p1 as ONE deep-K MXU matmul over an in-vreg im2col slab ----
            # Slab rows ordered (dy, dx, cin) to match the fused weight layout.
            rows = []
            for dy in range(4):
                wide = x[:, dy * Wf: dy * Wf + Lc + 3]        # 4 pre-shifted views
                for dx in range(4):
                    rows.append(wide[:, dx: dx + Lc])         # (cin, Lc)
            slab = jnp.concatenate(rows, axis=0)              # (16*cin, Lc)
            y = jnp.dot(w_refs[i][...], slab,
                        preferred_element_type=jnp.float32) + b_refs[i][...]

            # ---- InstanceNorm2d(affine=False, eps=1e-5): one-pass masked statistics ----
            if st["has_in"]:
                mask = m_refs[m_idx][...]                     # (1, Lc)
                m_idx += 1
                inv_cnt = 1.0 / float(st["OH"] * st["OW"])
                ym = y * mask
                mean = jnp.sum(ym, axis=-1, keepdims=True) * inv_cnt
                ex2 = jnp.sum(ym * y, axis=-1, keepdims=True) * inv_cnt
                var = jnp.maximum(ex2 - mean * mean, 0.0)
                # trailing *mask -> invalid lanes are EXACT zeros (required by the
                # stage-3 re-frame below and keeps the garbage-lane story non-fragile).
                y = (y - mean) * lax.rsqrt(var + IN_EPS) * mask

            if i < n_stage - 1:                               # LeakyReLU everywhere but last conv
                y = _leaky(y)

            if st["has_ds"]:
                # blur-pool downsample + re-frame: one matmul with a constant matrix.
                # D is stored bf16 (lossless dyadics); upcast -> f32 matmul, exact numerics.
                d = d_refs[d_idx][...].astype(jnp.float32)
                d_idx += 1
                x = jnp.dot(y, d, preferred_element_type=jnp.float32)
            elif i == n_stage - 2:
                # conv4 output: re-frame IN-VREG (no VMEM scratch round trip).  y's
                # invalid lanes are exact zeros, so concatenating against zeros yields
                # the proper zero padding ring for the final conv.
                zl = jnp.zeros((cout, Wf + 1), jnp.float32)
                zr = jnp.zeros((cout, L - Lc - Wf - 1), jnp.float32)
                x = jnp.concatenate([zl, y, zr], axis=-1)
            else:
                out_ref[0] = y                                # final conv core result

    return kernel


def make_discriminator_forward(H0, W0, in_channels=1, features=8):
    stages = _make_geometry(H0, W0, in_channels, features)
    # bf16 storage for the blur-pool matrices: exactly representable, halves their DMA.
    d_mats = [jnp.asarray(_build_downsample_matrix(st), dtype=jnp.bfloat16)
              for st in stages if st["has_ds"]]
    masks = [jnp.asarray(_build_core_mask(st)) for st in stages if st["has_in"]]
    kernel = _make_kernel(stages)

    # Guard the dense-D footprint (it grows O(H^2 W^2 / 4)); v7x only has 64 MiB VMEM.
    d_bytes = sum(int(np.prod(d.shape)) * d.dtype.itemsize for d in d_mats)
    if d_bytes > (24 << 20):
        raise ValueError("dense blur-pool matrices exceed the VMEM budget for this "
                         "geometry; switch the Downsample to a 9-tap shifted-slice blur")

    st0, st4 = stages[0], stages[4]
    L0, cin0 = st0["L"], st0["cin"]
    Lc_out, Wf_out = st4["Lc"], st4["Wf"]
    OH_out, OW_out = st4["OH"], st4["OW"]

    def forward(x_nchw, params):
        N = x_nchw.shape[0]
        # Frame the input once (tiny): zero ring of 1 = conv padding, row-major flatten.
        xf = jnp.pad(x_nchw, ((0, 0), (0, 0), (1, 1), (1, 1))).reshape(N, cin0, L0)
        inputs = ([xf]
                  + [params[f"w{i}"] for i in range(1, 6)]
                  + [params[f"b{i}"] for i in range(1, 6)]
                  + d_mats + masks)

        in_specs = [pl.BlockSpec((1, cin0, L0), lambda n: (n, 0, 0))]
        for a in inputs[1:]:
            in_specs.append(pl.BlockSpec(a.shape, lambda n, _nd=a.ndim: (0,) * _nd))

        # Explicit VMEM budget: constants are double-buffered by the pipeline; keep the
        # request >= the v6e/v7x default (32 MiB) and well under v7x's 64 MiB physical.
        const_bytes = sum(int(np.prod(a.shape)) * a.dtype.itemsize for a in inputs[1:])
        vmem_limit = int(min(48 << 20, max(32 << 20, 2 * const_bytes + (8 << 20))))

        out_core = pl.pallas_call(
            kernel,
            out_shape=jax.ShapeDtypeStruct((N, 1, Lc_out), jnp.float32),
            grid=(N,),
            in_specs=in_specs,
            out_specs=pl.BlockSpec((1, 1, Lc_out), lambda n: (n, 0, 0)),
            compiler_params=pltpu.CompilerParams(
                dimension_semantics=("parallel",),
                vmem_limit_bytes=vmem_limit),
        )(*inputs)

        # Pull the valid OHxOW window out of the final core layout (tiny slice/reshape).
        rows = [out_core[:, :, r * Wf_out:r * Wf_out + OW_out] for r in range(OH_out)]
        return jnp.concatenate(rows, axis=-1).reshape(N, 1, OH_out, OW_out)

    return forward


def init_params(key, in_channels=1, features=8):
    """Deterministic synthetic parameters.  PyTorch Conv2d weights are OIHW; the kernel
    consumes fused (cout, 16*cin) weights with columns ordered (kh, kw, cin) -- matching
    the in-kernel im2col slab -- and bias (cout, 1).  Reshaped ONCE here, never per
    forward.  The raw OIHW weights are also kept for the pure-JAX reference check."""
    chans = [in_channels, features, 2 * features, 4 * features, 8 * features, 1]
    params = {}
    for i in range(5):
        key, kw, kb = jax.random.split(key, 3)
        cin, cout = chans[i], chans[i + 1]
        w_oihw = 0.05 * jax.random.normal(kw, (cout, cin, 4, 4), jnp.float32)
        b = 0.01 * jax.random.normal(kb, (cout,), jnp.float32)
        params[f"w{i + 1}_oihw"] = w_oihw                     # reference only
        params[f"b{i + 1}_vec"] = b                           # reference only
        params[f"w{i + 1}"] = jnp.transpose(w_oihw, (0, 2, 3, 1)).reshape(cout, 16 * cin)
        params[f"b{i + 1}"] = b.reshape(cout, 1)
    return params


def reference_forward(x, params):
    """Pure-JAX (lax) reference of the PyTorch Discriminator forward."""
    f1 = jnp.array([1.0, 2.0, 1.0], jnp.float32)
    blur = (f1[:, None] * f1[None, :]) / 16.0

    def conv(h, w, b):
        y = lax.conv_general_dilated(h, w, window_strides=(1, 1),
                                     padding=((1, 1), (1, 1)),
                                     dimension_numbers=("NCHW", "OIHW", "NCHW"),
                                     precision=lax.Precision.HIGHEST)
        return y + b.reshape(1, -1, 1, 1)

    def down(h):
        c = h.shape[1]
        hp = jnp.pad(h, ((0, 0), (0, 0), (1, 1), (1, 1)), mode="reflect")
        w = jnp.broadcast_to(blur, (c, 1, 3, 3))
        return lax.conv_general_dilated(hp, w, window_strides=(2, 2), padding="VALID",
                                        dimension_numbers=("NCHW", "OIHW", "NCHW"),
                                        feature_group_count=c,
                                        precision=lax.Precision.HIGHEST)

    def inorm(h):
        mu = jnp.mean(h, axis=(2, 3), keepdims=True)
        var = jnp.mean((h - mu) ** 2, axis=(2, 3), keepdims=True)
        return (h - mu) * lax.rsqrt(var + IN_EPS)

    def lrelu(h):
        return jnp.where(h >= 0, h, NEG_SLOPE * h)

    h = x
    h = down(lrelu(conv(h, params["w1_oihw"], params["b1_vec"])))
    h = down(lrelu(inorm(conv(h, params["w2_oihw"], params["b2_vec"]))))
    h = down(lrelu(inorm(conv(h, params["w3_oihw"], params["b3_vec"]))))
    h = lrelu(inorm(conv(h, params["w4_oihw"], params["b4_vec"])))
    h = conv(h, params["w5_oihw"], params["b5_vec"])
    return h


if __name__ == "__main__":
    key = jax.random.PRNGKey(0)
    k_x, k_p = jax.random.split(key)
    # Small shapes: batch=2, in_channels=1, spatial=32, features=8.
    x = jax.random.normal(k_x, (2, 1, 32, 32), jnp.float32)
    params = init_params(k_p, in_channels=1, features=8)

    forward = jax.jit(make_discriminator_forward(32, 32, in_channels=1, features=8))
    out = jax.block_until_ready(forward(x, params))

    assert out.shape == (2, 1, 2, 2), out.shape
    assert bool(jnp.all(jnp.isfinite(out)))

    # Validate against the pure-JAX reference of the PyTorch module.
    ref = jax.block_until_ready(jax.jit(reference_forward)(x, params))
    err = float(jnp.max(jnp.abs(out - ref)))
    assert err < 5e-3, f"mismatch vs JAX reference: max abs err {err}"

    print("KERNEL_OK")
</pallas_src>

<mosaic_0001>
module attributes {stable_mosaic.version = 11 : i64} {
  func.func @kernel(%arg0: i32, %arg1: memref<1x1x1156xf32, #tpu.memory_space<vmem>>, %arg2: memref<8x16xf32, #tpu.memory_space<vmem>>, %arg3: memref<16x128xf32, #tpu.memory_space<vmem>>, %arg4: memref<32x256xf32, #tpu.memory_space<vmem>>, %arg5: memref<64x512xf32, #tpu.memory_space<vmem>>, %arg6: memref<1x1024xf32, #tpu.memory_space<vmem>>, %arg7: memref<8x1xf32, #tpu.memory_space<vmem>>, %arg8: memref<16x1xf32, #tpu.memory_space<vmem>>, %arg9: memref<32x1xf32, #tpu.memory_space<vmem>>, %arg10: memref<64x1xf32, #tpu.memory_space<vmem>>, %arg11: memref<1x1xf32, #tpu.memory_space<vmem>>, %arg12: memref<1051x324xbf16, #tpu.memory_space<vmem>>, %arg13: memref<267x100xbf16, #tpu.memory_space<vmem>>, %arg14: memref<67x36xbf16, #tpu.memory_space<vmem>>, %arg15: memref<1x267xf32, #tpu.memory_space<vmem>>, %arg16: memref<1x67xf32, #tpu.memory_space<vmem>>, %arg17: memref<1x15xf32, #tpu.memory_space<vmem>>, %arg18: memref<1x1x8xf32, #tpu.memory_space<vmem>>) attributes {dimension_semantics = [#tpu.dimension_semantics<parallel>], iteration_bounds = array<i64: 2>, scalar_prefetch = 0 : i64, scratch_operands = 0 : i64, tpu.core_type = #tpu.core_type<tc>, window_params = [{transform_indices = @transform_0, window_bounds = array<i64: 1, 1, 1156>}, {pipeline_mode = #tpu.pipeline_mode<synchronous>, transform_indices = @transform_1, window_bounds = array<i64: 8, 16>}, {pipeline_mode = #tpu.pipeline_mode<synchronous>, transform_indices = @transform_2, window_bounds = array<i64: 16, 128>}, {pipeline_mode = #tpu.pipeline_mode<synchronous>, transform_indices = @transform_3, window_bounds = array<i64: 32, 256>}, {pipeline_mode = #tpu.pipeline_mode<synchronous>, transform_indices = @transform_4, window_bounds = array<i64: 64, 512>}, {pipeline_mode = #tpu.pipeline_mode<synchronous>, transform_indices = @transform_5, window_bounds = array<i64: 1, 1024>}, {pipeline_mode = #tpu.pipeline_mode<synchronous>, transform_indices = @transform_6, window_bounds = array<i64: 8, 1>}, {pipeline_mode = #tpu.pipeline_mode<synchronous>, transform_indices = @transform_7, window_bounds = array<i64: 16, 1>}, {pipeline_mode = #tpu.pipeline_mode<synchronous>, transform_indices = @transform_8, window_bounds = array<i64: 32, 1>}, {pipeline_mode = #tpu.pipeline_mode<synchronous>, transform_indices = @transform_9, window_bounds = array<i64: 64, 1>}, {pipeline_mode = #tpu.pipeline_mode<synchronous>, transform_indices = @transform_10, window_bounds = array<i64: 1, 1>}, {pipeline_mode = #tpu.pipeline_mode<synchronous>, transform_indices = @transform_11, window_bounds = array<i64: 1051, 324>}, {pipeline_mode = #tpu.pipeline_mode<synchronous>, transform_indices = @transform_12, window_bounds = array<i64: 267, 100>}, {pipeline_mode = #tpu.pipeline_mode<synchronous>, transform_indices = @transform_13, window_bounds = array<i64: 67, 36>}, {pipeline_mode = #tpu.pipeline_mode<synchronous>, transform_indices = @transform_14, window_bounds = array<i64: 1, 267>}, {pipeline_mode = #tpu.pipeline_mode<synchronous>, transform_indices = @transform_15, window_bounds = array<i64: 1, 67>}, {pipeline_mode = #tpu.pipeline_mode<synchronous>, transform_indices = @transform_16, window_bounds = array<i64: 1, 15>}, {transform_indices = @transform_17, window_bounds = array<i64: 1, 1, 8>}]} {
    %c0 = arith.constant 0 : index
    %c0_0 = arith.constant 0 : index
    %c0_1 = arith.constant 0 : index
    %0 = vector.load %arg1[%c0, %c0_0, %c0_1] : memref<1x1x1156xf32, #tpu.memory_space<vmem>>, vector<1x1x1156xf32>
    %1 = vector.shape_cast %0 : vector<1x1x1156xf32> to vector<1x1156xf32>
    %2 = vector.extract_strided_slice %1 {offsets = [0, 0], sizes = [1, 1054], strides = [1, 1]} : vector<1x1156xf32> to vector<1x1054xf32>
    %3 = vector.extract_strided_slice %2 {offsets = [0, 0], sizes = [1, 1051], strides = [1, 1]} : vector<1x1054xf32> to vector<1x1051xf32>
    %4 = vector.extract_strided_slice %2 {offsets = [0, 1], sizes = [1, 1051], strides = [1, 1]} : vector<1x1054xf32> to vector<1x1051xf32>
    %5 = vector.extract_strided_slice %2 {offsets = [0, 2], sizes = [1, 1051], strides = [1, 1]} : vector<1x1054xf32> to vector<1x1051xf32>
    %6 = vector.extract_strided_slice %2 {offsets = [0, 3], sizes = [1, 1051], strides = [1, 1]} : vector<1x1054xf32> to vector<1x1051xf32>
    %7 = vector.extract_strided_slice %1 {offsets = [0, 34], sizes = [1, 1054], strides = [1, 1]} : vector<1x1156xf32> to vector<1x1054xf32>
    %8 = vector.extract_strided_slice %7 {offsets = [0, 0], sizes = [1, 1051], strides = [1, 1]} : vector<1x1054xf32> to vector<1x1051xf32>
    %9 = vector.extract_strided_slice %7 {offsets = [0, 1], sizes = [1, 1051], strides = [1, 1]} : vector<1x1054xf32> to vector<1x1051xf32>
    %10 = vector.extract_strided_slice %7 {offsets = [0, 2], sizes = [1, 1051], strides = [1, 1]} : vector<1x1054xf32> to vector<1x1051xf32>
    %11 = vector.extract_strided_slice %7 {offsets = [0, 3], sizes = [1, 1051], strides = [1, 1]} : vector<1x1054xf32> to vector<1x1051xf32>
    %12 = vector.extract_strided_slice %1 {offsets = [0, 68], sizes = [1, 1054], strides = [1, 1]} : vector<1x1156xf32> to vector<1x1054xf32>
    %13 = vector.extract_strided_slice %12 {offsets = [0, 0], sizes = [1, 1051], strides = [1, 1]} : vector<1x1054xf32> to vector<1x1051xf32>
    %14 = vector.extract_strided_slice %12 {offsets = [0, 1], sizes = [1, 1051], strides = [1, 1]} : vector<1x1054xf32> to vector<1x1051xf32>
    %15 = vector.extract_strided_slice %12 {offsets = [0, 2], sizes = [1, 1051], strides = [1, 1]} : vector<1x1054xf32> to vector<1x1051xf32>
    %16 = vector.extract_strided_slice %12 {offsets = [0, 3], sizes = [1, 1051], strides = [1, 1]} : vector<1x1054xf32> to vector<1x1051xf32>
    %17 = vector.extract_strided_slice %1 {offsets = [0, 102], sizes = [1, 1054], strides = [1, 1]} : vector<1x1156xf32> to vector<1x1054xf32>
    %18 = vector.extract_strided_slice %17 {offsets = [0, 0], sizes = [1, 1051], strides = [1, 1]} : vector<1x1054xf32> to vector<1x1051xf32>
    %19 = vector.extract_strided_slice %17 {offsets = [0, 1], sizes = [1, 1051], strides = [1, 1]} : vector<1x1054xf32> to vector<1x1051xf32>
    %20 = vector.extract_strided_slice %17 {offsets = [0, 2], sizes = [1, 1051], strides = [1, 1]} : vector<1x1054xf32> to vector<1x1051xf32>
    %21 = vector.extract_strided_slice %17 {offsets = [0, 3], sizes = [1, 1051], strides = [1, 1]} : vector<1x1054xf32> to vector<1x1051xf32>
    %22 = tpu.concatenate %3, %4, %5, %6, %8, %9, %10, %11, %13, %14, %15, %16, %18, %19, %20, %21 in 0 : vector<1x1051xf32>, vector<1x1051xf32>, vector<1x1051xf32>, vector<1x1051xf32>, vector<1x1051xf32>, vector<1x1051xf32>, vector<1x1051xf32>, vector<1x1051xf32>, vector<1x1051xf32>, vector<1x1051xf32>, vector<1x1051xf32>, vector<1x1051xf32>, vector<1x1051xf32>, vector<1x1051xf32>, vector<1x1051xf32>, vector<1x1051xf32> -> vector<16x1051xf32>
    %c0_2 = arith.constant 0 : index
    %c0_3 = arith.constant 0 : index
    %23 = vector.load %arg2[%c0_2, %c0_3] : memref<8x16xf32, #tpu.memory_space<vmem>>, vector<8x16xf32>
    %cst = arith.constant dense<0.000000e+00> : vector<8x1051xf32>
    %24 = tpu.matmul %23, %22, %cst {dimension_numbers = #tpu.dot_dimension_numbers<[1], [0], [0], [1], [0, 0, 1, 1], [], []>} : vector<8x16xf32>, vector<16x1051xf32>, vector<8x1051xf32> -> vector<8x1051xf32>
    %c0_4 = arith.constant 0 : index
    %c0_5 = arith.constant 0 : index
    %25 = vector.load %arg7[%c0_4, %c0_5] : memref<8x1xf32, #tpu.memory_space<vmem>>, vector<8x1xf32>
    %26 = vector.broadcast %25 : vector<8x1xf32> to vector<8x1051xf32>
    %27 = arith.addf %24, %26 : vector<8x1051xf32>
    %cst_6 = arith.constant 0.000000e+00 : f32
    %28 = vector.broadcast %cst_6 : f32 to vector<8x1051xf32>
    %29 = arith.cmpf oge, %27, %28 : vector<8x1051xf32>
    %cst_7 = arith.constant 2.000000e-01 : f32
    %30 = vector.broadcast %cst_7 : f32 to vector<8x1051xf32>
    %31 = arith.mulf %30, %27 : vector<8x1051xf32>
    %32 = arith.select %29, %27, %31 : vector<8x1051xi1>, vector<8x1051xf32>
    %c0_8 = arith.constant 0 : index
    %c0_9 = arith.constant 0 : index
    %33 = vector.load %arg12[%c0_8, %c0_9] : memref<1051x324xbf16, #tpu.memory_space<vmem>>, vector<1051x324xbf16>
    %34 = arith.extf %33 : vector<1051x324xbf16> to vector<1051x324xf32>
    %cst_10 = arith.constant dense<0.000000e+00> : vector<8x324xf32>
    %35 = tpu.matmul %32, %34, %cst_10 {dimension_numbers = #tpu.dot_dimension_numbers<[1], [0], [0], [1], [0, 0, 1, 1], [], []>} : vector<8x1051xf32>, vector<1051x324xf32>, vector<8x324xf32> -> vector<8x324xf32>
    %36 = vector.extract_strided_slice %35 {offsets = [0, 0], sizes = [8, 270], strides = [1, 1]} : vector<8x324xf32> to vector<8x270xf32>
    %37 = vector.extract_strided_slice %36 {offsets = [0, 0], sizes = [8, 267], strides = [1, 1]} : vector<8x270xf32> to vector<8x267xf32>
    %38 = vector.extract_strided_slice %36 {offsets = [0, 1], sizes = [8, 267], strides = [1, 1]} : vector<8x270xf32> to vector<8x267xf32>
    %39 = vector.extract_strided_slice %36 {offsets = [0, 2], sizes = [8, 267], strides = [1, 1]} : vector<8x270xf32> to vector<8x267xf32>
    %40 = vector.extract_strided_slice %36 {offsets = [0, 3], sizes = [8, 267], strides = [1, 1]} : vector<8x270xf32> to vector<8x267xf32>
    %41 = vector.extract_strided_slice %35 {offsets = [0, 18], sizes = [8, 270], strides = [1, 1]} : vector<8x324xf32> to vector<8x270xf32>
    %42 = vector.extract_strided_slice %41 {offsets = [0, 0], sizes = [8, 267], strides = [1, 1]} : vector<8x270xf32> to vector<8x267xf32>
    %43 = vector.extract_strided_slice %41 {offsets = [0, 1], sizes = [8, 267], strides = [1, 1]} : vector<8x270xf32> to vector<8x267xf32>
    %44 = vector.extract_strided_slice %41 {offsets = [0, 2], sizes = [8, 267], strides = [1, 1]} : vector<8x270xf32> to vector<8x267xf32>
    %45 = vector.extract_strided_slice %41 {offsets = [0, 3], sizes = [8, 267], strides = [1, 1]} : vector<8x270xf32> to vector<8x267xf32>
    %46 = vector.extract_strided_slice %35 {offsets = [0, 36], sizes = [8, 270], strides = [1, 1]} : vector<8x324xf32> to vector<8x270xf32>
    %47 = vector.extract_strided_slice %46 {offsets = [0, 0], sizes = [8, 267], strides = [1, 1]} : vector<8x270xf32> to vector<8x267xf32>
    %48 = vector.extract_strided_slice %46 {offsets = [0, 1], sizes = [8, 267], strides = [1, 1]} : vector<8x270xf32> to vector<8x267xf32>
    %49 = vector.extract_strided_slice %46 {offsets = [0, 2], sizes = [8, 267], strides = [1, 1]} : vector<8x270xf32> to vector<8x267xf32>
    %50 = vector.extract_strided_slice %46 {offsets = [0, 3], sizes = [8, 267], strides = [1, 1]} : vector<8x270xf32> to vector<8x267xf32>
    %51 = vector.extract_strided_slice %35 {offsets = [0, 54], sizes = [8, 270], strides = [1, 1]} : vector<8x324xf32> to vector<8x270xf32>
    %52 = vector.extract_strided_slice %51 {offsets = [0, 0], sizes = [8, 267], strides = [1, 1]} : vector<8x270xf32> to vector<8x267xf32>
    %53 = vector.extract_strided_slice %51 {offsets = [0, 1], sizes = [8, 267], strides = [1, 1]} : vector<8x270xf32> to vector<8x267xf32>
    %54 = vector.extract_strided_slice %51 {offsets = [0, 2], sizes = [8, 267], strides = [1, 1]} : vector<8x270xf32> to vector<8x267xf32>
    %55 = vector.extract_strided_slice %51 {offsets = [0, 3], sizes = [8, 267], strides = [1, 1]} : vector<8x270xf32> to vector<8x267xf32>
    %56 = tpu.concatenate %37, %38, %39, %40, %42, %43, %44, %45, %47, %48, %49, %50, %52, %53, %54, %55 in 0 : vector<8x267xf32>, vector<8x267xf32>, vector<8x267xf32>, vector<8x267xf32>, vector<8x267xf32>, vector<8x267xf32>, vector<8x267xf32>, vector<8x267xf32>, vector<8x267xf32>, vector<8x267xf32>, vector<8x267xf32>, vector<8x267xf32>, vector<8x267xf32>, vector<8x267xf32>, vector<8x267xf32>, vector<8x267xf32> -> vector<128x267xf32>
    %c0_11 = arith.constant 0 : index
    %c0_12 = arith.constant 0 : index
    %57 = vector.load %arg3[%c0_11, %c0_12] : memref<16x128xf32, #tpu.memory_space<vmem>>, vector<16x128xf32>
    %cst_13 = arith.constant dense<0.000000e+00> : vector<16x267xf32>
    %58 = tpu.matmul %57, %56, %cst_13 {dimension_numbers = #tpu.dot_dimension_numbers<[1], [0], [0], [1], [0, 0, 1, 1], [], []>} : vector<16x128xf32>, vector<128x267xf32>, vector<16x267xf32> -> vector<16x267xf32>
    %c0_14 = arith.constant 0 : index
    %c0_15 = arith.constant 0 : index
    %59 = vector.load %arg8[%c0_14, %c0_15] : memref<16x1xf32, #tpu.memory_space<vmem>>, vector<16x1xf32>
    %60 = vector.broadcast %59 : vector<16x1xf32> to vector<16x267xf32>
    %61 = arith.addf %58, %60 : vector<16x267xf32>
    %c0_16 = arith.constant 0 : index
    %c0_17 = arith.constant 0 : index
    %62 = vector.load %arg15[%c0_16, %c0_17] : memref<1x267xf32, #tpu.memory_space<vmem>>, vector<1x267xf32>
    %63 = vector.broadcast %62 : vector<1x267xf32> to vector<16x267xf32>
    %64 = arith.mulf %61, %63 : vector<16x267xf32>
    %cst_18 = arith.constant dense<0.000000e+00> : vector<16xf32>
    %65 = vector.multi_reduction <add>, %64, %cst_18 [1] : vector<16x267xf32> to vector<16xf32>
    %66 = vector.shape_cast %65 : vector<16xf32> to vector<16x1xf32>
    %cst_19 = arith.constant 0.00444444455 : f32
    %67 = vector.broadcast %cst_19 : f32 to vector<16x1xf32>
    %68 = arith.mulf %66, %67 : vector<16x1xf32>
    %69 = arith.mulf %64, %61 : vector<16x267xf32>
    %cst_20 = arith.constant dense<0.000000e+00> : vector<16xf32>
    %70 = vector.multi_reduction <add>, %69, %cst_20 [1] : vector<16x267xf32> to vector<16xf32>
    %71 = vector.shape_cast %70 : vector<16xf32> to vector<16x1xf32>
    %cst_21 = arith.constant 0.00444444455 : f32
    %72 = vector.broadcast %cst_21 : f32 to vector<16x1xf32>
    %73 = arith.mulf %71, %72 : vector<16x1xf32>
    %74 = arith.mulf %68, %68 : vector<16x1xf32>
    %75 = arith.subf %73, %74 : vector<16x1xf32>
    %cst_22 = arith.constant 0.000000e+00 : f32
    %76 = vector.broadcast %cst_22 : f32 to vector<16x1xf32>
    %77 = arith.maximumf %75, %76 : vector<16x1xf32>
    %78 = vector.broadcast %68 : vector<16x1xf32> to vector<16x267xf32>
    %79 = arith.subf %61, %78 : vector<16x267xf32>
    %cst_23 = arith.constant 9.99999974E-6 : f32
    %80 = vector.broadcast %cst_23 : f32 to vector<16x1xf32>
    %81 = arith.addf %77, %80 : vector<16x1xf32>
    %82 = math.rsqrt %81 : vector<16x1xf32>
    %83 = vector.broadcast %82 : vector<16x1xf32> to vector<16x267xf32>
    %84 = arith.mulf %79, %83 : vector<16x267xf32>
    %85 = vector.broadcast %62 : vector<1x267xf32> to vector<16x267xf32>
    %86 = arith.mulf %84, %85 : vector<16x267xf32>
    %cst_24 = arith.constant 0.000000e+00 : f32
    %87 = vector.broadcast %cst_24 : f32 to vector<16x267xf32>
    %88 = arith.cmpf oge, %86, %87 : vector<16x267xf32>
    %cst_25 = arith.constant 2.000000e-01 : f32
    %89 = vector.broadcast %cst_25 : f32 to vector<16x267xf32>
    %90 = arith.mulf %89, %86 : vector<16x267xf32>
    %91 = arith.select %88, %86, %90 : vector<16x267xi1>, vector<16x267xf32>
    %c0_26 = arith.constant 0 : index
    %c0_27 = arith.constant 0 : index
    %92 = vector.load %arg13[%c0_26, %c0_27] : memref<267x100xbf16, #tpu.memory_space<vmem>>, vector<267x100xbf16>
    %93 = arith.extf %92 : vector<267x100xbf16> to vector<267x100xf32>
    %cst_28 = arith.constant dense<0.000000e+00> : vector<16x100xf32>
    %94 = tpu.matmul %91, %93, %cst_28 {dimension_numbers = #tpu.dot_dimension_numbers<[1], [0], [0], [1], [0, 0, 1, 1], [], []>} : vector<16x267xf32>, vector<267x100xf32>, vector<16x100xf32> -> vector<16x100xf32>
    %95 = vector.extract_strided_slice %94 {offsets = [0, 0], sizes = [16, 70], strides = [1, 1]} : vector<16x100xf32> to vector<16x70xf32>
    %96 = vector.extract_strided_slice %95 {offsets = [0, 0], sizes = [16, 67], strides = [1, 1]} : vector<16x70xf32> to vector<16x67xf32>
    %97 = vector.extract_strided_slice %95 {offsets = [0, 1], sizes = [16, 67], strides = [1, 1]} : vector<16x70xf32> to vector<16x67xf32>
    %98 = vector.extract_strided_slice %95 {offsets = [0, 2], sizes = [16, 67], strides = [1, 1]} : vector<16x70xf32> to vector<16x67xf32>
    %99 = vector.extract_strided_slice %95 {offsets = [0, 3], sizes = [16, 67], strides = [1, 1]} : vector<16x70xf32> to vector<16x67xf32>
    %100 = vector.extract_strided_slice %94 {offsets = [0, 10], sizes = [16, 70], strides = [1, 1]} : vector<16x100xf32> to vector<16x70xf32>
    %101 = vector.extract_strided_slice %100 {offsets = [0, 0], sizes = [16, 67], strides = [1, 1]} : vector<16x70xf32> to vector<16x67xf32>
    %102 = vector.extract_strided_slice %100 {offsets = [0, 1], sizes = [16, 67], strides = [1, 1]} : vector<16x70xf32> to vector<16x67xf32>
    %103 = vector.extract_strided_slice %100 {offsets = [0, 2], sizes = [16, 67], strides = [1, 1]} : vector<16x70xf32> to vector<16x67xf32>
    %104 = vector.extract_strided_slice %100 {offsets = [0, 3], sizes = [16, 67], strides = [1, 1]} : vector<16x70xf32> to vector<16x67xf32>
    %105 = vector.extract_strided_slice %94 {offsets = [0, 20], sizes = [16, 70], strides = [1, 1]} : vector<16x100xf32> to vector<16x70xf32>
    %106 = vector.extract_strided_slice %105 {offsets = [0, 0], sizes = [16, 67], strides = [1, 1]} : vector<16x70xf32> to vector<16x67xf32>
    %107 = vector.extract_strided_slice %105 {offsets = [0, 1], sizes = [16, 67], strides = [1, 1]} : vector<16x70xf32> to vector<16x67xf32>
    %108 = vector.extract_strided_slice %105 {offsets = [0, 2], sizes = [16, 67], strides = [1, 1]} : vector<16x70xf32> to vector<16x67xf32>
    %109 = vector.extract_strided_slice %105 {offsets = [0, 3], sizes = [16, 67], strides = [1, 1]} : vector<16x70xf32> to vector<16x67xf32>
    %110 = vector.extract_strided_slice %94 {offsets = [0, 30], sizes = [16, 70], strides = [1, 1]} : vector<16x100xf32> to vector<16x70xf32>
    %111 = vector.extract_strided_slice %110 {offsets = [0, 0], sizes = [16, 67], strides = [1, 1]} : vector<16x70xf32> to vector<16x67xf32>
    %112 = vector.extract_strided_slice %110 {offsets = [0, 1], sizes = [16, 67], strides = [1, 1]} : vector<16x70xf32> to vector<16x67xf32>
    %113 = vector.extract_strided_slice %110 {offsets = [0, 2], sizes = [16, 67], strides = [1, 1]} : vector<16x70xf32> to vector<16x67xf32>
    %114 = vector.extract_strided_slice %110 {offsets = [0, 3], sizes = [16, 67], strides = [1, 1]} : vector<16x70xf32> to vector<16x67xf32>
    %115 = tpu.concatenate %96, %97, %98, %99, %101, %102, %103, %104, %106, %107, %108, %109, %111, %112, %113, %114 in 0 : vector<16x67xf32>, vector<16x67xf32>, vector<16x67xf32>, vector<16x67xf32>, vector<16x67xf32>, vector<16x67xf32>, vector<16x67xf32>, vector<16x67xf32>, vector<16x67xf32>, vector<16x67xf32>, vector<16x67xf32>, vector<16x67xf32>, vector<16x67xf32>, vector<16x67xf32>, vector<16x67xf32>, vector<16x67xf32> -> vector<256x67xf32>
    %c0_29 = arith.constant 0 : index
    %c0_30 = arith.constant 0 : index
    %116 = vector.load %arg4[%c0_29, %c0_30] : memref<32x256xf32, #tpu.memory_space<vmem>>, vector<32x256xf32>
    %cst_31 = arith.constant dense<0.000000e+00> : vector<32x67xf32>
    %117 = tpu.matmul %116, %115, %cst_31 {dimension_numbers = #tpu.dot_dimension_numbers<[1], [0], [0], [1], [0, 0, 1, 1], [], []>} : vector<32x256xf32>, vector<256x67xf32>, vector<32x67xf32> -> vector<32x67xf32>
    %c0_32 = arith.constant 0 : index
    %c0_33 = arith.constant 0 : index
    %118 = vector.load %arg9[%c0_32, %c0_33] : memref<32x1xf32, #tpu.memory_space<vmem>>, vector<32x1xf32>
    %119 = vector.broadcast %118 : vector<32x1xf32> to vector<32x67xf32>
    %120 = arith.addf %117, %119 : vector<32x67xf32>
    %c0_34 = arith.constant 0 : index
    %c0_35 = arith.constant 0 : index
    %121 = vector.load %arg16[%c0_34, %c0_35] : memref<1x67xf32, #tpu.memory_space<vmem>>, vector<1x67xf32>
    %122 = vector.broadcast %121 : vector<1x67xf32> to vector<32x67xf32>
    %123 = arith.mulf %120, %122 : vector<32x67xf32>
    %cst_36 = arith.constant dense<0.000000e+00> : vector<32xf32>
    %124 = vector.multi_reduction <add>, %123, %cst_36 [1] : vector<32x67xf32> to vector<32xf32>
    %125 = vector.shape_cast %124 : vector<32xf32> to vector<32x1xf32>
    %cst_37 = arith.constant 0.0204081628 : f32
    %126 = vector.broadcast %cst_37 : f32 to vector<32x1xf32>
    %127 = arith.mulf %125, %126 : vector<32x1xf32>
    %128 = arith.mulf %123, %120 : vector<32x67xf32>
    %cst_38 = arith.constant dense<0.000000e+00> : vector<32xf32>
    %129 = vector.multi_reduction <add>, %128, %cst_38 [1] : vector<32x67xf32> to vector<32xf32>
    %130 = vector.shape_cast %129 : vector<32xf32> to vector<32x1xf32>
    %cst_39 = arith.constant 0.0204081628 : f32
    %131 = vector.broadcast %cst_39 : f32 to vector<32x1xf32>
    %132 = arith.mulf %130, %131 : vector<32x1xf32>
    %133 = arith.mulf %127, %127 : vector<32x1xf32>
    %134 = arith.subf %132, %133 : vector<32x1xf32>
    %cst_40 = arith.constant 0.000000e+00 : f32
    %135 = vector.broadcast %cst_40 : f32 to vector<32x1xf32>
    %136 = arith.maximumf %134, %135 : vector<32x1xf32>
    %137 = vector.broadcast %127 : vector<32x1xf32> to vector<32x67xf32>
    %138 = arith.subf %120, %137 : vector<32x67xf32>
    %cst_41 = arith.constant 9.99999974E-6 : f32
    %139 = vector.broadcast %cst_41 : f32 to vector<32x1xf32>
    %140 = arith.addf %136, %139 : vector<32x1xf32>
    %141 = math.rsqrt %140 : vector<32x1xf32>
    %142 = vector.broadcast %141 : vector<32x1xf32> to vector<32x67xf32>
    %143 = arith.mulf %138, %142 : vector<32x67xf32>
    %144 = vector.broadcast %121 : vector<1x67xf32> to vector<32x67xf32>
    %145 = arith.mulf %143, %144 : vector<32x67xf32>
    %cst_42 = arith.constant 0.000000e+00 : f32
    %146 = vector.broadcast %cst_42 : f32 to vector<32x67xf32>
    %147 = arith.cmpf oge, %145, %146 : vector<32x67xf32>
    %cst_43 = arith.constant 2.000000e-01 : f32
    %148 = vector.broadcast %cst_43 : f32 to vector<32x67xf32>
    %149 = arith.mulf %148, %145 : vector<32x67xf32>
    %150 = arith.select %147, %145, %149 : vector<32x67xi1>, vector<32x67xf32>
    %c0_44 = arith.constant 0 : index
    %c0_45 = arith.constant 0 : index
    %151 = vector.load %arg14[%c0_44, %c0_45] : memref<67x36xbf16, #tpu.memory_space<vmem>>, vector<67x36xbf16>
    %152 = arith.extf %151 : vector<67x36xbf16> to vector<67x36xf32>
    %cst_46 = arith.constant dense<0.000000e+00> : vector<32x36xf32>
    %153 = tpu.matmul %150, %152, %cst_46 {dimension_numbers = #tpu.dot_dimension_numbers<[1], [0], [0], [1], [0, 0, 1, 1], [], []>} : vector<32x67xf32>, vector<67x36xf32>, vector<32x36xf32> -> vector<32x36xf32>
    %154 = vector.extract_strided_slice %153 {offsets = [0, 0], sizes = [32, 18], strides = [1, 1]} : vector<32x36xf32> to vector<32x18xf32>
    %155 = vector.extract_strided_slice %154 {offsets = [0, 0], sizes = [32, 15], strides = [1, 1]} : vector<32x18xf32> to vector<32x15xf32>
    %156 = vector.extract_strided_slice %154 {offsets = [0, 1], sizes = [32, 15], strides = [1, 1]} : vector<32x18xf32> to vector<32x15xf32>
    %157 = vector.extract_strided_slice %154 {offsets = [0, 2], sizes = [32, 15], strides = [1, 1]} : vector<32x18xf32> to vector<32x15xf32>
    %158 = vector.extract_strided_slice %154 {offsets = [0, 3], sizes = [32, 15], strides = [1, 1]} : vector<32x18xf32> to vector<32x15xf32>
    %159 = vector.extract_strided_slice %153 {offsets = [0, 6], sizes = [32, 18], strides = [1, 1]} : vector<32x36xf32> to vector<32x18xf32>
    %160 = vector.extract_strided_slice %159 {offsets = [0, 0], sizes = [32, 15], strides = [1, 1]} : vector<32x18xf32> to vector<32x15xf32>
    %161 = vector.extract_strided_slice %159 {offsets = [0, 1], sizes = [32, 15], strides = [1, 1]} : vector<32x18xf32> to vector<32x15xf32>
    %162 = vector.extract_strided_slice %159 {offsets = [0, 2], sizes = [32, 15], strides = [1, 1]} : vector<32x18xf32> to vector<32x15xf32>
    %163 = vector.extract_strided_slice %159 {offsets = [0, 3], sizes = [32, 15], strides = [1, 1]} : vector<32x18xf32> to vector<32x15xf32>
    %164 = vector.extract_strided_slice %153 {offsets = [0, 12], sizes = [32, 18], strides = [1, 1]} : vector<32x36xf32> to vector<32x18xf32>
    %165 = vector.extract_strided_slice %164 {offsets = [0, 0], sizes = [32, 15], strides = [1, 1]} : vector<32x18xf32> to vector<32x15xf32>
    %166 = vector.extract_strided_slice %164 {offsets = [0, 1], sizes = [32, 15], strides = [1, 1]} : vector<32x18xf32> to vector<32x15xf32>
    %167 = vector.extract_strided_slice %164 {offsets = [0, 2], sizes = [32, 15], strides = [1, 1]} : vector<32x18xf32> to vector<32x15xf32>
    %168 = vector.extract_strided_slice %164 {offsets = [0, 3], sizes = [32, 15], strides = [1, 1]} : vector<32x18xf32> to vector<32x15xf32>
    %169 = vector.extract_strided_slice %153 {offsets = [0, 18], sizes = [32, 18], strides = [1, 1]} : vector<32x36xf32> to vector<32x18xf32>
    %170 = vector.extract_strided_slice %169 {offsets = [0, 0], sizes = [32, 15], strides = [1, 1]} : vector<32x18xf32> to vector<32x15xf32>
    %171 = vector.extract_strided_slice %169 {offsets = [0, 1], sizes = [32, 15], strides = [1, 1]} : vector<32x18xf32> to vector<32x15xf32>
    %172 = vector.extract_strided_slice %169 {offsets = [0, 2], sizes = [32, 15], strides = [1, 1]} : vector<32x18xf32> to vector<32x15xf32>
    %173 = vector.extract_strided_slice %169 {offsets = [0, 3], sizes = [32, 15], strides = [1, 1]} : vector<32x18xf32> to vector<32x15xf32>
    %174 = tpu.concatenate %155, %156, %157, %158, %160, %161, %162, %163, %165, %166, %167, %168, %170, %171, %172, %173 in 0 : vector<32x15xf32>, vector<32x15xf32>, vector<32x15xf32>, vector<32x15xf32>, vector<32x15xf32>, vector<32x15xf32>, vector<32x15xf32>, vector<32x15xf32>, vector<32x15xf32>, vector<32x15xf32>, vector<32x15xf32>, vector<32x15xf32>, vector<32x15xf32>, vector<32x15xf32>, vector<32x15xf32>, vector<32x15xf32> -> vector<512x15xf32>
    %c0_47 = arith.constant 0 : index
    %c0_48 = arith.constant 0 : index
    %175 = vector.load %arg5[%c0_47, %c0_48] : memref<64x512xf32, #tpu.memory_space<vmem>>, vector<64x512xf32>
    %cst_49 = arith.constant dense<0.000000e+00> : vector<64x15xf32>
    %176 = tpu.matmul %175, %174, %cst_49 {dimension_numbers = #tpu.dot_dimension_numbers<[1], [0], [0], [1], [0, 0, 1, 1], [], []>} : vector<64x512xf32>, vector<512x15xf32>, vector<64x15xf32> -> vector<64x15xf32>
    %c0_50 = arith.constant 0 : index
    %c0_51 = arith.constant 0 : index
    %177 = vector.load %arg10[%c0_50, %c0_51] : memref<64x1xf32, #tpu.memory_space<vmem>>, vector<64x1xf32>
    %178 = vector.broadcast %177 : vector<64x1xf32> to vector<64x15xf32>
    %179 = arith.addf %176, %178 : vector<64x15xf32>
    %c0_52 = arith.constant 0 : index
    %c0_53 = arith.constant 0 : index
    %180 = vector.load %arg17[%c0_52, %c0_53] : memref<1x15xf32, #tpu.memory_space<vmem>>, vector<1x15xf32>
    %181 = vector.broadcast %180 : vector<1x15xf32> to vector<64x15xf32>
    %182 = arith.mulf %179, %181 : vector<64x15xf32>
    %cst_54 = arith.constant dense<0.000000e+00> : vector<64xf32>
    %183 = vector.multi_reduction <add>, %182, %cst_54 [1] : vector<64x15xf32> to vector<64xf32>
    %184 = vector.shape_cast %183 : vector<64xf32> to vector<64x1xf32>
    %cst_55 = arith.constant 0.111111112 : f32
    %185 = vector.broadcast %cst_55 : f32 to vector<64x1xf32>
    %186 = arith.mulf %184, %185 : vector<64x1xf32>
    %187 = arith.mulf %182, %179 : vector<64x15xf32>
    %cst_56 = arith.constant dense<0.000000e+00> : vector<64xf32>
    %188 = vector.multi_reduction <add>, %187, %cst_56 [1] : vector<64x15xf32> to vector<64xf32>
    %189 = vector.shape_cast %188 : vector<64xf32> to vector<64x1xf32>
    %cst_57 = arith.constant 0.111111112 : f32
    %190 = vector.broadcast %cst_57 : f32 to vector<64x1xf32>
    %191 = arith.mulf %189, %190 : vector<64x1xf32>
    %192 = arith.mulf %186, %186 : vector<64x1xf32>
    %193 = arith.subf %191, %192 : vector<64x1xf32>
    %cst_58 = arith.constant 0.000000e+00 : f32
    %194 = vector.broadcast %cst_58 : f32 to vector<64x1xf32>
    %195 = arith.maximumf %193, %194 : vector<64x1xf32>
    %196 = vector.broadcast %186 : vector<64x1xf32> to vector<64x15xf32>
    %197 = arith.subf %179, %196 : vector<64x15xf32>
    %cst_59 = arith.constant 9.99999974E-6 : f32
    %198 = vector.broadcast %cst_59 : f32 to vector<64x1xf32>
    %199 = arith.addf %195, %198 : vector<64x1xf32>
    %200 = math.rsqrt %199 : vector<64x1xf32>
    %201 = vector.broadcast %200 : vector<64x1xf32> to vector<64x15xf32>
    %202 = arith.mulf %197, %201 : vector<64x15xf32>
    %203 = vector.broadcast %180 : vector<1x15xf32> to vector<64x15xf32>
    %204 = arith.mulf %202, %203 : vector<64x15xf32>
    %cst_60 = arith.constant 0.000000e+00 : f32
    %205 = vector.broadcast %cst_60 : f32 to vector<64x15xf32>
    %206 = arith.cmpf oge, %204, %205 : vector<64x15xf32>
    %cst_61 = arith.constant 2.000000e-01 : f32
    %207 = vector.broadcast %cst_61 : f32 to vector<64x15xf32>
    %208 = arith.mulf %207, %204 : vector<64x15xf32>
    %209 = arith.select %206, %204, %208 : vector<64x15xi1>, vector<64x15xf32>
    %cst_62 = arith.constant 0.000000e+00 : f32
    %210 = vector.broadcast %cst_62 : f32 to vector<64x7xf32>
    %cst_63 = arith.constant 0.000000e+00 : f32
    %211 = vector.broadcast %cst_63 : f32 to vector<64x14xf32>
    %212 = tpu.concatenate %210, %209, %211 in 1 : vector<64x7xf32>, vector<64x15xf32>, vector<64x14xf32> -> vector<64x36xf32>
    %213 = vector.extract_strided_slice %212 {offsets = [0, 0], sizes = [64, 11], strides = [1, 1]} : vector<64x36xf32> to vector<64x11xf32>
    %214 = vector.extract_strided_slice %213 {offsets = [0, 0], sizes = [64, 8], strides = [1, 1]} : vector<64x11xf32> to vector<64x8xf32>
    %215 = vector.extract_strided_slice %213 {offsets = [0, 1], sizes = [64, 8], strides = [1, 1]} : vector<64x11xf32> to vector<64x8xf32>
    %216 = vector.extract_strided_slice %213 {offsets = [0, 2], sizes = [64, 8], strides = [1, 1]} : vector<64x11xf32> to vector<64x8xf32>
    %217 = vector.extract_strided_slice %213 {offsets = [0, 3], sizes = [64, 8], strides = [1, 1]} : vector<64x11xf32> to vector<64x8xf32>
    %218 = vector.extract_strided_slice %212 {offsets = [0, 6], sizes = [64, 11], strides = [1, 1]} : vector<64x36xf32> to vector<64x11xf32>
    %219 = vector.extract_strided_slice %218 {offsets = [0, 0], sizes = [64, 8], strides = [1, 1]} : vector<64x11xf32> to vector<64x8xf32>
    %220 = vector.extract_strided_slice %218 {offsets = [0, 1], sizes = [64, 8], strides = [1, 1]} : vector<64x11xf32> to vector<64x8xf32>
    %221 = vector.extract_strided_slice %218 {offsets = [0, 2], sizes = [64, 8], strides = [1, 1]} : vector<64x11xf32> to vector<64x8xf32>
    %222 = vector.extract_strided_slice %218 {offsets = [0, 3], sizes = [64, 8], strides = [1, 1]} : vector<64x11xf32> to vector<64x8xf32>
    %223 = vector.extract_strided_slice %212 {offsets = [0, 12], sizes = [64, 11], strides = [1, 1]} : vector<64x36xf32> to vector<64x11xf32>
    %224 = vector.extract_strided_slice %223 {offsets = [0, 0], sizes = [64, 8], strides = [1, 1]} : vector<64x11xf32> to vector<64x8xf32>
    %225 = vector.extract_strided_slice %223 {offsets = [0, 1], sizes = [64, 8], strides = [1, 1]} : vector<64x11xf32> to vector<64x8xf32>
    %226 = vector.extract_strided_slice %223 {offsets = [0, 2], sizes = [64, 8], strides = [1, 1]} : vector<64x11xf32> to vector<64x8xf32>
    %227 = vector.extract_strided_slice %223 {offsets = [0, 3], sizes = [64, 8], strides = [1, 1]} : vector<64x11xf32> to vector<64x8xf32>
    %228 = vector.extract_strided_slice %212 {offsets = [0, 18], sizes = [64, 11], strides = [1, 1]} : vector<64x36xf32> to vector<64x11xf32>
    %229 = vector.extract_strided_slice %228 {offsets = [0, 0], sizes = [64, 8], strides = [1, 1]} : vector<64x11xf32> to vector<64x8xf32>
    %230 = vector.extract_strided_slice %228 {offsets = [0, 1], sizes = [64, 8], strides = [1, 1]} : vector<64x11xf32> to vector<64x8xf32>
    %231 = vector.extract_strided_slice %228 {offsets = [0, 2], sizes = [64, 8], strides = [1, 1]} : vector<64x11xf32> to vector<64x8xf32>
    %232 = vector.extract_strided_slice %228 {offsets = [0, 3], sizes = [64, 8], strides = [1, 1]} : vector<64x11xf32> to vector<64x8xf32>
    %233 = tpu.concatenate %214, %215, %216, %217, %219, %220, %221, %222, %224, %225, %226, %227, %229, %230, %231, %232 in 0 : vector<64x8xf32>, vector<64x8xf32>, vector<64x8xf32>, vector<64x8xf32>, vector<64x8xf32>, vector<64x8xf32>, vector<64x8xf32>, vector<64x8xf32>, vector<64x8xf32>, vector<64x8xf32>, vector<64x8xf32>, vector<64x8xf32>, vector<64x8xf32>, vector<64x8xf32>, vector<64x8xf32>, vector<64x8xf32> -> vector<1024x8xf32>
    %c0_64 = arith.constant 0 : index
    %c0_65 = arith.constant 0 : index
    %234 = vector.load %arg6[%c0_64, %c0_65] : memref<1x1024xf32, #tpu.memory_space<vmem>>, vector<1x1024xf32>
    %cst_66 = arith.constant dense<0.000000e+00> : vector<1x8xf32>
    %235 = tpu.matmul %234, %233, %cst_66 {dimension_numbers = #tpu.dot_dimension_numbers<[1], [0], [0], [1], [0, 0, 1, 1], [], []>} : vector<1x1024xf32>, vector<1024x8xf32>, vector<1x8xf32> -> vector<1x8xf32>
    %c0_67 = arith.constant 0 : index
    %c0_68 = arith.constant 0 : index
    %236 = vector.load %arg11[%c0_67, %c0_68] : memref<1x1xf32, #tpu.memory_space<vmem>>, vector<1x1xf32>
    %237 = vector.broadcast %236 : vector<1x1xf32> to vector<1x8xf32>
    %238 = arith.addf %235, %237 : vector<1x8xf32>
    %c0_69 = arith.constant 0 : index
    %c0_70 = arith.constant 0 : index
    %c0_71 = arith.constant 0 : index
    %239 = vector.load %arg18[%c0_69, %c0_70, %c0_71] : memref<1x1x8xf32, #tpu.memory_space<vmem>>, vector<1x1x8xf32>
    %240 = vector.shape_cast %239 : vector<1x1x8xf32> to vector<1x8xf32>
    %241 = vector.shape_cast %238 : vector<1x8xf32> to vector<1x1x8xf32>
    tpu.vector_store %arg18[%c0_69, %c0_70, %c0_71], %241 {strides = array<i32>} : memref<1x1x8xf32, #tpu.memory_space<vmem>>, vector<1x1x8xf32>,
    return
  }
  func.func @transform_0(%arg0: i32) -> (i32, i32, i32) {
    %c0_i32 = arith.constant 0 : i32
    %c0_i32_0 = arith.constant 0 : i32
    %c0_i32_1 = arith.constant 0 : i32
    return %arg0, %c0_i32, %c0_i32_0 : i32, i32, i32
  }
  func.func @transform_1(%arg0: i32) -> (i32, i32) {
    %c0_i32 = arith.constant 0 : i32
    %c0_i32_0 = arith.constant 0 : i32
    %c0_i32_1 = arith.constant 0 : i32
    return %c0_i32, %c0_i32_0 : i32, i32
  }
  func.func @transform_2(%arg0: i32) -> (i32, i32) {
    %c0_i32 = arith.constant 0 : i32
    %c0_i32_0 = arith.constant 0 : i32
    %c0_i32_1 = arith.constant 0 : i32
    return %c0_i32, %c0_i32_0 : i32, i32
  }
  func.func @transform_3(%arg0: i32) -> (i32, i32) {
    %c0_i32 = arith.constant 0 : i32
    %c0_i32_0 = arith.constant 0 : i32
    %c0_i32_1 = arith.constant 0 : i32
    return %c0_i32, %c0_i32_0 : i32, i32
  }
  func.func @transform_4(%arg0: i32) -> (i32, i32) {
    %c0_i32 = arith.constant 0 : i32
    %c0_i32_0 = arith.constant 0 : i32
    %c0_i32_1 = arith.constant 0 : i32
    return %c0_i32, %c0_i32_0 : i32, i32
  }
  func.func @transform_5(%arg0: i32) -> (i32, i32) {
    %c0_i32 = arith.constant 0 : i32
    %c0_i32_0 = arith.constant 0 : i32
    %c0_i32_1 = arith.constant 0 : i32
    return %c0_i32, %c0_i32_0 : i32, i32
  }
  func.func @transform_6(%arg0: i32) -> (i32, i32) {
    %c0_i32 = arith.constant 0 : i32
    %c0_i32_0 = arith.constant 0 : i32
    %c0_i32_1 = arith.constant 0 : i32
    return %c0_i32, %c0_i32_0 : i32, i32
  }
  func.func @transform_7(%arg0: i32) -> (i32, i32) {
    %c0_i32 = arith.constant 0 : i32
    %c0_i32_0 = arith.constant 0 : i32
    %c0_i32_1 = arith.constant 0 : i32
    return %c0_i32, %c0_i32_0 : i32, i32
  }
  func.func @transform_8(%arg0: i32) -> (i32, i32) {
    %c0_i32 = arith.constant 0 : i32
    %c0_i32_0 = arith.constant 0 : i32
    %c0_i32_1 = arith.constant 0 : i32
    return %c0_i32, %c0_i32_0 : i32, i32
  }
  func.func @transform_9(%arg0: i32) -> (i32, i32) {
    %c0_i32 = arith.constant 0 : i32
    %c0_i32_0 = arith.constant 0 : i32
    %c0_i32_1 = arith.constant 0 : i32
    return %c0_i32, %c0_i32_0 : i32, i32
  }
  func.func @transform_10(%arg0: i32) -> (i32, i32) {
    %c0_i32 = arith.constant 0 : i32
    %c0_i32_0 = arith.constant 0 : i32
    %c0_i32_1 = arith.constant 0 : i32
    return %c0_i32, %c0_i32_0 : i32, i32
  }
  func.func @transform_11(%arg0: i32) -> (i32, i32) {
    %c0_i32 = arith.constant 0 : i32
    %c0_i32_0 = arith.constant 0 : i32
    %c0_i32_1 = arith.constant 0 : i32
    return %c0_i32, %c0_i32_0 : i32, i32
  }
  func.func @transform_12(%arg0: i32) -> (i32, i32) {
    %c0_i32 = arith.constant 0 : i32
    %c0_i32_0 = arith.constant 0 : i32
    %c0_i32_1 = arith.constant 0 : i32
    return %c0_i32, %c0_i32_0 : i32, i32
  }
  func.func @transform_13(%arg0: i32) -> (i32, i32) {
    %c0_i32 = arith.constant 0 : i32
    %c0_i32_0 = arith.constant 0 : i32
    %c0_i32_1 = arith.constant 0 : i32
    return %c0_i32, %c0_i32_0 : i32, i32
  }
  func.func @transform_14(%arg0: i32) -> (i32, i32) {
    %c0_i32 = arith.constant 0 : i32
    %c0_i32_0 = arith.constant 0 : i32
    %c0_i32_1 = arith.constant 0 : i32
    return %c0_i32, %c0_i32_0 : i32, i32
  }
  func.func @transform_15(%arg0: i32) -> (i32, i32) {
    %c0_i32 = arith.constant 0 : i32
    %c0_i32_0 = arith.constant 0 : i32
    %c0_i32_1 = arith.constant 0 : i32
    return %c0_i32, %c0_i32_0 : i32, i32
  }
  func.func @transform_16(%arg0: i32) -> (i32, i32) {
    %c0_i32 = arith.constant 0 : i32
    %c0_i32_0 = arith.constant 0 : i32
    %c0_i32_1 = arith.constant 0 : i32
    return %c0_i32, %c0_i32_0 : i32, i32
  }
  func.func @transform_17(%arg0: i32) -> (i32, i32, i32) {
    %c0_i32 = arith.constant 0 : i32
    %c0_i32_0 = arith.constant 0 : i32
    %c0_i32_1 = arith.constant 0 : i32
    return %arg0, %c0_i32, %c0_i32_0 : i32, i32, i32
  }
}

</mosaic_0001>

<bundles_post_ra>
// kernel: forward.1
= control target key start
LH: loop header
LB: loop body
LE: loop exit
PB: predicated region body
PF: predicated region fallthrough
CT: control target
= control target key end

     0   :  { %s9631_s0 = inlined_call_operand.vmem [shape: f32[2,1,1156], index: 0, kind: input, shape index: {}]   ;;  %s9632_s1 = inlined_call_operand.hbm [shape: f32[8,16], index: 1, kind: input, shape index: {}]   ;;  %s9633_s2 = inlined_call_operand.hbm [shape: f32[16,128], index: 2, kind: input, shape index: {}]   ;;  %s9634_s3 = inlined_call_operand.hbm [shape: f32[32,256], index: 3, kind: input, shape index: {}]   ;;  %s9635_s4 = inlined_call_operand.vmem [shape: f32[64,512], index: 4, kind: input, shape index: {}]   ;;  %s9636_s5 = inlined_call_operand.hbm [shape: f32[1,1024], index: 5, kind: input, shape index: {}]   ;;  %s9637_s6 = inlined_call_operand.vmem [shape: f32[8,1], index: 6, kind: input, shape index: {}]   ;;  %s9638_s7 = inlined_call_operand.vmem [shape: f32[16,1], index: 7, kind: input, shape index: {}]   ;;  %s9639_s8 = inlined_call_operand.vmem [shape: f32[32,1], index: 8, kind: input, shape index: {}]   ;;  %s9640_s9 = inlined_call_operand.vmem [shape: f32[64,1], index: 9, kind: input, shape index: {}]   ;;  %s9641_s10 = inlined_call_operand.<no memory space> [shape: f32[1,1], index: 10, kind: input, shape index: {}]   ;;  %s9642_s11 = inlined_call_operand.hbm [shape: bf16[1051,324], index: 11, kind: input, shape index: {}]   ;;  %s9643_s12 = inlined_call_operand.vmem [shape: bf16[267,100], index: 12, kind: input, shape index: {}]   ;;  %s9644_s13 = inlined_call_operand.hbm [shape: bf16[67,36], index: 13, kind: input, shape index: {}]   ;;  %s9645_s14 = inlined_call_operand.vmem [shape: f32[1,267], index: 14, kind: input, shape index: {}]   ;;  %s9646_s15 = inlined_call_operand.vmem [shape: f32[1,67], index: 15, kind: input, shape index: {}]   ;;  %s9647_s16 = inlined_call_operand.hbm [shape: f32[1,15], index: 16, kind: input, shape index: {}]   ;;  %s9648_s17 = inlined_call_operand.vmem [shape: f32[2,1,8], index: 17, kind: output, shape index: {}]  }
   0x1   :  { %9715 = sst [smem:[#allocation55_spill]] %s9631_s0  ;;  %v22_v0 = vstv %s9641_s10 }
   0x2   :  { %9716 = sst [smem:[#allocation56_spill]] %s9632_s1  ;;  %23 = vst [vmem:[#allocation2] sm:$0x1] %v22_v0 }
   0x3   :  { %9717 = sst [smem:[#allocation57_spill]] %s9633_s2 }
   0x4   :  { %9718 = sst [smem:[#allocation58_spill]] %s9634_s3 }
   0x5   :  { %24 = vsyncpa [#allocation4], 0 }
   0x6   :  { %25 = vsyncpa [#allocation6], 0 }
   0x7   :  { %26 = vsyncpa [#allocation9], 0 }
   0x8   :  { %27 = vsyncpa [#allocation12], 0  ;;  %s7026_s26 = smov 0  }
   0x9 LB: > { %s6873_s27 = smov [#allocation5]   ;;  %s7032_s29 = sadd.s32 4294967295, %s6871_s26   ;;  %s6871_s26 = sphi %s7026_s26, %s33_s26  }
   0xa   : > { %s449_s28 = sshll.u32 %s6873_s27, 4  ;;  %p5758_p0 = scmp.ge.s32.totalorder %s6871_s26, 1  ;;  %s450_s28 = int_to_ptr.vmem [resolvable:$true] %s449_s28 }
   0xb   : > { %p426_p1 = scmp.lt.s32.totalorder %s6871_s26, 3  ;;  %p9649_p2 = scmp.eq.s32.totalorder %s7032_s29, 0 }
   0xc   : > { %s6874_s0 = smov [#allocation8]   ;;  %s6875_s19 = smov [#allocation11]  }
   0xd   : > { %p7037_p3 = pnand %p5758_p0, %p426_p1  ;;  %s479_s30 = sshll.u32 %s6874_s0, 4  ;;  %s480_s30 = int_to_ptr.vmem [resolvable:$true] %s479_s30 }
   0xe   : > { %s520_s1 = sshll.u32 %s6875_s19, 4  ;;  %s6678_s21 = scalar_lea.vmem %s450_s28, 256  ;;  %s7049_s1 = int_to_ptr.vmem [resolvable:$true] %s520_s1 }
   0xf   : > { %s9719_s10 = scalar_select %p7037_p3, 1, 0 }
  0x10   : > { %p6533_p4 = pneg %p7037_p3  ;;  %p6679_p7 = scmp.ne.s32.totalorder %s450_s28, %s6678_s21 }
  0x11   : > { %p6686_p10 = scmp.lt.s32.totalorder %s450_s28, %s450_s28  ;;  %p6687_p11 = scmp.lt.s32.totalorder %s6678_s21, %s6678_s21 }
  0x12   : > { %p7045_p5 = pnand %p9649_p2, %p6533_p4 }
  0x13   : > { %p6688_p12 = por %p6687_p11, %p6686_p10 }
  0x14   : > { %p7053_p6 = pneg %p7045_p5 }
  0x16   : > { %p6681_p8 = pnand %p6679_p7, %p7053_p6 }
  0x18   : > { %p6682_p9 = pneg %p6681_p8 }
  0x1a   : > { %p6689_p13 = pnand %p6688_p12, %p6682_p9 }
  0x1c   : > { %6692 = shalt.err (!%p6689_p13)
}
  0x1d   : > { %s6876_s22 = smov 128   ;;  %s6877_s23 = smov 8  }
  0x1e   : > { %s9722_s2 = sld [smem:[#allocation57_spill]]  ;;  %s6704_s27 = scalar_lea.vmem %s480_s30, 128 }
  0x1f   : > { %p6705_p0 = scmp.ne.s32.totalorder %s480_s30, %s6704_s27  ;;  %p6712_p7 = scmp.lt.s32.totalorder %s480_s30, %s480_s30 }
  0x20   : > { %p6713_p8 = scmp.lt.s32.totalorder %s6704_s27, %s6704_s27 }
  0x21   : > { %p6707_p1 = pnand %p6705_p0, %p7053_p6 }
  0x22   : > { %p6714_p2 = por %p6713_p8, %p6712_p7 }
  0x23   : > { %p6708_p4 = pneg %p6707_p1 }
  0x24   : > { %6539 = dma.hbm_to_vmem [thread:$0]  (!%p7045_p5), %s9722_s2, 256, %s450_s28, [#allocation6], %s6876_s22, %s6876_s22, %s6877_s23  }
  0x25   : > { %p6715_p10 = pnand %p6714_p2, %p6708_p4 }
  0x27   : > { %6718 = shalt.err (!%p6715_p10)
}
  0x28   : > { %6545 = dma.hbm_to_vmem [thread:$0]  (!%p7045_p5), %s9636_s5, 128, %s480_s30, [#allocation9]  }
  0x29   : > { %s6730_s28 = scalar_lea.vmem %s7049_s1, 576  ;;  %p6738_p13 = scmp.lt.s32.totalorder %s7049_s1, %s7049_s1 }
  0x2a   : > { %p6731_p9 = scmp.ne.s32.totalorder %s7049_s1, %s6730_s28  ;;  %p6739_p0 = scmp.lt.s32.totalorder %s6730_s28, %s6730_s28 }
  0x2c   : > { %p6733_p11 = pnand %p6731_p9, %p7053_p6  ;;  %p6740_p2 = por %p6739_p0, %p6738_p13 }
  0x2e   : > { %p6734_p12 = pneg %p6733_p11 }
  0x30   : > { %p6741_p1 = pnand %p6740_p2, %p6734_p12 }
  0x32   : > { %6744 = shalt.err (!%p6741_p1)
}
  0x33   : > { %s6878_s21 = smov 64   ;;  %s6879_s22 = smov 4  }
  0x34   : > { %6551 = dma.hbm_to_vmem [thread:$0]  (!%p7045_p5), %s9644_s13, 576, %s7049_s1, [#allocation12], %s6878_s21, %s6878_s21, %s6879_s22  }
  0x35   : > { %s6880_s30 = smov [#allocation3]   ;;  %s6881_s27 = smov [#allocation7]  }
  0x36   : > { %s439_s25 = sshll.u32 %s6880_s30, 4  ;;  %s462_s0 = sshll.u32 %s6881_s27, 4  ;;  %s440_s25 = int_to_ptr.vmem [resolvable:$true] %s439_s25  ;;  %s463_s0 = int_to_ptr.vmem [resolvable:$true] %s462_s0 }
  0x37   : > { %s6756_s19 = scalar_lea.vmem %s440_s25, 128  ;;  %p6764_p10 = scmp.lt.s32.totalorder %s440_s25, %s440_s25 }
  0x38   : > { %p6757_p4 = scmp.ne.s32.totalorder %s440_s25, %s6756_s19  ;;  %p6765_p9 = scmp.lt.s32.totalorder %s6756_s19, %s6756_s19 }
  0x3a   : > { %p6759_p7 = pnand %p6757_p4, %p7053_p6  ;;  %p6766_p11 = por %p6765_p9, %p6764_p10 }
  0x3c   : > { %p6760_p8 = pneg %p6759_p7 }
  0x3e   : > { %p6767_p12 = pnand %p6766_p11, %p6760_p8 }
  0x40   : > { %6770 = shalt.err (!%p6767_p12)
}
  0x41   : > { %s9723_s21 = sld [smem:[#allocation56_spill]]  ;;  %s6782_s22 = scalar_lea.vmem %s463_s0, 1024 }
  0x42   : > { %p6783_p13 = scmp.ne.s32.totalorder %s463_s0, %s6782_s22  ;;  %p6790_p1 = scmp.lt.s32.totalorder %s463_s0, %s463_s0 }
  0x43   : > { %p6791_p4 = scmp.lt.s32.totalorder %s6782_s22, %s6782_s22 }
  0x44   : > { %p6785_p0 = pnand %p6783_p13, %p7053_p6 }
  0x45   : > { %p6792_p7 = por %p6791_p4, %p6790_p1 }
  0x46   : > { %p6786_p2 = pneg %p6785_p0 }
  0x47   : > { %6536 = dma.hbm_to_vmem [thread:$0]  (!%p7045_p5), %s9723_s21, 128, %s440_s25, [#allocation4]  }
  0x48   : > { %p6793_p3 = pnand %p6792_p7, %p6786_p2 }
  0x4a   : > { %6796 = shalt.err (!%p6793_p3)
}
  0x4b   : > { %s6882_s23 = smov 256   ;;  %s6883_s24 = smov 16  }
  0x4c   : > { %s9724_s3 = sld [smem:[#allocation58_spill]]  ;;  %s6884_s25 = smov [#allocation10]  }
  0x4d   : > { %s504_s19 = sshll.u32 %s6884_s25, 4  ;;  %s505_s19 = int_to_ptr.vmem [resolvable:$true] %s504_s19 }
  0x4e   : > { %s6808_s28 = scalar_lea.vmem %s505_s19, 25344  ;;  %p6816_p11 = scmp.lt.s32.totalorder %s505_s19, %s505_s19 }
  0x4f   : > { %p6809_p8 = scmp.ne.s32.totalorder %s505_s19, %s6808_s28  ;;  %p6817_p12 = scmp.lt.s32.totalorder %s6808_s28, %s6808_s28 }
  0x51   : > { %p6811_p10 = pnand %p6809_p8, %p7053_p6  ;;  %p6818_p3 = por %p6817_p12, %p6816_p11 }
  0x52   : > { %6542 = dma.hbm_to_vmem [thread:$0]  (!%p7045_p5), %s9724_s3, 1024, %s463_s0, [#allocation6], %s6882_s23, %s6882_s23, %s6883_s24  }
  0x53   : > { %p6812_p9 = pneg %p6811_p10 }
  0x55   : > { %p6819_p13 = pnand %p6818_p3, %p6812_p9 }
  0x57   : > { %6822 = shalt.err (!%p6819_p13)
}
  0x58   : > { %s6885_s1 = smov 192   ;;  %s6886_s21 = smov 12  }
  0x59   : > { %6548 = dma.hbm_to_vmem [thread:$0]  (!%p7045_p5), %s9642_s11, 25344, %s505_s19, [#allocation9], %s6885_s1, %s6885_s1, %s6886_s21  }
  0x5a   : > { %s6887_s23 = smov [#allocation13]  }
  0x5b   : > { %s540_s24 = sshll.u32 %s6887_s23, 4  ;;  %s541_s24 = int_to_ptr.vmem [resolvable:$true] %s540_s24 }
  0x5c   : > { %s6834_s30 = scalar_lea.vmem %s541_s24, 16  ;;  %s6841_s27 = scalar_lea.vmem %s541_s24, 32 }
  0x5d   : > { %p6835_p0 = scmp.ne.s32.totalorder %s541_s24, %s6834_s30  ;;  %p6842_p4 = scmp.lt.s32.totalorder %s541_s24, %s541_s24 }
  0x5e   : > { %p6843_p7 = scmp.lt.s32.totalorder %s6841_s27, %s6834_s30 }
  0x5f   : > { %p6837_p2 = pnand %p6835_p0, %p7053_p6 }
  0x60   : > { %p6844_p8 = por %p6843_p7, %p6842_p4 }
  0x61   : > { %p6838_p1 = pneg %p6837_p2 }
  0x63   : > { %p6845_p10 = pnand %p6844_p8, %p6838_p1 }
  0x65   : > { %6848 = shalt.err (!%p6845_p10)
}
  0x66   : > { %6554 = dma.hbm_to_vmem [thread:$0]  (!%p7045_p5), %s9647_s16, 16, %s541_s24, [#allocation12]  }
  0x67   : > { %p9725_p9 = scmp.ne.s32.totalorder %s9719_s10, 0 }
  0x69   : > { %560 = sbr.rel (%p9725_p9) target bundleno = 3745 (0xea1), region = 88 }
  0x6e   : > { %p9726_p11 = scmp.eq.s32.totalorder %s7032_s29, 0 }
  0x70   : > { %6854 = dma.done.wait (%p9726_p11), [#allocation4], 128   ;;  %p9727_p6 = pmov %p9726_p11 }
  0x72   : > { %6856 = vsyncadd (%p9727_p6), [#allocation4], 4294967168  ;;  %p9728_p12 = pmov %p9727_p6 }
  0x73   : > { %p9729_p3 = pmov %p9727_p6 }
  0x74   : > { %6858 = dma.done.wait (%p9728_p12), [#allocation6], 1280  }
  0x75   : > { %6860 = vsyncadd (%p9729_p3), [#allocation6], 4294966016  ;;  %p9730_p13 = pmov %p9729_p3 }
  0x76   : > { %p9731_p5 = pmov %p9729_p3 }
  0x77   : > { %6862 = dma.done.wait (%p9730_p13), [#allocation9], 25472  }
  0x78   : > { %6864 = vsyncadd (%p9731_p5), [#allocation9], 4294941824  ;;  %p9732_p0 = pmov %p9729_p3 }
  0x7a   : > { %6866 = dma.done.wait (%p9732_p0), [#allocation12], 592   ;;  %p9733_p2 = pmov %p9732_p0 }
  0x7b   : > { %p633_p1 = scmp.lt.s32.totalorder %s7032_s29, 1  ;;  %v644_v1 = vlaneseq  ;;  %s9735_s19 = sld [smem:[#allocation55_spill]]  ;;  %v9663_v22 = vmov 0.0   ;;  %vm9675_vm0 = vcmask 482304   ;;  %vm9672_vm1 = vcmask 490496  }
  0x7c   : > { %6868 = vsyncadd (%p9733_p2), [#allocation12], 4294966704  ;;  %s9653_s21 = smov 59   ;;  %s9651_s22 = smov 60   ;;  %1453 = vmatprep.mubr.f32.mxu0 %v9663_v22  ;;  %1666 = vmatprep.mubr.f32.mxu1 %v9663_v22  ;;  %vm9677_vm2 = vcmask 474112   ;;  %vm9668_vm3 = vcmask 465920  }
  0x7d   : > { %s9921_s29 = smov (!%p633_p1, %s7032_s29), 1  ;;  %v7133_v2 = vshrl.u32 %v644_v1, 7  ;;  %s6890_s0 = smov 58   ;;  %vm1245_vm4 = vcmask 1040384   ;;  %vm9667_vm5 = vcmask 211968   ;;  %vm1255_vm6 = vcmask 1041408  }
  0x7e   : > { %s6504_s10 = smul.u32 10, %s9921_s29  ;;  %s9681_s23 = smov 127   ;;  %vm9670_vm7 = vcmask 203776   ;;  %vm1265_vm8 = vcmask 1042432   ;;  %vm9669_vm9 = vcmask 195584   ;;  %vm1275_vm10 = vcmask 1043456  }
  0x7f   : > { %9734 = vst [vmem:[#allocation18_spill] sm:$0xff] %v7133_v2  ;;  %v7137_v3 = vsub.s32 1, %v7133_v2  ;;  %v7145_v4 = vsub.s32 2, %v7133_v2  ;;  %v7163_v8 = vsub.s32 0, %v7133_v2  ;;  %s6892_s24 = smov 57   ;;  %s9684_s30 = smov 126  }
  0x80   : > { %s6894_s27 = smov 26   ;;  %s9708_s25 = smov 125   ;;  %v9660_v10 = vsub.s32 4, %v7133_v2  ;;  %v9662_v11 = vsub.s32 3, %v7133_v2  ;;  %v9661_v29 = vsub.s32 5, %v7133_v2  ;;  %v9659_v33 = vsub.s32 6, %v7133_v2 }
  0x81   : > { %s7142_s1 = scalar_lea.vmem %s9735_s19, %s6504_s10  ;;  %9736 = vst [vmem:[#allocation19_spill] sm:$0xff] %v7145_v4  ;;  %s6896_s28 = smov 25   ;;  %v9712_v60 = vsub.s32 7, %v7133_v2  ;;  %vm1285_vm11 = vcmask 1044480   ;;  %vm1295_vm12 = vcmask 1045504   ;;  %vm9671_vm13 = vcmask 187392  }
  0x82   : > { %v7148_v5 = vld [vmem:[%s7142_s1] sm:$0xff]  ;;  %s6897_s10 = smov 94   ;;  %s6898_s18 = smov 24   ;;  %vm1305_vm14 = vcmask 1046528   ;;  %vm707_vm15 = vcmask 1039360  }
  0x83   : > { %v7152_v6 = vrot.slane %v7148_v5, %v7137_v3  ;;  %v7160_v7 = vrot.slane %v7148_v5, %v7145_v4  ;;  %v7171_v9 = vrot.slane %v7148_v5, %v7163_v8  ;;  %s6899_s20 = smov 93   ;;  %v7238_v12 = vrot.slane %v7148_v5, %v9660_v10  ;;  %s9655_s19 = smov 23  }
  0x84   : > { %v7243_v13 = vrot.slane %v7148_v5, %v9662_v11  ;;  %v7363_v32 = vrot.slane %v7148_v5, %v9661_v29  ;;  %v7377_v36 = vrot.slane %v7148_v5, %v9659_v33  ;;  %s9835_s3 = smov 125   ;;  %s9837_s2 = smov 121  }
  0x85   : > { %979 = vrot.lane.b32.xlu1 %v7152_v6, %s9653_s21  ;;  %943 = vrot.lane.b32.xlu0 %v7152_v6, %s9651_s22 }
  0x89   : > { %981 = vrot.lane.b32.xlu1 %v7160_v7, %s9653_s21  ;;  %945 = vrot.lane.b32.xlu0 %v7160_v7, %s9651_s22 }
  0x8d   : > { %977 = vrot.lane.b32.xlu1 %v7171_v9, %s9653_s21  ;;  %941 = vrot.lane.b32.xlu0 %v7171_v9, %s9651_s22 }
  0x91   : > { %1017 = vrot.lane.b32.xlu1 %v7160_v7, %s6890_s0  ;;  %1015 = vrot.lane.b32.xlu0 %v7152_v6, %s6890_s0 }
  0x95   : > { %693 = vrot.lane.b32.xlu1 %v7160_v7, %s9681_s23  ;;  %691 = vrot.lane.b32.xlu0 %v7152_v6, %s9681_s23 }
  0x99   : > { %1051 = vrot.lane.b32.xlu1 %v7152_v6, %s6892_s24  ;;  %1013 = vrot.lane.b32.xlu0 %v7171_v9, %s6890_s0 }
  0x9d   : > { %689 = vrot.lane.b32.xlu1 %v7171_v9, %s9681_s23  ;;  %1053 = vrot.lane.b32.xlu0 %v7160_v7, %s6892_s24 }
  0xa1   : > { %729 = vrot.lane.b32.xlu1 %v7160_v7, %s9684_s30  ;;  %727 = vrot.lane.b32.xlu0 %v7152_v6, %s9684_s30 }
  0xa5   : > { %1091 = vrot.lane.b32.xlu1 %v7152_v6, %s6894_s27  ;;  %1049 = vrot.lane.b32.xlu0 %v7171_v9, %s6892_s24 }
  0xa9   : > { %725 = vrot.lane.b32.xlu1 %v7171_v9, %s9684_s30  ;;  %1093 = vrot.lane.b32.xlu0 %v7160_v7, %s6894_s27 }
  0xad   : > { %765 = vrot.lane.b32.xlu1 %v7160_v7, %s9708_s25  ;;  %763 = vrot.lane.b32.xlu0 %v7152_v6, %s9708_s25 }
  0xb1   : > { %1130 = vrot.lane.b32.xlu1 %v7152_v6, %s6896_s28  ;;  %1089 = vrot.lane.b32.xlu0 %v7171_v9, %s6894_s27 }
  0xb5   : > { %761 = vrot.lane.b32.xlu1 %v7171_v9, %s9708_s25  ;;  %1132 = vrot.lane.b32.xlu0 %v7160_v7, %s6896_s28 }
  0xb9   : > { %801 = vrot.lane.b32.xlu1 %v7160_v7, %s6897_s10  ;;  %799 = vrot.lane.b32.xlu0 %v7152_v6, %s6897_s10 }
  0xbd   : > { %1169 = vrot.lane.b32.xlu1 %v7152_v6, %s6898_s18  ;;  %1128 = vrot.lane.b32.xlu0 %v7171_v9, %s6896_s28 }
  0xc1   : > { %797 = vrot.lane.b32.xlu1 %v7171_v9, %s6897_s10  ;;  %1171 = vrot.lane.b32.xlu0 %v7160_v7, %s6898_s18 }
  0xc5   : > { %837 = vrot.lane.b32.xlu1 %v7160_v7, %s6899_s20  ;;  %835 = vrot.lane.b32.xlu0 %v7152_v6, %s6899_s20 }
  0xc9   : > { %949 = vrot.lane.b32.xlu1 %v7238_v12, %s9651_s22  ;;  %947 = vrot.lane.b32.xlu0 %v7243_v13, %s9651_s22  ;;  %s9657_s22 = smov 92  }
  0xcd   : > { %985 = vrot.lane.b32.xlu1 %v7238_v12, %s9653_s21  ;;  %983 = vrot.lane.b32.xlu0 %v7243_v13, %s9653_s21  ;;  %s9683_s21 = smov 91  }
  0xd1   : > { %1208 = vrot.lane.b32.xlu1 %v7152_v6, %s9655_s19  ;;  %1167 = vrot.lane.b32.xlu0 %v7171_v9, %s6898_s18 }
  0xd5   : > { %833 = vrot.lane.b32.xlu1 %v7171_v9, %s6899_s20  ;;  %1210 = vrot.lane.b32.xlu0 %v7160_v7, %s9655_s19 }
  0xd9   : > { %873 = vrot.lane.b32.xlu1 %v7160_v7, %s9657_s22  ;;  %871 = vrot.lane.b32.xlu0 %v7152_v6, %s9657_s22 }
  0xdd   : > { %1021 = vrot.lane.b32.xlu1 %v7238_v12, %s6890_s0  ;;  %1019 = vrot.lane.b32.xlu0 %v7243_v13, %s6890_s0 }
  0xe1   : > { %695 = vrot.lane.b32.xlu1 %v7243_v13, %s9681_s23  ;;  %1206 = vrot.lane.b32.xlu0 %v7171_v9, %s9655_s19 }
  0xe5   : > { %869 = vrot.lane.b32.xlu1 %v7171_v9, %s9657_s22  ;;  %697 = vrot.lane.b32.xlu0 %v7238_v12, %s9681_s23 }
  0xe9   : > { %909 = vrot.lane.b32.xlu1 %v7160_v7, %s9683_s21  ;;  %907 = vrot.lane.b32.xlu0 %v7152_v6, %s9683_s21 }
  0xed   : > { %1057 = vrot.lane.b32.xlu1 %v7238_v12, %s6892_s24  ;;  %1055 = vrot.lane.b32.xlu0 %v7243_v13, %s6892_s24 }
  0xf1   : > { %733 = vrot.lane.b32.xlu1 %v7238_v12, %s9684_s30  ;;  %731 = vrot.lane.b32.xlu0 %v7243_v13, %s9684_s30 }
  0xf5   : > { %1095 = vrot.lane.b32.xlu1 %v7243_v13, %s6894_s27  ;;  %905 = vrot.lane.b32.xlu0 %v7171_v9, %s9683_s21 }
  0xf7   : > { %v7293_v14 = vpop.permute.xlu1 %979  ;;  %v7295_v15 = vpop.permute.xlu0 %943 }
  0xf9   : > { %767 = vrot.lane.b32.xlu1 %v7243_v13, %s9708_s25  ;;  %1097 = vrot.lane.b32.xlu0 %v7238_v12, %s6894_s27 }
  0xfb   : > { %v7301_v16 = vpop.permute.xlu1 %981  ;;  %v7303_v17 = vpop.permute.xlu0 %945 }
  0xfc   : > { %v997_v57 = vsel %vm9675_vm0, %v7293_v14, %v7301_v16  ;;  %v961_v58 = vsel %vm9672_vm1, %v7295_v15, %v7303_v17 }
  0xfd   : > { %1134 = vrot.lane.b32.xlu1 %v7243_v13, %s6896_s28  ;;  %769 = vrot.lane.b32.xlu0 %v7238_v12, %s9708_s25  ;;  %v1316_v62 = vsel %vm1245_vm4, %v961_v58, %v997_v57  ;;  %v7491_v58 = vrot.slane %v7148_v5, %v9712_v60 }
  0xff   : > { %v7309_v18 = vpop.permute.xlu1 %977  ;;  %v7311_v19 = vpop.permute.xlu0 %941 }
 0x101   : > { %803 = vrot.lane.b32.xlu1 %v7243_v13, %s6897_s10  ;;  %1136 = vrot.lane.b32.xlu0 %v7238_v12, %s6896_s28 }
 0x103   : > { %v7317_v20 = vpop.permute.xlu1 %1017  ;;  %v7319_v21 = vpop.permute.xlu0 %1015 }
 0x104   : > { %v1033_v59 = vsel %vm9677_vm2, %v7319_v21, %v7317_v20 }
 0x105   : > { %1173 = vrot.lane.b32.xlu1 %v7243_v13, %s6898_s18  ;;  %805 = vrot.lane.b32.xlu0 %v7238_v12, %s6897_s10  ;;  %v1325_v33 = vsel %vm1255_vm6, %v1316_v62, %v1033_v59 }
 0x107   : > { %v7327_v23 = vpop.permute.xlu1 %693  ;;  %v7329_v24 = vpop.permute.xlu0 %691 }
 0x109   : > { %839 = vrot.lane.b32.xlu1 %v7243_v13, %s6899_s20  ;;  %1175 = vrot.lane.b32.xlu0 %v7238_v12, %s6898_s18 }
 0x10b   : > { %v7335_v25 = vpop.permute.xlu1 %1051  ;;  %v7337_v26 = vpop.permute.xlu0 %1013 }
 0x10d   : > { %1212 = vrot.lane.b32.xlu1 %v7243_v13, %s9655_s19  ;;  %841 = vrot.lane.b32.xlu0 %v7238_v12, %s6899_s20 }
 0x10f   : > { %v7343_v27 = vpop.permute.xlu1 %689  ;;  %v7345_v28 = vpop.permute.xlu0 %1053 }
 0x110   : > { %v1069_v61 = vsel %vm9668_vm3, %v7335_v25, %v7345_v28 }
 0x111   : > { %875 = vrot.lane.b32.xlu1 %v7243_v13, %s9657_s22  ;;  %1214 = vrot.lane.b32.xlu0 %v7238_v12, %s9655_s19  ;;  %s9737_s19 = smov 60   ;;  %v1334_v29 = vsel %vm1265_vm8, %v1325_v33, %v1069_v61  ;;  %v7495_v33 = vld [vmem:[%s7142_s1 + $0x8] sm:$0x3]  ;;  %s9739_s1 = smov 23  }
 0x113   : > { %v7352_v30 = vpop.permute.xlu1 %729  ;;  %v7354_v31 = vpop.permute.xlu0 %727 }
 0x115   : > { %911 = vrot.lane.b32.xlu1 %v7243_v13, %s9683_s21  ;;  %877 = vrot.lane.b32.xlu0 %v7238_v12, %s9657_s22  ;;  %s9738_s22 = smov 59  }
 0x117   : > { %v7366_v34 = vpop.permute.xlu1 %1091  ;;  %v7368_v35 = vpop.permute.xlu0 %1049 }
 0x119   : > { %951 = vrot.lane.b32.xlu1 %v7363_v32, %s9737_s19  ;;  %913 = vrot.lane.b32.xlu0 %v7238_v12, %s9683_s21 }
 0x11b   : > { %v7379_v37 = vpop.permute.xlu1 %725  ;;  %v7381_v38 = vpop.permute.xlu0 %1093 }
 0x11c   : > { %v1111_v63 = vsel %vm9667_vm5, %v7366_v34, %v7381_v38 }
 0x11d   : > { %987 = vrot.lane.b32.xlu1 %v7363_v32, %s9738_s22  ;;  %953 = vrot.lane.b32.xlu0 %v7377_v36, %s9737_s19  ;;  %v1343_v59 = vsel %vm1275_vm10, %v1334_v29, %v1111_v63  ;;  %v7512_v29 = vrot.slane %v7495_v33, %v7163_v8 }
 0x11f   : > { %v7387_v39 = vpop.permute.xlu1 %765  ;;  %v7389_v40 = vpop.permute.xlu0 %763 }
 0x121   : > { %1023 = vrot.lane.b32.xlu1 %v7363_v32, %s6890_s0  ;;  %989 = vrot.lane.b32.xlu0 %v7377_v36, %s9738_s22 }
 0x123   : > { %v7395_v41 = vpop.permute.xlu1 %1130  ;;  %v7397_v42 = vpop.permute.xlu0 %1089 }
 0x125   : > { %699 = vrot.lane.b32.xlu1 %v7363_v32, %s9681_s23  ;;  %1025 = vrot.lane.b32.xlu0 %v7377_v36, %s6890_s0 }
 0x127   : > { %v7403_v43 = vpop.permute.xlu1 %761  ;;  %v7405_v44 = vpop.permute.xlu0 %1132 }
 0x128   : > { %v1150_v10 = vsel %vm9670_vm7, %v7395_v41, %v7405_v44 }
 0x129   : > { %1059 = vrot.lane.b32.xlu1 %v7363_v32, %s6892_s24  ;;  %701 = vrot.lane.b32.xlu0 %v7377_v36, %s9681_s23  ;;  %v1352_v11 = vsel %vm1285_vm11, %v1343_v59, %v1150_v10 }
 0x12b   : > { %v7411_v45 = vpop.permute.xlu1 %801  ;;  %v7413_v46 = vpop.permute.xlu0 %799 }
 0x12d   : > { %735 = vrot.lane.b32.xlu1 %v7363_v32, %s9684_s30  ;;  %1061 = vrot.lane.b32.xlu0 %v7377_v36, %s6892_s24 }
 0x12f   : > { %v7419_v47 = vpop.permute.xlu1 %1169  ;;  %v7421_v48 = vpop.permute.xlu0 %1128 }
 0x131   : > { %1099 = vrot.lane.b32.xlu1 %v7363_v32, %s6894_s27  ;;  %737 = vrot.lane.b32.xlu0 %v7377_v36, %s9684_s30 }
 0x133   : > { %v7427_v49 = vpop.permute.xlu1 %797  ;;  %v7429_v50 = vpop.permute.xlu0 %1171 }
 0x134   : > { %v1189_v57 = vsel %vm9669_vm9, %v7419_v47, %v7429_v50 }
 0x135   : > { %771 = vrot.lane.b32.xlu1 %v7363_v32, %s9708_s25  ;;  %1101 = vrot.lane.b32.xlu0 %v7377_v36, %s6894_s27  ;;  %v1361_v2 = vsel %vm1295_vm12, %v1352_v11, %v1189_v57  ;;  %v996_v11 = vsel %vm9675_vm0, %v7309_v18, %v7293_v14  ;;  %v960_v57 = vsel %vm9672_vm1, %v7311_v19, %v7295_v15  ;;  %vm9676_vm1 = vcmask 744448  }
 0x136   : > { %v1315_v14 = vsel %vm1245_vm4, %v960_v57, %v996_v11  ;;  %v1110_v15 = vsel %vm9667_vm5, %v7397_v42, %v7366_v34  ;;  %vm743_vm5 = vcmask 1031168  }
 0x137   : > { %v7435_v51 = vpop.permute.xlu1 %837  ;;  %v7437_v52 = vpop.permute.xlu0 %835 }
 0x139   : > { %1138 = vrot.lane.b32.xlu1 %v7363_v32, %s6896_s28  ;;  %773 = vrot.lane.b32.xlu0 %v7377_v36, %s9708_s25 }
 0x13b   : > { %v7443_v53 = vpop.permute.xlu1 %949  ;;  %v7445_v54 = vpop.permute.xlu0 %947 }
 0x13d   : > { %807 = vrot.lane.b32.xlu1 %v7363_v32, %s6897_s10  ;;  %1140 = vrot.lane.b32.xlu0 %v7377_v36, %s6896_s28 }
 0x13f   : > { %v7451_v55 = vpop.permute.xlu1 %985  ;;  %v7453_v56 = vpop.permute.xlu0 %983 }
 0x141   : > { %1177 = vrot.lane.b32.xlu1 %v7363_v32, %s6898_s18  ;;  %809 = vrot.lane.b32.xlu0 %v7377_v36, %s6897_s10 }
 0x143   : > { %v1209_v0 = vpop.permute.xlu1 %1208  ;;  %v1168_v1 = vpop.permute.xlu0 %1167 }
 0x145   : > { %843 = vrot.lane.b32.xlu1 %v7363_v32, %s6899_s20  ;;  %1179 = vrot.lane.b32.xlu0 %v7377_v36, %s6898_s18 }
 0x147   : > { %v7497_v61 = vpop.permute.xlu1 %833  ;;  %v7499_v62 = vpop.permute.xlu0 %1210 }
 0x148   : > { %v1228_v22 = vsel %vm9671_vm13, %v1209_v0, %v7499_v62 }
 0x149   : > { %955 = vrot.lane.b32.xlu1 %v7491_v58, %s9737_s19  ;;  %845 = vrot.lane.b32.xlu0 %v7377_v36, %s6899_s20  ;;  %v1370_v5 = vsel %vm1305_vm14, %v1361_v2, %v1228_v22  ;;  %v1032_v2 = vsel %vm9677_vm2, %v7337_v26, %v7319_v21  ;;  %v1068_v22 = vsel %vm9668_vm3, %v7368_v35, %v7335_v25  ;;  %vm9680_vm3 = vcmask 1022976  }
 0x14a   : > { %1417 = vmatprep.subr.mxu0 %v1370_v5  ;;  %v1324_v21 = vsel %vm1255_vm6, %v1315_v14, %v1032_v2  ;;  %v1149_v26 = vsel %vm9670_vm7, %v7421_v48, %v7395_v41  ;;  %v1188_v25 = vsel %vm9669_vm9, %v1168_v1, %v7419_v47  ;;  %v709_v48 = vsel %vm707_vm15, %v7329_v24, %v7327_v23 }
 0x14b   : > { %v7514_v63 = vpop.permute.xlu1 %873  ;;  %v7516_v10 = vpop.permute.xlu0 %871  ;;  %v1333_v59 = vsel %vm1265_vm8, %v1324_v21, %v1068_v22  ;;  %vm9679_vm9 = vcmask 769024   ;;  %v745_v5 = vsel %vm743_vm5, %v7354_v31, %v7352_v30  ;;  %vm9673_vm7 = vcmask 760832  }
 0x14c   : > { %v1342_v34 = vsel %vm1275_vm10, %v1333_v59, %v1110_v15  ;;  %v781_v57 = vsel %vm9680_vm3, %v7389_v40, %v7387_v39  ;;  %v817_v2 = vsel %vm9679_vm9, %v7413_v46, %v7411_v45  ;;  %v853_v21 = vsel %vm9673_vm7, %v7437_v52, %v7435_v51 }
 0x14d   : > { %991 = vrot.lane.b32.xlu1 %v7491_v58, %s9738_s22  ;;  %957 = vrot.lane.b32.xlu0 %v7512_v29, %s9737_s19  ;;  %v1351_v35 = vsel %vm1285_vm11, %v1342_v34, %v1149_v26  ;;  %s6911_s19 = smov 89  }
 0x14e   : > { %v1360_v1 = vsel %vm1295_vm12, %v1351_v35, %v1188_v25 }
 0x14f   : > { %v7538_v18 = vpop.permute.xlu1 %1021  ;;  %v7540_v19 = vpop.permute.xlu0 %1019 }
 0x151   : > { %1216 = vrot.lane.b32.xlu1 %v7363_v32, %s9739_s1  ;;  %993 = vrot.lane.b32.xlu0 %v7512_v29, %s9738_s22  ;;  %s9740_s22 = smov 92  }
 0x153   : > { %v7555_v42 = vpop.permute.xlu1 %695  ;;  %v1207_v41 = vpop.permute.xlu0 %1206 }
 0x154   : > { %v1227_v47 = vsel %vm9671_vm13, %v1207_v41, %v1209_v0  ;;  %vm9678_vm13 = vcmask 752640   ;;  %v1247_v0 = vsel %vm1245_vm4, %v7152_v6, %v709_v48 }
 0x155   : > { %879 = vrot.lane.b32.xlu1 %v7363_v32, %s9740_s22  ;;  %1218 = vrot.lane.b32.xlu0 %v7377_v36, %s9739_s1  ;;  %v1369_v11 = vsel %vm1305_vm14, %v1360_v1, %v1227_v47  ;;  %v1257_v15 = vsel %vm1255_vm6, %v1247_v0, %v745_v5  ;;  %v889_v59 = vsel %vm9678_vm13, %v7516_v10, %v7514_v63 }
 0x156   : > { %1418 = vmatpush1.msra.mxu0 %v1369_v11  ;;  %v1267_v26 = vsel %vm1265_vm8, %v1257_v15, %v781_v57  ;;  %v708_v11 = vsel %vm707_vm15, %v7343_v27, %v7329_v24  ;;  %v744_v57 = vsel %vm743_vm5, %v7379_v37, %v7354_v31  ;;  %v780_v0 = vsel %vm9680_vm3, %v7403_v43, %v7389_v40 }
 0x157   : > { %v870_v22 = vpop.permute.xlu1 %869  ;;  %v7578_v14 = vpop.permute.xlu0 %697  ;;  %v1277_v6 = vsel %vm1275_vm10, %v1267_v26, %v817_v2  ;;  %v6904_v2 = vmov 0   ;;  %v1246_v24 = vsel %vm1245_vm4, %v7171_v9, %v708_v11  ;;  %v816_v27 = vsel %vm9679_vm9, %v7427_v49, %v7413_v46 }
 0x158   : > { %v1287_v25 = vsel %vm1285_vm11, %v1277_v6, %v853_v21  ;;  %6637 = vset.pattern.permute.xlu1 %v6904_v2  ;;  %6638 = vset.pattern.permute.xlu0 %v6904_v2  ;;  %v1256_v15 = vsel %vm1255_vm6, %v1246_v24, %v744_v57  ;;  %v852_v40 = vsel %vm9673_vm7, %v7497_v61, %v7437_v52  ;;  %v7645_v61 = vld [vmem:[#allocation3] sm:$0xff]  ;;  %vm9674_vm7 = vcmask 130048  }
 0x159   : > { %1027 = vrot.lane.b32.xlu1 %v7491_v58, %s6890_s0  ;;  %881 = vrot.lane.b32.xlu0 %v7377_v36, %s9740_s22  ;;  %v1297_v48 = vsel %vm1295_vm12, %v1287_v25, %v889_v59  ;;  %v1266_v43 = vsel %vm1265_vm8, %v1256_v15, %v780_v0  ;;  %v888_v21 = vsel %vm9678_vm13, %v870_v22, %v7516_v10  ;;  %v9741_v25 = vmov 0.0  }
 0x15a   : > { %v1276_v9 = vsel %vm1275_vm10, %v1266_v43, %v816_v27  ;;  %v998_v24 = vsel %vm9675_vm0, %v7301_v16, %v7453_v56  ;;  %v999_v27 = vsel %vm9675_vm0, %v7453_v56, %v7451_v55  ;;  %v1034_v15 = vsel %vm9677_vm2, %v7317_v20, %v7540_v19 }
 0x15b   : > { %v7594_v34 = vpop.permute.xlu1 %909  ;;  %v908_v35 = vpop.permute.xlu0 %907  ;;  %v1286_v46 = vsel %vm1285_vm11, %v1276_v9, %v852_v40  ;;  %v1035_v40 = vsel %vm9677_vm2, %v7540_v19, %v7538_v18  ;;  %vm9746_vm13 = vcmask 211968  }
 0x15c   : > { %v925_v41 = vsel %vm9676_vm1, %v908_v35, %v7594_v34  ;;  %v1296_v52 = vsel %vm1295_vm12, %v1286_v46, %v888_v21 }
 0x15d   : > { %703 = vrot.lane.b32.xlu1 %v7491_v58, %s9681_s23  ;;  %1029 = vrot.lane.b32.xlu0 %v7512_v29, %s6890_s0  ;;  %v1307_v47 = vsel %vm1305_vm14, %v1297_v48, %v925_v41  ;;  %s9702_s0 = smov 107  }
 0x15e   : > { %1419 = vmatprep.subr.mxu0 %v1307_v47 }
 0x15f   : > { %v7604_v1 = vpop.permute.xlu1 %1057  ;;  %v7606_v5 = vpop.permute.xlu0 %1055 }
 0x161   : > { %915 = vrot.lane.b32.xlu1 %v7363_v32, %s9683_s21  ;;  %705 = vrot.lane.b32.xlu0 %v7512_v29, %s9681_s23  ;;  %s9688_s23 = smov 109  }
 0x163   : > { %v7626_v31 = vpop.permute.xlu1 %733  ;;  %v7628_v37 = vpop.permute.xlu0 %731 }
 0x165   : > { %1063 = vrot.lane.b32.xlu1 %v7491_v58, %s6892_s24  ;;  %917 = vrot.lane.b32.xlu0 %v7377_v36, %s9683_s21 }
 0x167   : > { %v1096_v49 = vpop.permute.xlu1 %1095  ;;  %v906_v26 = vpop.permute.xlu0 %905 }
 0x168   : > { %v924_v59 = vsel %vm9676_vm1, %v906_v26, %v908_v35  ;;  %vm9744_vm1 = vcmask 465920  }
 0x169   : > { %739 = vrot.lane.b32.xlu1 %v7491_v58, %s9684_s30  ;;  %1065 = vrot.lane.b32.xlu0 %v7512_v29, %s6892_s24  ;;  %v1306_v10 = vsel %vm1305_vm14, %v1296_v52, %v924_v59  ;;  %v1071_v20 = vsel %vm9744_vm1, %v7606_v5, %v7604_v1  ;;  %vm9745_vm2 = vmmov %vm9744_vm1  ;;  %vm9748_vm1 = vcmask 203776   ;;  %s9686_s24 = smov 110  }
 0x16a   : > { %1420 = vmatpush1.msra.mxu0 %v1306_v10  ;;  %v1070_v21 = vsel %vm9745_vm2, %v7345_v28, %v7606_v5  ;;  %vm9749_vm2 = vmmov %vm9748_vm1 }
 0x16b   : > { %v7652_v22 = vpop.permute.xlu1 %767  ;;  %v7654_v6 = vpop.permute.xlu0 %1097  ;;  %5775 = vmatmul.mubr.msk.f32.vlgmr.msra.gmra.mxu0 %vm9674_vm7, %v7645_v61  ;;  %vm9742_vm7 = vcmask 490496  }
 0x16c   : > { %1524 = vmatprep.mubr.f32.mxu0 %v9741_v25  ;;  %v962_v16 = vsel %vm9742_vm7, %v7303_v17, %v7445_v54  ;;  %vm9743_vm0 = vmmov %vm9742_vm7  ;;  %v1113_v9 = vsel %vm9746_vm13, %v1096_v49, %v7654_v6  ;;  %vm9750_vm7 = vcmask 195584  }
 0x16d   : > { %1103 = vrot.lane.b32.xlu1 %v7491_v58, %s6894_s27  ;;  %741 = vrot.lane.b32.xlu0 %v7512_v29, %s9684_s30  ;;  %v963_v56 = vsel %vm9743_vm0, %v7445_v54, %v7443_v53  ;;  %v1317_v19 = vsel %vm1245_vm4, %v962_v16, %v998_v24  ;;  %vm9747_vm0 = vmmov %vm9746_vm13 }
 0x16e   : > { %v1318_v43 = vsel %vm1245_vm4, %v963_v56, %v999_v27  ;;  %v1326_v54 = vsel %vm1255_vm6, %v1317_v19, %v1034_v15  ;;  %v1112_v59 = vsel %vm9747_vm0, %v7381_v38, %v1096_v49  ;;  %v710_v38 = vsel %vm707_vm15, %v7327_v23, %v7555_v42  ;;  %vm9751_vm13 = vmmov %vm9750_vm7 }
 0x16f   : > { %v1135_v35 = vpop.permute.xlu1 %1134  ;;  %v7663_v41 = vpop.permute.xlu0 %769  ;;  %v1327_v26 = vsel %vm1255_vm6, %v1318_v43, %v1035_v40  ;;  %v1335_v49 = vsel %vm1265_vm8, %v1326_v54, %v1070_v21  ;;  %vm9752_vm0 = vcmask 187392   ;;  %v746_v56 = vsel %vm743_vm5, %v7352_v30, %v7628_v37 }
 0x170   : > { %v1336_v10 = vsel %vm1265_vm8, %v1327_v26, %v1071_v20  ;;  %v1151_v28 = vsel %vm9749_vm2, %v7405_v44, %v1135_v35  ;;  %v1344_v27 = vsel %vm1275_vm10, %v1335_v49, %v1112_v59  ;;  %v747_v20 = vsel %vm743_vm5, %v7628_v37, %v7626_v31 }
 0x171   : > { %775 = vrot.lane.b32.xlu1 %v7491_v58, %s9708_s25  ;;  %1105 = vrot.lane.b32.xlu0 %v7512_v29, %s6894_s27  ;;  %v1345_v24 = vsel %vm1275_vm10, %v1336_v10, %v1113_v9  ;;  %v783_v19 = vsel %vm9680_vm3, %v7652_v22, %v7663_v41  ;;  %v1248_v37 = vsel %vm1245_vm4, %v7160_v7, %v710_v38  ;;  %vm9754_vm2 = vcmask 760832  }
 0x172   : > { %v782_v9 = vsel %vm9680_vm3, %v7387_v39, %v7652_v22  ;;  %v1258_v59 = vsel %vm1255_vm6, %v1248_v37, %v746_v56 }
 0x173   : > { %v7669_v48 = vpop.permute.xlu1 %803  ;;  %v7671_v47 = vpop.permute.xlu0 %1136 }
 0x174   : > { %v1152_v52 = vsel %vm9748_vm1, %v1135_v35, %v7671_v47  ;;  %v711_v35 = vsel %vm707_vm15, %v7555_v42, %v7578_v14  ;;  %vm9753_vm1 = vmmov %vm9752_vm0  ;;  %v818_v7 = vsel %vm9679_vm9, %v7411_v45, %v7669_v48 }
 0x175   : > { %1142 = vrot.lane.b32.xlu1 %v7491_v58, %s6896_s28  ;;  %777 = vrot.lane.b32.xlu0 %v7512_v29, %s9708_s25  ;;  %v1354_v15 = vsel %vm1285_vm11, %v1345_v24, %v1152_v52  ;;  %v1249_v21 = vsel %vm1245_vm4, %v7243_v13, %v711_v35 }
 0x176   : > { %v1259_v52 = vsel %vm1255_vm6, %v1249_v21, %v747_v20 }
 0x177   : > { %v1174_v11 = vpop.permute.xlu1 %1173  ;;  %v7677_v57 = vpop.permute.xlu0 %805  ;;  %v1269_v39 = vsel %vm1265_vm8, %v1259_v52, %v783_v19 }
 0x178   : > { %v1190_v44 = vsel %vm9751_vm13, %v7429_v50, %v1174_v11  ;;  %v1353_v50 = vsel %vm1285_vm11, %v1344_v27, %v1151_v28  ;;  %vm9756_vm13 = vcmask 752640   ;;  %v1268_v28 = vsel %vm1265_vm8, %v1258_v59, %v782_v9 }
 0x179   : > { %811 = vrot.lane.b32.xlu1 %v7491_v58, %s6897_s10  ;;  %1144 = vrot.lane.b32.xlu0 %v7512_v29, %s6896_s28  ;;  %v1362_v30 = vsel %vm1295_vm12, %v1353_v50, %v1190_v44  ;;  %v1088_v27 = vrot.slane %v7495_v33, %v7137_v3  ;;  %v1379_v33 = vld [vmem:[%s9637_s6] sm:$0xff] }
 0x17b   : > { %v840_v0 = vpop.permute.xlu1 %839  ;;  %v7683_v2 = vpop.permute.xlu0 %1175 }
 0x17c   : > { %v1191_v5 = vsel %vm9750_vm7, %v1174_v11, %v7683_v2  ;;  %vm9755_vm7 = vmmov %vm9754_vm2 }
 0x17d   : > { %1181 = vrot.lane.b32.xlu1 %v7491_v58, %s6898_s18  ;;  %813 = vrot.lane.b32.xlu0 %v7512_v29, %s6897_s10  ;;  %v1363_v42 = vsel %vm1295_vm12, %v1354_v15, %v1191_v5  ;;  %v854_v22 = vsel %vm9755_vm7, %v7435_v51, %v840_v0  ;;  %v1278_v5 = vsel %vm1275_vm10, %v1268_v28, %v818_v7  ;;  %vm9760_vm7 = vcmask 130048   ;;  %s6908_s10 = smov 74  }
 0x17e   : > { %v1288_v24 = vsel %vm1285_vm11, %v1278_v5, %v854_v22 }
 0x17f   : > { %v1213_v17 = vpop.permute.xlu1 %1212  ;;  %v7717_v46 = vpop.permute.xlu0 %841 }
 0x180   : > { %v1229_v40 = vsel %vm9752_vm0, %v7499_v62, %v1213_v17  ;;  %v855_v13 = vsel %vm9754_vm2, %v840_v0, %v7717_v46  ;;  %vm9757_vm0 = vmmov %vm9756_vm13 }
 0x181   : > { %847 = vrot.lane.b32.xlu1 %v7491_v58, %s6899_s20  ;;  %1183 = vrot.lane.b32.xlu0 %v7512_v29, %s6898_s18  ;;  %v1371_v43 = vsel %vm1305_vm14, %v1362_v30, %v1229_v40 }
 0x183   : > { %v876_v16 = vpop.permute.xlu1 %875  ;;  %v7748_v23 = vpop.permute.xlu0 %1214 }
 0x184   : > { %v1230_v11 = vsel %vm9753_vm1, %v1213_v17, %v7748_v23  ;;  %v819_v17 = vsel %vm9679_vm9, %v7669_v48, %v7677_v57  ;;  %v890_v48 = vsel %vm9757_vm0, %v7514_v63, %v876_v16  ;;  %vm9758_vm1 = vcmask 744448  }
 0x185   : > { %1220 = vrot.lane.b32.xlu1 %v7491_v58, %s9739_s1  ;;  %849 = vrot.lane.b32.xlu0 %v7512_v29, %s6899_s20  ;;  %v1372_v62 = vsel %vm1305_vm14, %v1363_v42, %v1230_v11  ;;  %v1279_v45 = vsel %vm1275_vm10, %v1269_v39, %v819_v17  ;;  %vm9759_vm2 = vmmov %vm9758_vm1  ;;  %vm9766_vm9 = vcmask 465920   ;;  %s6910_s20 = smov 90  }
 0x186   : > { %1488 = vmatprep.subr.mxu0 %v1372_v62  ;;  %v1289_v51 = vsel %vm1285_vm11, %v1279_v45, %v855_v13 }
 0x187   : > { %v912_v54 = vpop.permute.xlu1 %911  ;;  %1489 = vmatpush1.msra.mxu0 %v1371_v43  ;;  %v7780_v26 = vpop.permute.xlu0 %877 }
 0x188   : > { %v891_v10 = vsel %vm9756_vm13, %v876_v16, %v7780_v26  ;;  %v926_v0 = vsel %vm9758_vm1, %v7594_v34, %v912_v54  ;;  %v1298_v34 = vsel %vm1295_vm12, %v1288_v24, %v890_v48  ;;  %vm9761_vm13 = vcmask 482304  }
 0x189   : > { %883 = vrot.lane.b32.xlu1 %v7491_v58, %s9740_s22  ;;  %1222 = vrot.lane.b32.xlu0 %v7512_v29, %s9739_s1  ;;  %v1299_v35 = vsel %vm1295_vm12, %v1289_v51, %v891_v10  ;;  %v1308_v15 = vsel %vm1305_vm14, %v1298_v34, %v926_v0  ;;  %vm9762_vm0 = vmmov %vm9761_vm13  ;;  %vm9763_vm1 = vcmask 474112  }
 0x18b   : > { %v952_v38 = vpop.permute.xlu1 %951  ;;  %v7806_v49 = vpop.permute.xlu0 %913 }
 0x18c   : > { %v927_v44 = vsel %vm9759_vm2, %v912_v54, %v7806_v49  ;;  %vm9764_vm2 = vcmask 490496  }
 0x18d   : > { %919 = vrot.lane.b32.xlu1 %v7491_v58, %s9683_s21  ;;  %885 = vrot.lane.b32.xlu0 %v7512_v29, %s9740_s22  ;;  %v1309_v63 = vsel %vm1305_vm14, %v1299_v35, %v927_v44  ;;  %vm9767_vm3 = vmmov %vm9764_vm2 }
 0x18e   : > { %1490 = vmatprep.subr.mxu0 %v1309_v63  ;;  %v964_v63 = vsel %vm9767_vm3, %v7443_v53, %v952_v38  ;;  %vm9771_vm3 = vcmask 203776  }
 0x18f   : > { %v988_v40 = vpop.permute.xlu1 %987  ;;  %1491 = vmatpush1.msra.mxu0 %v1308_v15  ;;  %v7821_v16 = vpop.permute.xlu0 %953 }
 0x190   : > { %5776 = vmatmul.mubr.msk.f32.vlgmr.msra.gmra.mxu0 %vm9760_vm7, %v7645_v61  ;;  %v1000_v51 = vsel %vm9762_vm0, %v7451_v55, %v988_v40  ;;  %v965_v24 = vsel %vm9764_vm2, %v952_v38, %v7821_v16  ;;  %vm9765_vm7 = vmmov %vm9763_vm1  ;;  %vm9769_vm0 = vcmask 211968   ;;  %vm9773_vm2 = vcmask 195584  }
 0x191   : > { %1107 = vrot.lane.b32.xlu1 %v1088_v27, %s6894_s27  ;;  %921 = vrot.lane.b32.xlu0 %v7512_v29, %s9683_s21  ;;  %s6906_s27 = smov 72  }
 0x192   : > { %1595 = vmatprep.mubr.f32.mxu0 %v9741_v25 }
 0x193   : > { %v1024_v56 = vpop.permute.xlu1 %1023  ;;  %v7829_v50 = vpop.permute.xlu0 %989 }
 0x194   : > { %v1001_v5 = vsel %vm9761_vm13, %v988_v40, %v7829_v50  ;;  %v1036_v44 = vsel %vm9765_vm7, %v7538_v18, %v1024_v56  ;;  %vm9768_vm13 = vmmov %vm9766_vm9 }
 0x195   : > { %1185 = vrot.lane.b32.xlu1 %v1088_v27, %s6898_s18  ;;  %1146 = vrot.lane.b32.xlu0 %v1088_v27, %s6896_s28  ;;  %v1320_v34 = vsel %vm1245_vm4, %v965_v24, %v1001_v5  ;;  %vm9774_vm7 = vmmov %vm9773_vm2  ;;  %s6907_s28 = smov 71   ;;  %s6909_s18 = smov 73  }
 0x197   : > { %v7836_v11 = vpop.permute.xlu1 %699  ;;  %v7838_v42 = vpop.permute.xlu0 %1025 }
 0x198   : > { %v1037_v0 = vsel %vm9763_vm1, %v1024_v56, %v7838_v42  ;;  %vm9772_vm1 = vmmov %vm9771_vm3 }
 0x199   : > { %1224 = vrot.lane.b32.xlu0 %v1088_v27, %s9739_s1  ;;  %1382 = vperm.xlu1 %6637, %v1379_v33   ;;  %v1319_v33 = vsel %vm1245_vm4, %v964_v63, %v1000_v51  ;;  %v1329_v18 = vsel %vm1255_vm6, %v1320_v34, %v1037_v0  ;;  %s9690_s1 = smov 108  }
 0x19a   : > { %v1328_v38 = vsel %vm1255_vm6, %v1319_v33, %v1036_v44 }
 0x19b   : > { %v1060_v20 = vpop.permute.xlu1 %1059  ;;  %v7841_v62 = vpop.permute.xlu0 %701 }
 0x19c   : > { %v1072_v55 = vsel %vm9768_vm13, %v7604_v1, %v1060_v20  ;;  %vm9775_vm13 = vcmask 187392  }
 0x19d   : > { %v1337_v51 = vsel %vm1265_vm8, %v1328_v38, %v1072_v55 }
 0x19f   : > { %v736_v30 = vpop.permute.xlu1 %735  ;;  %v7843_v19 = vpop.permute.xlu0 %1061 }
 0x1a0   : > { %v1073_v35 = vsel %vm9766_vm9, %v1060_v20, %v7843_v19  ;;  %vm9770_vm9 = vmmov %vm9769_vm0  ;;  %v748_v38 = vsel %vm743_vm5, %v7626_v31, %v736_v30 }
 0x1a1   : > { %v1338_v1 = vsel %vm1265_vm8, %v1329_v18, %v1073_v35 }
 0x1a3   : > { %v1100_v43 = vpop.permute.xlu1 %1099  ;;  %v7845_v37 = vpop.permute.xlu0 %737 }
 0x1a4   : > { %v1114_v56 = vsel %vm9770_vm9, %v7654_v6, %v1100_v43  ;;  %vm9777_vm9 = vcmask 1022976  }
 0x1a7   : > { %v772_v21 = vpop.permute.xlu1 %771  ;;  %v7847_v9 = vpop.permute.xlu0 %1101 }
 0x1a8   : > { %v1115_v27 = vsel %vm9769_vm0, %v1100_v43, %v7847_v9  ;;  %v1346_v43 = vsel %vm1275_vm10, %v1337_v51, %v1114_v56  ;;  %vm9776_vm0 = vmmov %vm9775_vm13  ;;  %v712_v56 = vsel %vm707_vm15, %v7578_v14, %v7836_v11 }
 0x1a9   : > { %v1347_v0 = vsel %vm1275_vm10, %v1338_v1, %v1115_v27 }
 0x1ab   : > { %v1139_v17 = vpop.permute.xlu1 %1138  ;;  %v7849_v54 = vpop.permute.xlu0 %773 }
 0x1ac   : > { %v1153_v20 = vsel %vm9772_vm1, %v7671_v47, %v1139_v17  ;;  %v785_v1 = vsel %vm9777_vm9, %v772_v21, %v7849_v54  ;;  %vm9779_vm1 = vcmask 769024  }
 0x1ad   : > { %v1355_v47 = vsel %vm1285_vm11, %v1346_v43, %v1153_v20 }
 0x1af   : > { %v7851_v59 = vpop.permute.xlu1 %807  ;;  %v7853_v52 = vpop.permute.xlu0 %1140 }
 0x1b0   : > { %v1154_v53 = vsel %vm9771_vm3, %v1139_v17, %v7853_v52  ;;  %vm9778_vm3 = vmmov %vm9777_vm9 }
 0x1b1   : > { %v1356_v24 = vsel %vm1285_vm11, %v1347_v0, %v1154_v53  ;;  %v749_v53 = vsel %vm743_vm5, %v736_v30, %v7845_v37  ;;  %v1250_v0 = vsel %vm1245_vm4, %v7238_v12, %v712_v56 }
 0x1b3   : > { %v1178_v7 = vpop.permute.xlu1 %1177  ;;  %v7855_v13 = vpop.permute.xlu0 %809 }
 0x1b4   : > { %v1192_v6 = vsel %vm9774_vm7, %v7683_v2, %v1178_v7  ;;  %v821_v51 = vsel %vm9779_vm1, %v7851_v59, %v7855_v13  ;;  %vm9781_vm7 = vcmask 760832  }
 0x1b5   : > { %v1364_v2 = vsel %vm1295_vm12, %v1355_v47, %v1192_v6 }
 0x1b7   : > { %v7857_v39 = vpop.permute.xlu1 %843  ;;  %v7859_v22 = vpop.permute.xlu0 %1179 }
 0x1b8   : > { %v1193_v5 = vsel %vm9773_vm2, %v1178_v7, %v7859_v22  ;;  %vm9780_vm2 = vmmov %vm9779_vm1 }
 0x1b9   : > { %v1365_v34 = vsel %vm1295_vm12, %v1356_v24, %v1193_v5  ;;  %v784_v5 = vsel %vm9778_vm3, %v7663_v41, %v772_v21  ;;  %v820_v30 = vsel %vm9780_vm2, %v7677_v57, %v7851_v59  ;;  %v1260_v41 = vsel %vm1255_vm6, %v1250_v0, %v748_v38 }
 0x1ba   : > { %v1270_v43 = vsel %vm1265_vm8, %v1260_v41, %v784_v5  ;;  %vm9785_vm3 = vcmask 744448   ;;  %vm9787_vm2 = vcmask 130048  }
 0x1bb   : > { %v7861_v10 = vpop.permute.xlu1 %955  ;;  %v7863_v28 = vpop.permute.xlu0 %845  ;;  %v1280_v59 = vsel %vm1275_vm10, %v1270_v43, %v820_v30  ;;  %vm9786_vm1 = vmmov %vm9785_vm3 }
 0x1bf   : > { %v7865_v45 = vpop.permute.xlu1 %991  ;;  %v7867_v48 = vpop.permute.xlu0 %957 }
 0x1c3   : > { %v1217_v15 = vpop.permute.xlu1 %1216  ;;  %v7888_v40 = vpop.permute.xlu0 %993 }
 0x1c4   : > { %v1231_v44 = vsel %vm9775_vm13, %v7748_v23, %v1217_v15  ;;  %vm9782_vm13 = vmmov %vm9781_vm7 }
 0x1c5   : > { %v1373_v7 = vsel %vm1305_vm14, %v1364_v2, %v1231_v44  ;;  %v856_v6 = vsel %vm9782_vm13, %v7717_v46, %v7857_v39  ;;  %vm9788_vm13 = vcmask 482304  }
 0x1c6   : > { %v1290_v46 = vsel %vm1285_vm11, %v1280_v59, %v856_v6 }
 0x1c7   : > { %v880_v35 = vpop.permute.xlu1 %879  ;;  %v7910_v63 = vpop.permute.xlu0 %1218 }
 0x1c8   : > { %v1232_v17 = vsel %vm9776_vm0, %v1217_v15, %v7910_v63  ;;  %v713_v15 = vsel %vm707_vm15, %v7836_v11, %v7841_v62  ;;  %vm9783_vm0 = vcmask 752640  }
 0x1c9   : > { %v1374_v55 = vsel %vm1305_vm14, %v1365_v34, %v1232_v17  ;;  %v1251_v20 = vsel %vm1245_vm4, %v7363_v32, %v713_v15  ;;  %v857_v32 = vsel %vm9781_vm7, %v7857_v39, %v7863_v28  ;;  %vm9784_vm9 = vmmov %vm9783_vm0  ;;  %vm6905_vm7 = vmmov 0  }
 0x1ca   : > { %1559 = vmatprep.subr.mxu0 %v1374_v55  ;;  %v1261_v31 = vsel %vm1255_vm6, %v1251_v20, %v749_v53  ;;  %v892_v57 = vsel %vm9784_vm9, %v7780_v26, %v880_v35  ;;  %vm9790_vm9 = vcmask 474112  }
 0x1cb   : > { %v1028_v27 = vpop.permute.xlu1 %1027  ;;  %1560 = vmatpush1.msra.mxu0 %v1373_v7  ;;  %v7919_v23 = vpop.permute.xlu0 %881  ;;  %v1271_v21 = vsel %vm1265_vm8, %v1261_v31, %v785_v1  ;;  %v1300_v26 = vsel %vm1295_vm12, %v1290_v46, %v892_v57 }
 0x1cc   : > { %v893_v12 = vsel %vm9783_vm0, %v880_v35, %v7919_v23  ;;  %v1281_v24 = vsel %vm1275_vm10, %v1271_v21, %v821_v51  ;;  %vm9789_vm0 = vmmov %vm9788_vm13 }
 0x1cd   : > { %v1291_v44 = vsel %vm1285_vm11, %v1281_v24, %v857_v32  ;;  %v1003_v32 = vsel %vm9788_vm13, %v7865_v45, %v7888_v40  ;;  %v1002_v41 = vsel %vm9789_vm0, %v7829_v50, %v7865_v45 }
 0x1ce   : > { %v1301_v55 = vsel %vm1295_vm12, %v1291_v44, %v893_v12 }
 0x1cf   : > { %v7921_v33 = vpop.permute.xlu1 %703  ;;  %v7923_v18 = vpop.permute.xlu0 %1029 }
 0x1d0   : > { %v1039_v21 = vsel %vm9790_vm9, %v1028_v27, %v7923_v18 }
 0x1d3   : > { %v916_v14 = vpop.permute.xlu1 %915  ;;  %v7944_v11 = vpop.permute.xlu0 %705 }
 0x1d4   : > { %v928_v47 = vsel %vm9785_vm3, %v7806_v49, %v916_v14  ;;  %vm9791_vm3 = vcmask 490496  }
 0x1d5   : > { %v1310_v35 = vsel %vm1305_vm14, %v1300_v26, %v928_v47  ;;  %v967_v6 = vsel %vm9791_vm3, %v7861_v10, %v7867_v48  ;;  %vm9794_vm13 = vmmov %vm9791_vm3 }
 0x1d6   : > { %v966_v24 = vsel %vm9794_vm13, %v7821_v16, %v7861_v10  ;;  %v1322_v57 = vsel %vm1245_vm4, %v967_v6, %v1003_v32  ;;  %vm9800_vm13 = vcmask 195584  }
 0x1d7   : > { %v1064_v17 = vpop.permute.xlu1 %1063  ;;  %v7970_v34 = vpop.permute.xlu0 %917 }
 0x1d8   : > { %v929_v39 = vsel %vm9786_vm1, %v916_v14, %v7970_v34  ;;  %vm9792_vm1 = vmmov %vm9790_vm9  ;;  %vm9796_vm9 = vcmask 211968  }
 0x1d9   : > { %v1311_v2 = vsel %vm1305_vm14, %v1301_v55, %v929_v39  ;;  %v1038_v12 = vsel %vm9792_vm1, %v7838_v42, %v1028_v27  ;;  %v1321_v42 = vsel %vm1245_vm4, %v966_v24, %v1002_v41  ;;  %v1331_v27 = vsel %vm1255_vm6, %v1322_v57, %v1039_v21  ;;  %vm9797_vm3 = vmmov %vm9796_vm9 }
 0x1da   : > { %1561 = vmatprep.subr.mxu0 %v1311_v2  ;;  %vm9798_vm1 = vcmask 203776   ;;  %v1330_v10 = vsel %vm1255_vm6, %v1321_v42, %v1038_v12  ;;  %v1800_v42 = vld [vmem:[#allocation10 + $0xb4] sm:$0xff] }
 0x1db   : > { %v740_v7 = vpop.permute.xlu1 %739  ;;  %1562 = vmatpush1.msra.mxu0 %v1310_v35  ;;  %v7979_v49 = vpop.permute.xlu0 %1065 }
 0x1dc   : > { %5777 = vmatmul.mubr.msk.f32.vlgmr.msra.gmra.mxu0 %vm9787_vm2, %v7645_v61  ;;  %6420 = vmatprep.subr.mxu0 %v9741_v25  ;;  %vm9793_vm2 = vcmask 465920   ;;  %v750_v12 = vsel %vm743_vm5, %v7845_v37, %v740_v7 }
 0x1dd   : > { %6424 = vmatprep.mubr.msk.f32.mxu0 %vm6905_vm7, %v9741_v25  ;;  %v1075_v43 = vsel %vm9793_vm2, %v1064_v17, %v7979_v49  ;;  %vm9795_vm0 = vmmov %vm9793_vm2 }
 0x1de   : > { %v1074_v50 = vsel %vm9795_vm0, %v7843_v19, %v1064_v17  ;;  %v1340_v19 = vsel %vm1265_vm8, %v1331_v27, %v1075_v43  ;;  %vm9799_vm2 = vmmov %vm9798_vm1 }
 0x1df   : > { %v1104_v15 = vpop.permute.xlu1 %1103  ;;  %v7986_v56 = vpop.permute.xlu0 %741  ;;  %v1339_v39 = vsel %vm1265_vm8, %v1330_v10, %v1074_v50  ;;  %vm9801_vm0 = vmmov %vm9800_vm13 }
 0x1e0   : > { %v1116_v47 = vsel %vm9797_vm3, %v7847_v9, %v1104_v15  ;;  %v751_v21 = vsel %vm743_vm5, %v740_v7, %v7986_v56 }
 0x1e1   : > { %v1348_v2 = vsel %vm1275_vm10, %v1339_v39, %v1116_v47 }
 0x1e3   : > { %v776_v53 = vpop.permute.xlu1 %775  ;;  %v7988_v38 = vpop.permute.xlu0 %1105 }
 0x1e4   : > { %v1117_v45 = vsel %vm9796_vm9, %v1104_v15, %v7988_v38  ;;  %vm9802_vm9 = vcmask 187392  }
 0x1e5   : > { %v1349_v55 = vsel %vm1275_vm10, %v1340_v19, %v1117_v45  ;;  %vm9803_vm3 = vmmov %vm9802_vm9 }
 0x1e7   : > { %v1143_v1 = vpop.permute.xlu1 %1142  ;;  %v7990_v20 = vpop.permute.xlu0 %777 }
 0x1e8   : > { %v1155_v17 = vsel %vm9799_vm2, %v7853_v52, %v1143_v1 }
 0x1eb   : > { %v812_v5 = vpop.permute.xlu1 %811  ;;  %v7992_v51 = vpop.permute.xlu0 %1144 }
 0x1ec   : > { %v1156_v16 = vsel %vm9798_vm1, %v1143_v1, %v7992_v51  ;;  %v715_v1 = vsel %vm707_vm15, %v7921_v33, %v7944_v11  ;;  %vm9804_vm1 = vcmask 1022976  }
 0x1ed   : > { %v1358_v15 = vsel %vm1285_vm11, %v1349_v55, %v1156_v16  ;;  %v787_v43 = vsel %vm9804_vm1, %v776_v53, %v7990_v20  ;;  %v1253_v57 = vsel %vm1245_vm4, %v7491_v58, %v715_v1  ;;  %vm9805_vm2 = vmmov %vm9804_vm1  ;;  %vm9810_vm1 = vcmask 752640  }
 0x1ee   : > { %v1263_v7 = vsel %vm1255_vm6, %v1253_v57, %v751_v21 }
 0x1ef   : > { %v1182_v14 = vpop.permute.xlu1 %1181  ;;  %v7994_v0 = vpop.permute.xlu0 %813 }
 0x1f0   : > { %v1194_v9 = vsel %vm9801_vm0, %v7859_v22, %v1182_v14  ;;  %v1357_v22 = vsel %vm1285_vm11, %v1348_v2, %v1155_v17  ;;  %v2080_v2 = vunpack.c.h.bf16 %v1800_v42 }
 0x1f1   : > { %v1366_v6 = vsel %vm1295_vm12, %v1357_v22, %v1194_v9 }
 0x1f3   : > { %v848_v31 = vpop.permute.xlu1 %847  ;;  %v7996_v30 = vpop.permute.xlu0 %1183 }
 0x1f4   : > { %v1195_v46 = vsel %vm9800_vm13, %v1182_v14, %v7996_v30  ;;  %v714_v14 = vsel %vm707_vm15, %v7841_v62, %v7921_v33  ;;  %v786_v62 = vsel %vm9805_vm2, %v7849_v54, %v776_v53  ;;  %vm9806_vm13 = vcmask 769024   ;;  %vm9811_vm2 = vmmov %vm9810_vm1 }
 0x1f5   : > { %v1367_v41 = vsel %vm1295_vm12, %v1358_v15, %v1195_v46  ;;  %v823_v33 = vsel %vm9806_vm13, %v812_v5, %v7994_v0  ;;  %v1252_v37 = vsel %vm1245_vm4, %v7377_v36, %v714_v14  ;;  %vm9807_vm0 = vmmov %vm9806_vm13  ;;  %v1273_v53 = vsel %vm1265_vm8, %v1263_v7, %v787_v43 }
 0x1f6   : > { %v1262_v54 = vsel %vm1255_vm6, %v1252_v37, %v750_v12  ;;  %v1283_v16 = vsel %vm1275_vm10, %v1273_v53, %v823_v33  ;;  %vm9812_vm13 = vcmask 744448  }
 0x1f7   : > { %v1221_v59 = vpop.permute.xlu1 %1220  ;;  %v8021_v44 = vpop.permute.xlu0 %849  ;;  %v1272_v36 = vsel %vm1265_vm8, %v1262_v54, %v786_v62  ;;  %v1862_v54 = vld [vmem:[#allocation10 + $0x228] sm:$0xff] }
 0x1f8   : > { %v1233_v52 = vsel %vm9802_vm9, %v7910_v63, %v1221_v59  ;;  %vm9808_vm9 = vcmask 760832  }
 0x1f9   : > { %v1375_v24 = vsel %vm1305_vm14, %v1366_v6, %v1233_v52  ;;  %v859_v58 = vsel %vm9808_vm9, %v848_v31, %v8021_v44  ;;  %v1796_v52 = vld [vmem:[#allocation10 + $0x9c] sm:$0xff]  ;;  %v1254_v6 = vsel %vm1245_vm4, %v7512_v29, %v7944_v11  ;;  %v1864_v11 = vld [vmem:[#allocation10 + $0x234] sm:$0xff] }
 0x1fa   : > { %v1293_v10 = vsel %vm1285_vm11, %v1283_v16, %v859_v58  ;;  %v2073_v43 = vunpack.c.l.bf16 %v1796_v52  ;;  %v1790_v29 = vld [vmem:[#allocation10 + $0x78] sm:$0xff] }
 0x1fb   : > { %v884_v26 = vpop.permute.xlu1 %883  ;;  %v8040_v35 = vpop.permute.xlu0 %1222  ;;  %v1860_v16 = vld [vmem:[#allocation10 + $0x21c] sm:$0xff] }
 0x1fc   : > { %v1234_v32 = vsel %vm9803_vm3, %v1221_v59, %v8040_v35  ;;  %v822_v59 = vsel %vm9807_vm0, %v7855_v13, %v812_v5  ;;  %vm9809_vm3 = vmmov %vm9808_vm9  ;;  %v894_v13 = vsel %vm9811_vm2, %v7919_v23, %v884_v26  ;;  %v1323_v23 = vsel %vm1245_vm4, %v7867_v48, %v7888_v40 }
 0x1fd   : > { %v1376_v63 = vsel %vm1305_vm14, %v1367_v41, %v1234_v32  ;;  %v858_v27 = vsel %vm9809_vm3, %v7863_v28, %v848_v31  ;;  %v1282_v5 = vsel %vm1275_vm10, %v1272_v36, %v822_v59  ;;  %v2079_v28 = vunpack.c.l.bf16 %v1800_v42  ;;  %v1798_v31 = vld [vmem:[#allocation10 + $0xa8] sm:$0xff]  ;;  %vm9813_vm0 = vmmov %vm9812_vm13 }
 0x1fe   : > { %1630 = vmatprep.subr.mxu1 %v1376_v63  ;;  %v1292_v39 = vsel %vm1285_vm11, %v1282_v5, %v858_v27  ;;  %vm9814_vm9 = vcmask 211968   ;;  %v1332_v1 = vsel %vm1255_vm6, %v1323_v23, %v7923_v18  ;;  %v2077_v41 = vunpack.c.h.bf16 %v1798_v31  ;;  %v1788_v42 = vld [vmem:[#allocation10 + $0x6c] sm:$0xff] }
 0x1ff   : > { %v920_v50 = vpop.permute.xlu1 %919  ;;  %1631 = vmatpush1.msra.mxu1 %v1375_v24  ;;  %v8070_v45 = vpop.permute.xlu0 %885  ;;  %v1302_v15 = vsel %vm1295_vm12, %v1292_v39, %v894_v13  ;;  %v1341_v22 = vsel %vm1265_vm8, %v1332_v1, %v7979_v49  ;;  %v2076_v40 = vunpack.c.l.bf16 %v1798_v31  ;;  %vm9815_vm3 = vcmask 203776   ;;  %v1792_v24 = vld [vmem:[#allocation10 + $0x84] sm:$0xff] }
 0x200   : > { %v895_v47 = vsel %vm9810_vm1, %v884_v26, %v8070_v45  ;;  %v930_v19 = vsel %vm9812_vm13, %v7970_v34, %v920_v50  ;;  %vm9816_vm1 = vcmask 130048   ;;  %v2074_v18 = vunpack.c.h.bf16 %v1796_v52  ;;  %v1782_v39 = vld [vmem:[#allocation10 + $0x48] sm:$0xff] }
 0x201   : > { %v1303_v9 = vsel %vm1295_vm12, %v1293_v10, %v895_v47  ;;  %v1312_v32 = vsel %vm1305_vm14, %v1302_v15, %v930_v19  ;;  %vm9817_vm2 = vcmask 195584   ;;  %vm9818_vm4 = vcmask 187392   ;;  %v1784_v10 = vld [vmem:[#allocation10 + $0x54] sm:$0xff] }
 0x202   : > { %v2067_v58 = vunpack.c.l.bf16 %v1792_v24  ;;  %v2064_v47 = vunpack.c.l.bf16 %v1790_v29  ;;  %v2175_v36 = vunpack.c.l.bf16 %v1864_v11  ;;  %v2062_v13 = vunpack.c.h.bf16 %v1788_v42  ;;  %v1854_v15 = vld [vmem:[#allocation10 + $0x1f8] sm:$0xff] }
 0x203   : > { %v1108_v17 = vpop.permute.xlu1 %1107  ;;  %v922_v46 = vpop.permute.xlu0 %921  ;;  %v2173_v5 = vunpack.c.h.bf16 %v1862_v54  ;;  %v2172_v19 = vunpack.c.l.bf16 %v1862_v54  ;;  %v2053_v52 = vunpack.c.h.bf16 %v1782_v39 }
 0x204   : > { %v931_v55 = vsel %vm9813_vm0, %v920_v50, %v922_v46  ;;  %v1118_v26 = vsel %vm9814_vm9, %v7988_v38, %v1108_v17  ;;  %v1794_v38 = vld [vmem:[#allocation10 + $0x90] sm:$0xff] }
 0x205   : > { %v1313_v34 = vsel %vm1305_vm14, %v1303_v9, %v931_v55  ;;  %v1350_v21 = vsel %vm1275_vm10, %v1341_v22, %v1118_v26  ;;  %v2071_v57 = vunpack.c.h.bf16 %v1794_v38  ;;  %v2070_v50 = vunpack.c.l.bf16 %v1794_v38  ;;  %v1858_v17 = vld [vmem:[#allocation10 + $0x210] sm:$0xff]  ;;  %v1856_v9 = vld [vmem:[#allocation10 + $0x204] sm:$0xff]  ;;  %v1780_v26 = vld [vmem:[#allocation10 + $0x3c] sm:$0xff] }
 0x206   : > { %1632 = vmatprep.subr.mxu1 %v1313_v34  ;;  %v2169_v55 = vunpack.c.l.bf16 %v1860_v16  ;;  %v2167_v23 = vunpack.c.h.bf16 %v1858_v17  ;;  %v2166_v34 = vunpack.c.l.bf16 %v1858_v17  ;;  %v2164_v1 = vunpack.c.h.bf16 %v1856_v9 }
 0x207   : > { %v1186_v14 = vpop.permute.xlu1 %1185  ;;  %1633 = vmatpush1.msra.mxu1 %v1312_v32  ;;  %v1147_v48 = vpop.permute.xlu0 %1146  ;;  %v2052_v32 = vunpack.c.l.bf16 %v1782_v39  ;;  %v2163_v22 = vunpack.c.l.bf16 %v1856_v9  ;;  %v2049_v38 = vunpack.c.l.bf16 %v1780_v26 }
 0x208   : > { %v1157_v63 = vsel %vm9815_vm3, %v7992_v51, %v1147_v48  ;;  %5778 = vmatmul.mubr.msk.f32.vlgmr.msra.gmra.mxu1 %vm9816_vm1, %v7645_v61  ;;  %2443 = vmatprep.subr.mxu1 %v2080_v2  ;;  %v1196_v49 = vsel %vm9817_vm2, %v7996_v30, %v1186_v14  ;;  %v1264_v51 = vsel %vm1255_vm6, %v1254_v6, %v7986_v56  ;;  %v2068_v56 = vunpack.c.h.bf16 %v1792_v24  ;;  %vm9819_vm6 = vmmov %vm9816_vm1  ;;  %v1852_v14 = vld [vmem:[#allocation10 + $0x1ec] sm:$0xff] }
 0x209   : > { %v1359_v12 = vsel %vm1285_vm11, %v1350_v21, %v1157_v63  ;;  %2444 = vmatpush1.msra.mxu1 %v2079_v28  ;;  %v1274_v62 = vsel %vm1265_vm8, %v1264_v51, %v7990_v20  ;;  %v2056_v2 = vunpack.c.h.bf16 %v1784_v10  ;;  %v2050_v48 = vunpack.c.h.bf16 %v1780_v26  ;;  %v1776_v21 = vld [vmem:[#allocation10 + $0x24] sm:$0xff]  ;;  %v1848_v51 = vld [vmem:[#allocation10 + $0x1d4] sm:$0xff] }
 0x20a   : > { %2445 = vmatprep.subr.mxu1 %v2077_v41  ;;  %v1284_v30 = vsel %vm1275_vm10, %v1274_v62, %v7994_v0  ;;  %v1368_v7 = vsel %vm1295_vm12, %v1359_v12, %v1196_v49  ;;  %v2065_v0 = vunpack.c.h.bf16 %v1790_v29  ;;  %v1778_v41 = vld [vmem:[#allocation10 + $0x30] sm:$0xff]  ;;  %v2160_v63 = vunpack.c.l.bf16 %v1854_v15 }
 0x20b   : > { %v1225_v33 = vpop.permute.xlu0 %1224  ;;  %2446 = vmatpush1.msra.mxu1 %v2076_v40  ;;  %v1294_v59 = vsel %vm1285_vm11, %v1284_v30, %v8021_v44  ;;  %v1786_v44 = vld [vmem:[#allocation10 + $0x60] sm:$0xff]  ;;  %v2161_v40 = vunpack.c.h.bf16 %v1854_v15  ;;  %v2047_v6 = vunpack.c.h.bf16 %v1778_v41  ;;  %v2158_v49 = vunpack.c.h.bf16 %v1852_v14 }
 0x20c   : > { %v1235_v37 = vsel %vm9818_vm4, %v8040_v35, %v1225_v33  ;;  %2447 = vmatprep.subr.mxu1 %v2074_v18  ;;  %v1304_v53 = vsel %vm1295_vm12, %v1294_v59, %v8070_v45  ;;  %v2176_v35 = vunpack.c.h.bf16 %v1864_v11  ;;  %v2061_v45 = vunpack.c.l.bf16 %v1788_v42  ;;  %v1850_v18 = vld [vmem:[#allocation10 + $0x1e0] sm:$0xff]  ;;  %v1846_v11 = vld [vmem:[#allocation10 + $0x1c8] sm:$0xff] }
 0x20d   : > { %v1377_v20 = vsel %vm1305_vm14, %v1368_v7, %v1235_v37  ;;  %2448 = vmatpush1.msra.mxu1 %v2073_v43  ;;  %v1314_v27 = vsel %vm1305_vm14, %v1304_v53, %v922_v46  ;;  %v2059_v28 = vunpack.c.h.bf16 %v1786_v44  ;;  %v2170_v46 = vunpack.c.h.bf16 %v1860_v16  ;;  %v1774_v43 = vld [vmem:[#allocation10 + $0x18] sm:$0xff] }
 0x20e   : > { %6421 = vmatpush3.msra.mxu0 %v1377_v20  ;;  %2449 = vmatprep.subr.mxu1 %v2071_v57  ;;  %v2058_v31 = vunpack.c.l.bf16 %v1786_v44  ;;  %v2046_v12 = vunpack.c.l.bf16 %v1778_v41  ;;  %v2157_v24 = vunpack.c.l.bf16 %v1852_v14  ;;  %v2044_v57 = vunpack.c.h.bf16 %v1776_v21  ;;  %v1844_v20 = vld [vmem:[#allocation10 + $0x1bc] sm:$0xff]  ;;  %v1832_v53 = vld [vmem:[#allocation10 + $0x174] sm:$0xff] }
 0x20f   : > { %6422 = vmatprep.subr.mxu0 %v9741_v25  ;;  %2450 = vmatpush1.msra.mxu1 %v2070_v50  ;;  %v2155_v62 = vunpack.c.h.bf16 %v1850_v18  ;;  %v2043_v33 = vunpack.c.l.bf16 %v1776_v21  ;;  %v1772_v50 = vld [vmem:[#allocation10 + $0xc] sm:$0xff]  ;;  %v2154_v29 = vunpack.c.l.bf16 %v1850_v18  ;;  %v2041_v30 = vunpack.c.h.bf16 %v1774_v43 }
 0x210   : > { %6423 = vmatpush3.msra.mxu0 %v1314_v27  ;;  %2451 = vmatprep.subr.mxu1 %v2068_v56  ;;  %v2152_v37 = vunpack.c.h.bf16 %v1848_v51  ;;  %v2040_v7 = vunpack.c.l.bf16 %v1774_v43  ;;  %v1770_v56 = vld [vmem:[#allocation10] sm:$0xff]  ;;  %v2151_v59 = vunpack.c.l.bf16 %v1848_v51  ;;  %v2149_v42 = vunpack.c.h.bf16 %v1846_v11 }
 0x211   : > { %6425 = vmatmul.mubr.msk.f32.vlgmr.msra.gmra.mxu0 %vm9819_vm6, %v7645_v61  ;;  %2452 = vmatpush1.msra.mxu1 %v2067_v58  ;;  %v2055_v61 = vunpack.c.l.bf16 %v1784_v10  ;;  %v2038_v58 = vunpack.c.h.bf16 %v1772_v50  ;;  %v2037_v54 = vunpack.c.l.bf16 %v1772_v50  ;;  %v2035_v27 = vunpack.c.h.bf16 %v1770_v56 }
 0x212   : > { %2453 = vmatprep.subr.mxu1 %v2065_v0  ;;  %2514 = vmatprep.subr.mxu0 %v2176_v35  ;;  %v2148_v0 = vunpack.c.l.bf16 %v1846_v11  ;;  %v1842_v35 = vld [vmem:[#allocation10 + $0x1b0] sm:$0xff]  ;;  %v2034_v44 = vunpack.c.l.bf16 %v1770_v56  ;;  %v2145_v16 = vunpack.c.l.bf16 %v1844_v20  ;;  %v2127_v10 = vunpack.c.l.bf16 %v1832_v53 }
 0x213   : > { %2454 = vmatpush1.msra.mxu1 %v2064_v47  ;;  %2515 = vmatpush1.msra.mxu0 %v2175_v36  ;;  %v2146_v47 = vunpack.c.h.bf16 %v1844_v20  ;;  %v1830_v36 = vld [vmem:[#allocation10 + $0x168] sm:$0xff]  ;;  %v2142_v17 = vunpack.c.l.bf16 %v1842_v35  ;;  %vm2430_vm2 = vcmask 220160   ;;  %vm3308_vm4 = vcmask 588800  }
 0x214   : > { %2455 = vmatprep.subr.mxu1 %v2062_v13  ;;  %2516 = vmatprep.subr.mxu0 %v2173_v5  ;;  %v1840_v13 = vld [vmem:[#allocation10 + $0x1a4] sm:$0xff]  ;;  %v2128_v5 = vunpack.c.h.bf16 %v1832_v53  ;;  %v2124_v39 = vunpack.c.l.bf16 %v1830_v36  ;;  %vm3296_vm6 = vcmask 596992  }
 0x215   : > { %2456 = vmatpush1.msra.mxu1 %v2061_v45  ;;  %2517 = vmatpush1.msra.mxu0 %v2172_v19  ;;  %v2143_v45 = vunpack.c.h.bf16 %v1842_v35  ;;  %v1828_v19 = vld [vmem:[#allocation10 + $0x15c] sm:$0xff]  ;;  %v2139_v9 = vunpack.c.l.bf16 %v1840_v13  ;;  %v1814_v53 = vld [vmem:[#allocation10 + $0x108] sm:$0xff] }
 0x216   : > { %2457 = vmatprep.subr.mxu1 %v2059_v28  ;;  %2518 = vmatprep.subr.mxu0 %v2170_v46  ;;  %v1838_v28 = vld [vmem:[#allocation10 + $0x198] sm:$0xff]  ;;  %v2125_v46 = vunpack.c.h.bf16 %v1830_v36  ;;  %v2121_v26 = vunpack.c.l.bf16 %v1828_v19 }
 0x217   : > { %2458 = vmatpush1.msra.mxu1 %v2058_v31  ;;  %2519 = vmatpush1.msra.mxu0 %v2169_v55  ;;  %v2140_v31 = vunpack.c.h.bf16 %v1840_v13  ;;  %v1826_v55 = vld [vmem:[#allocation10 + $0x150] sm:$0xff]  ;;  %v2136_v15 = vunpack.c.l.bf16 %v1838_v28  ;;  %v1812_v36 = vld [vmem:[#allocation10 + $0xfc] sm:$0xff]  ;;  %v2101_v13 = vunpack.c.h.bf16 %v1814_v53 }
 0x218   : > { %2459 = vmatprep.subr.mxu1 %v2056_v2  ;;  %2520 = vmatprep.subr.mxu0 %v2167_v23  ;;  %v1836_v2 = vld [vmem:[#allocation10 + $0x18c] sm:$0xff]  ;;  %v2122_v23 = vunpack.c.h.bf16 %v1828_v19  ;;  %v2118_v41 = vunpack.c.l.bf16 %v1826_v55 }
 0x219   : > { %2460 = vmatpush1.msra.mxu1 %v2055_v61  ;;  %2521 = vmatpush1.msra.mxu0 %v2166_v34  ;;  %v2137_v61 = vunpack.c.h.bf16 %v1838_v28  ;;  %v1824_v34 = vld [vmem:[#allocation10 + $0x144] sm:$0xff]  ;;  %v1810_v19 = vld [vmem:[#allocation10 + $0xf0] sm:$0xff]  ;;  %v2098_v28 = vunpack.c.h.bf16 %v1812_v36 }
 0x21a   : > { %2461 = vmatprep.subr.mxu1 %v2053_v52  ;;  %2522 = vmatprep.subr.mxu0 %v2164_v1  ;;  %v1834_v52 = vld [vmem:[#allocation10 + $0x180] sm:$0xff]  ;;  %v2119_v1 = vunpack.c.h.bf16 %v1826_v55  ;;  %v2116_v21 = vunpack.c.h.bf16 %v1824_v34  ;;  %v2115_v18 = vunpack.c.l.bf16 %v1824_v34  ;;  %v1806_v34 = vld [vmem:[#allocation10 + $0xd8] sm:$0xff] }
 0x21b   : > { %2462 = vmatpush1.msra.mxu1 %v2052_v32  ;;  %2523 = vmatpush1.msra.mxu0 %v2163_v22  ;;  %v2134_v32 = vunpack.c.h.bf16 %v1836_v2  ;;  %v1822_v22 = vld [vmem:[#allocation10 + $0x138] sm:$0xff]  ;;  %v1808_v55 = vld [vmem:[#allocation10 + $0xe4] sm:$0xff] }
 0x21c   : > { %2463 = vmatprep.subr.mxu1 %v2050_v48  ;;  %2524 = vmatprep.subr.mxu0 %v2161_v40  ;;  %v8139_v48 = vpop.permute.xlu1 %1382  ;;  %v2133_v40 = vunpack.c.l.bf16 %v1836_v2  ;;  %v2113_v43 = vunpack.c.h.bf16 %v1822_v22  ;;  %v2095_v2 = vunpack.c.h.bf16 %v1810_v19 }
 0x21d   : > { %2464 = vmatpush1.msra.mxu1 %v2049_v38  ;;  %2525 = vmatpush1.msra.mxu0 %v2160_v63  ;;  %v1896_v38 = vld [vmem:[#allocation10 + $0x2f4] sm:$0xff]  ;;  %v2131_v63 = vunpack.c.h.bf16 %v1834_v52 }
 0x21e   : > { %2465 = vmatprep.subr.mxu1 %v2047_v6  ;;  %2526 = vmatprep.subr.mxu0 %v2158_v49  ;;  %v1820_v6 = vld [vmem:[#allocation10 + $0x12c] sm:$0xff]  ;;  %v2224_v51 = vunpack.c.h.bf16 %v1896_v38  ;;  %v2223_v11 = vunpack.c.l.bf16 %v1896_v38 }
 0x21f   : > { %2466 = vmatpush1.msra.mxu1 %v2046_v12  ;;  %2527 = vmatpush1.msra.mxu0 %v2157_v24  ;;  %v2130_v12 = vunpack.c.l.bf16 %v1834_v52  ;;  %v2110_v50 = vunpack.c.h.bf16 %v1820_v6  ;;  %v2092_v52 = vunpack.c.h.bf16 %v1808_v55 }
 0x220   : > { %2467 = vmatprep.subr.mxu1 %v2044_v57  ;;  %2528 = vmatprep.subr.mxu0 %v2155_v62  ;;  %v1894_v57 = vld [vmem:[#allocation10 + $0x2e8] sm:$0xff]  ;;  %v2112_v62 = vunpack.c.l.bf16 %v1822_v22 }
 0x221   : > { %2468 = vmatpush1.msra.mxu1 %v2043_v33  ;;  %2529 = vmatpush1.msra.mxu0 %v2154_v29  ;;  %v1818_v33 = vld [vmem:[#allocation10 + $0x120] sm:$0xff]  ;;  %v2221_v56 = vunpack.c.h.bf16 %v1894_v57  ;;  %v1804_v22 = vld [vmem:[#allocation10 + $0xcc] sm:$0xff] }
 0x222   : > { %2469 = vmatprep.subr.mxu1 %v2041_v30  ;;  %2530 = vmatprep.subr.mxu0 %v2152_v37  ;;  %v1892_v30 = vld [vmem:[#allocation10 + $0x2dc] sm:$0xff]  ;;  %v2109_v37 = vunpack.c.l.bf16 %v1820_v6  ;;  %v2088_v6 = vunpack.c.l.bf16 %v1806_v34 }
 0x223   : > { %2470 = vmatpush1.msra.mxu1 %v2040_v7  ;;  %2531 = vmatpush1.msra.mxu0 %v2151_v59  ;;  %v1816_v7 = vld [vmem:[#allocation10 + $0x114] sm:$0xff]  ;;  %v2107_v59 = vunpack.c.h.bf16 %v1818_v33 }
 0x224   : > { %2471 = vmatprep.subr.mxu1 %v2038_v58  ;;  %2532 = vmatprep.subr.mxu0 %v2149_v42  ;;  %v2220_v58 = vunpack.c.l.bf16 %v1894_v57  ;;  %v1890_v42 = vld [vmem:[#allocation10 + $0x2d0] sm:$0xff]  ;;  %v2104_v35 = vunpack.c.h.bf16 %v1816_v7  ;;  %v2085_v57 = vunpack.c.l.bf16 %v1804_v22 }
 0x225   : > { %2472 = vmatpush1.msra.mxu1 %v2037_v54  ;;  %2533 = vmatpush1.msra.mxu0 %v2148_v0  ;;  %v2106_v54 = vunpack.c.l.bf16 %v1818_v33  ;;  %v2218_v0 = vunpack.c.h.bf16 %v1892_v30 }
 0x226   : > { %2473 = vmatprep.subr.mxu1 %v2035_v27  ;;  %2534 = vmatprep.subr.mxu0 %v2146_v47  ;;  %v2217_v27 = vunpack.c.l.bf16 %v1892_v30  ;;  %v1888_v47 = vld [vmem:[#allocation10 + $0x2c4] sm:$0xff] }
 0x227   : > { %2474 = vmatpush1.msra.mxu1 %v2034_v44  ;;  %2535 = vmatpush1.msra.mxu0 %v2145_v16  ;;  %v2103_v44 = vunpack.c.l.bf16 %v1816_v7  ;;  %v2215_v16 = vunpack.c.h.bf16 %v1890_v42  ;;  %v1926_v30 = vld [vmem:[#allocation10 + $0x3a8] sm:$0xff]  ;;  %v1874_v7 = vld [vmem:[#allocation10 + $0x270] sm:$0xff] }
 0x228   : > { %2475 = vmatprep.subr.mxu1 %v2128_v5  ;;  %2536 = vmatprep.subr.mxu0 %v2143_v45  ;;  %v2214_v5 = vunpack.c.l.bf16 %v1890_v42  ;;  %v1886_v45 = vld [vmem:[#allocation10 + $0x2b8] sm:$0xff] }
 0x229   : > { %2476 = vmatpush2.msra.mxu1 %v2127_v10  ;;  %2537 = vmatpush1.msra.mxu0 %v2142_v17  ;;  %v2100_v10 = vunpack.c.l.bf16 %v1814_v53  ;;  %v2212_v17 = vunpack.c.h.bf16 %v1888_v47  ;;  %v1924_v42 = vld [vmem:[#allocation10 + $0x39c] sm:$0xff]  ;;  %v1872_v53 = vld [vmem:[#allocation10 + $0x264] sm:$0xff] }
 0x22a   : > { %2477 = vmatprep.subr.mxu1 %v2125_v46  ;;  %2538 = vmatprep.subr.mxu0 %v2140_v31  ;;  %v2211_v46 = vunpack.c.l.bf16 %v1888_v47  ;;  %v1884_v31 = vld [vmem:[#allocation10 + $0x2ac] sm:$0xff] }
 0x22b   : > { %2478 = vmatpush2.msra.mxu1 %v2124_v39  ;;  %v8137_v14 = vpop.f32.mrf.mxu0  ;;  %2539 = vmatpush1.msra.mxu0 %v2139_v9  ;;  %v2097_v39 = vunpack.c.l.bf16 %v1812_v36  ;;  %v2209_v9 = vunpack.c.h.bf16 %v1886_v45  ;;  %v1922_v47 = vld [vmem:[#allocation10 + $0x390] sm:$0xff]  ;;  %v1870_v36 = vld [vmem:[#allocation10 + $0x258] sm:$0xff] }
 0x22c   : > { %2479 = vmatprep.subr.mxu1 %v2122_v23  ;;  %2540 = vmatprep.subr.mxu0 %v2137_v61  ;;  %v2208_v23 = vunpack.c.l.bf16 %v1886_v45  ;;  %v1882_v61 = vld [vmem:[#allocation10 + $0x2a0] sm:$0xff] }
 0x22d   : > { %2480 = vmatpush2.msra.mxu1 %v2121_v26  ;;  %v1457_v49 = vpop.f32.mrf.mxu0  ;;  %2541 = vmatpush1.msra.mxu0 %v2136_v15  ;;  %v2094_v26 = vunpack.c.l.bf16 %v1810_v19  ;;  %v2206_v15 = vunpack.c.h.bf16 %v1884_v31  ;;  %v2203_v38 = vunpack.c.h.bf16 %v1882_v61  ;;  %v1920_v45 = vld [vmem:[#allocation10 + $0x384] sm:$0xff]  ;;  %v1868_v19 = vld [vmem:[#allocation10 + $0x24c] sm:$0xff] }
 0x22e   : > { %2481 = vmatprep.subr.mxu1 %v2119_v1  ;;  %v1458_v24 = vadd.f32 %v1457_v49, %v8139_v48  ;;  %2542 = vmatprep.subr.mxu0 %v2134_v32  ;;  %v2205_v1 = vunpack.c.l.bf16 %v1884_v31  ;;  %v1880_v32 = vld [vmem:[#allocation10 + $0x294] sm:$0xff]  ;;  %v1802_v49 = vld [vmem:[#allocation10 + $0xc0] sm:$0xff] }
 0x22f   : > { %2482 = vmatpush2.msra.mxu1 %v2118_v41  ;;  %2543 = vmatpush1.msra.mxu0 %v2133_v40  ;;  %v2091_v41 = vunpack.c.l.bf16 %v1808_v55  ;;  %v1456_v40 = vadd.f32 %v8137_v14, %v8139_v48  ;;  %v1928_v14 = vld [vmem:[#allocation10 + $0x3b4] sm:$0xff]  ;;  %v1866_v55 = vld [vmem:[#allocation10 + $0x240] sm:$0xff] }
 0x230   : > { %2483 = vmatprep.subr.mxu1 %v2116_v21  ;;  %v1753_v29 = vmul.f32 0.2, %v1458_v24  ;;  %vm1744_vm10 = vcmp.ge.f32.partialorder %v1458_v24, 0.0  ;;  %2544 = vmatprep.subr.mxu0 %v2131_v63  ;;  %v2089_v21 = vunpack.c.h.bf16 %v1806_v34  ;;  %v2202_v63 = vunpack.c.l.bf16 %v1882_v61  ;;  %v1918_v31 = vld [vmem:[#allocation10 + $0x378] sm:$0xff]  ;;  %v1916_v61 = vld [vmem:[#allocation10 + $0x36c] sm:$0xff] }
 0x231   : > { %2484 = vmatpush2.msra.mxu1 %v2115_v18  ;;  %2545 = vmatpush1.msra.mxu0 %v2130_v12  ;;  %v1878_v18 = vld [vmem:[#allocation10 + $0x288] sm:$0xff]  ;;  %v2200_v12 = vunpack.c.h.bf16 %v1880_v32  ;;  %vm1743_vm11 = vcmp.ge.f32.partialorder %v1456_v40, 0.0  ;;  %v1992_v34 = vld [vmem:[#allocation10 + $0x534] sm:$0xff] }
 0x232   : > { %2485 = vmatprep.subr.mxu1 %v2113_v43  ;;  %v8142_v20 = vsel %vm1744_vm10, %v1458_v24, %v1753_v29  ;;  %2546 = vmatprep.subr.mxu0 %v2224_v51  ;;  %v2086_v43 = vunpack.c.h.bf16 %v1804_v22  ;;  %v2199_v24 = vunpack.c.l.bf16 %v1880_v32  ;;  %v1876_v51 = vld [vmem:[#allocation10 + $0x27c] sm:$0xff]  ;;  %v2197_v33 = vunpack.c.h.bf16 %v1878_v18 }
 0x233   : > { %2486 = vmatpush2.msra.mxu1 %v2112_v62  ;;  %2507 = vmatprep.mubr.f32.mxu1 %v8142_v20  ;;  %v1752_v62 = vmul.f32 0.2, %v1456_v40  ;;  %v2196_v29 = vunpack.c.l.bf16 %v1878_v18  ;;  %v1914_v32 = vld [vmem:[#allocation10 + $0x360] sm:$0xff]  ;;  %v2254_v22 = vunpack.c.h.bf16 %v1916_v61  ;;  %vm3284_vm10 = vcmask 605184  }
 0x234   : > { %2487 = vmatprep.subr.mxu1 %v2110_v50  ;;  %2547 = vmatpush2.msra.mxu0 %v2223_v11  ;;  %v2083_v50 = vunpack.c.h.bf16 %v1802_v49  ;;  %v2082_v11 = vunpack.c.l.bf16 %v1802_v49 }
 0x235   : > { %2488 = vmatpush2.msra.mxu1 %v2109_v37  ;;  %2548 = vmatprep.subr.mxu0 %v2221_v56  ;;  %v2194_v37 = vunpack.c.h.bf16 %v1876_v51  ;;  %v2272_v56 = vunpack.c.h.bf16 %v1928_v14 }
 0x236   : > { %2489 = vmatprep.subr.mxu1 %v2107_v59  ;;  %2549 = vmatpush2.msra.mxu0 %v2220_v58  ;;  %v2271_v59 = vunpack.c.l.bf16 %v1928_v14  ;;  %v8147_v58 = vsel %vm1743_vm11, %v1456_v40, %v1752_v62  ;;  %v1990_v14 = vld [vmem:[#allocation10 + $0x528] sm:$0xff]  ;;  %vm3272_vm11 = vcmask 728064  }
 0x237   : > { %2490 = vmatpush2.msra.mxu1 %v2106_v54  ;;  %2550 = vmatprep.subr.mxu0 %v2218_v0  ;;  %v2193_v54 = vunpack.c.l.bf16 %v1876_v51  ;;  %v2269_v0 = vunpack.c.h.bf16 %v1926_v30 }
 0x238   : > { %2491 = vmatprep.subr.mxu1 %v2104_v35  ;;  %2551 = vmatpush2.msra.mxu0 %v2217_v27  ;;  %v2191_v35 = vunpack.c.h.bf16 %v1874_v7  ;;  %v2268_v27 = vunpack.c.l.bf16 %v1926_v30  ;;  %v2367_v30 = vunpack.c.l.bf16 %v1992_v34 }
 0x239   : > { %2492 = vmatpush2.msra.mxu1 %v2103_v44  ;;  %2552 = vmatprep.subr.mxu0 %v2215_v16  ;;  %v2190_v44 = vunpack.c.l.bf16 %v1874_v7  ;;  %v2266_v16 = vunpack.c.h.bf16 %v1924_v42 }
 0x23a   : > { %2493 = vmatprep.subr.mxu1 %v2101_v13  ;;  %2553 = vmatpush2.msra.mxu0 %v2214_v5  ;;  %v2188_v13 = vunpack.c.h.bf16 %v1872_v53  ;;  %v2265_v5 = vunpack.c.l.bf16 %v1924_v42  ;;  %v2365_v42 = vunpack.c.h.bf16 %v1990_v14 }
 0x23b   : > { %2494 = vmatpush2.msra.mxu1 %v2100_v10  ;;  %2554 = vmatprep.subr.mxu0 %v2212_v17  ;;  %v2187_v10 = vunpack.c.l.bf16 %v1872_v53  ;;  %v2263_v17 = vunpack.c.h.bf16 %v1922_v47  ;;  %v2364_v53 = vunpack.c.l.bf16 %v1990_v14  ;;  %v1972_v14 = vld [vmem:[#allocation10 + $0x4bc] sm:$0xff] }
 0x23c   : > { %2495 = vmatprep.subr.mxu1 %v2098_v28  ;;  %2555 = vmatpush2.msra.mxu0 %v2211_v46  ;;  %v2185_v28 = vunpack.c.h.bf16 %v1870_v36  ;;  %v2262_v46 = vunpack.c.l.bf16 %v1922_v47 }
 0x23d   : > { %2496 = vmatpush2.msra.mxu1 %v2097_v39  ;;  %2556 = vmatprep.subr.mxu0 %v2209_v9  ;;  %v2184_v39 = vunpack.c.l.bf16 %v1870_v36  ;;  %v2260_v9 = vunpack.c.h.bf16 %v1920_v45 }
 0x23e   : > { %2497 = vmatprep.subr.mxu1 %v2095_v2  ;;  %2557 = vmatpush2.msra.mxu0 %v2208_v23  ;;  %v2182_v2 = vunpack.c.h.bf16 %v1868_v19  ;;  %v2259_v23 = vunpack.c.l.bf16 %v1920_v45 }
 0x23f   : > { %2498 = vmatpush2.msra.mxu1 %v2094_v26  ;;  %2558 = vmatprep.subr.mxu0 %v2206_v15  ;;  %v2181_v26 = vunpack.c.l.bf16 %v1868_v19  ;;  %v2257_v15 = vunpack.c.h.bf16 %v1918_v31 }
 0x240   : > { %2499 = vmatprep.subr.mxu1 %v2092_v52  ;;  %2559 = vmatpush2.msra.mxu0 %v2205_v1  ;;  %v2179_v52 = vunpack.c.h.bf16 %v1866_v55  ;;  %v2256_v1 = vunpack.c.l.bf16 %v1918_v31 }
 0x241   : > { %2500 = vmatpush2.msra.mxu1 %v2091_v41  ;;  %2560 = vmatprep.subr.mxu0 %v2203_v38  ;;  %v2178_v41 = vunpack.c.l.bf16 %v1866_v55  ;;  %v2368_v38 = vunpack.c.h.bf16 %v1992_v34 }
 0x242   : > { %2501 = vmatprep.subr.mxu1 %v2089_v21  ;;  %2561 = vmatpush2.msra.mxu0 %v2202_v63  ;;  %v2253_v21 = vunpack.c.l.bf16 %v1916_v61  ;;  %v1912_v63 = vld [vmem:[#allocation10 + $0x354] sm:$0xff] }
 0x243   : > { %2502 = vmatpush2.msra.mxu1 %v2088_v6  ;;  %2562 = vmatprep.subr.mxu0 %v2200_v12  ;;  %v2251_v6 = vunpack.c.h.bf16 %v1914_v32  ;;  %v2250_v12 = vunpack.c.l.bf16 %v1914_v32  ;;  %v2247_v62 = vunpack.c.l.bf16 %v1912_v63 }
 0x244   : > { %2503 = vmatprep.subr.mxu1 %v2086_v43  ;;  %2563 = vmatpush2.msra.mxu0 %v2199_v24  ;;  %v1910_v43 = vld [vmem:[#allocation10 + $0x348] sm:$0xff] }
 0x245   : > { %2504 = vmatpush2.msra.mxu1 %v2085_v57  ;;  %2564 = vmatprep.subr.mxu0 %v2197_v33  ;;  %v2248_v57 = vunpack.c.h.bf16 %v1912_v63  ;;  %v1908_v33 = vld [vmem:[#allocation10 + $0x33c] sm:$0xff]  ;;  %v2244_v7 = vunpack.c.l.bf16 %v1910_v43 }
 0x246   : > { %2505 = vmatprep.subr.mxu1 %v2083_v50  ;;  %2565 = vmatpush2.msra.mxu0 %v2196_v29  ;;  %v2245_v29 = vunpack.c.h.bf16 %v1910_v43  ;;  %v1956_v43 = vld [vmem:[#allocation10 + $0x45c] sm:$0xff] }
 0x247   : > { %2506 = vmatpush2.msra.mxu1 %v2082_v11  ;;  %2566 = vmatprep.subr.mxu0 %v2194_v37  ;;  %v1988_v37 = vld [vmem:[#allocation10 + $0x51c] sm:$0xff] }
 0x248   : > { %2585 = vmatprep.subr.mxu1 %v2272_v56  ;;  %2508 = vmatmul.mubr.f32.vlgmr.msra.gmra.mxu1 %v8147_v58  ;;  %v1906_v56 = vld [vmem:[#allocation10 + $0x330] sm:$0xff]  ;;  %v2362_v47 = vunpack.c.h.bf16 %v1988_v37  ;;  %v2361_v36 = vunpack.c.l.bf16 %v1988_v37 }
 0x249   : > { %2586 = vmatpush1.msra.mxu1 %v2271_v59  ;;  %2567 = vmatpush2.msra.mxu0 %v2193_v54  ;;  %v2242_v54 = vunpack.c.h.bf16 %v1908_v33  ;;  %v1970_v37 = vld [vmem:[#allocation10 + $0x4b0] sm:$0xff] }
 0x24a   : > { %2587 = vmatprep.subr.mxu1 %v2269_v0  ;;  %2568 = vmatprep.subr.mxu0 %v2191_v35  ;;  %v1986_v0 = vld [vmem:[#allocation10 + $0x510] sm:$0xff]  ;;  %v2241_v35 = vunpack.c.l.bf16 %v1908_v33 }
 0x24b   : > { %2588 = vmatpush1.msra.mxu1 %v2268_v27  ;;  %2569 = vmatpush2.msra.mxu0 %v2190_v44  ;;  %v1904_v27 = vld [vmem:[#allocation10 + $0x324] sm:$0xff]  ;;  %v2239_v44 = vunpack.c.h.bf16 %v1906_v56  ;;  %v2359_v45 = vunpack.c.h.bf16 %v1986_v0  ;;  %v2358_v19 = vunpack.c.l.bf16 %v1986_v0  ;;  %v1954_v33 = vld [vmem:[#allocation10 + $0x450] sm:$0xff] }
 0x24c   : > { %2589 = vmatprep.subr.mxu1 %v2266_v16  ;;  %2570 = vmatprep.subr.mxu0 %v2188_v13  ;;  %v1984_v16 = vld [vmem:[#allocation10 + $0x504] sm:$0xff]  ;;  %v2238_v13 = vunpack.c.l.bf16 %v1906_v56 }
 0x24d   : > { %2590 = vmatpush1.msra.mxu1 %v2265_v5  ;;  %2571 = vmatpush2.msra.mxu0 %v2187_v10  ;;  %v1902_v5 = vld [vmem:[#allocation10 + $0x318] sm:$0xff]  ;;  %v2236_v10 = vunpack.c.h.bf16 %v1904_v27  ;;  %v2356_v31 = vunpack.c.h.bf16 %v1984_v16  ;;  %v2355_v55 = vunpack.c.l.bf16 %v1984_v16  ;;  %v1952_v56 = vld [vmem:[#allocation10 + $0x444] sm:$0xff] }
 0x24e   : > { %2591 = vmatprep.subr.mxu1 %v2263_v17  ;;  %2572 = vmatprep.subr.mxu0 %v2185_v28  ;;  %v1982_v17 = vld [vmem:[#allocation10 + $0x4f8] sm:$0xff]  ;;  %v2235_v28 = vunpack.c.l.bf16 %v1904_v27  ;;  %v1968_v0 = vld [vmem:[#allocation10 + $0x4a4] sm:$0xff] }
 0x24f   : > { %2592 = vmatpush1.msra.mxu1 %v2262_v46  ;;  %2573 = vmatpush2.msra.mxu0 %v2184_v39  ;;  %v1900_v46 = vld [vmem:[#allocation10 + $0x30c] sm:$0xff]  ;;  %v2233_v39 = vunpack.c.h.bf16 %v1902_v5  ;;  %v2353_v61 = vunpack.c.h.bf16 %v1982_v17  ;;  %v2352_v34 = vunpack.c.l.bf16 %v1982_v17  ;;  %v1950_v27 = vld [vmem:[#allocation10 + $0x438] sm:$0xff] }
 0x250   : > { %2593 = vmatprep.subr.mxu1 %v2260_v9  ;;  %v1526_v40 = vpop.f32.mrf.mxu0  ;;  %2574 = vmatprep.subr.mxu0 %v2182_v2  ;;  %v1980_v9 = vld [vmem:[#allocation10 + $0x4ec] sm:$0xff]  ;;  %v2232_v2 = vunpack.c.l.bf16 %v1902_v5  ;;  %v1966_v16 = vld [vmem:[#allocation10 + $0x498] sm:$0xff] }
 0x251   : > { %2594 = vmatpush1.msra.mxu1 %v2259_v23  ;;  %v1527_v18 = vadd.f32 %v1526_v40, %v8139_v48  ;;  %2575 = vmatpush2.msra.mxu0 %v2181_v26  ;;  %v1898_v23 = vld [vmem:[#allocation10 + $0x300] sm:$0xff]  ;;  %v2230_v26 = vunpack.c.h.bf16 %v1900_v46  ;;  %v2350_v32 = vunpack.c.h.bf16 %v1980_v9  ;;  %v1976_v40 = vld [vmem:[#allocation10 + $0x4d4] sm:$0xff]  ;;  %v1948_v5 = vld [vmem:[#allocation10 + $0x42c] sm:$0xff] }
 0x252   : > { %2595 = vmatprep.subr.mxu1 %v2257_v15  ;;  %v1528_v49 = vpop.f32.mrf.mxu0  ;;  %2576 = vmatprep.subr.mxu0 %v2179_v52  ;;  %v1978_v15 = vld [vmem:[#allocation10 + $0x4e0] sm:$0xff]  ;;  %v2229_v52 = vunpack.c.l.bf16 %v1900_v46  ;;  %v1964_v17 = vld [vmem:[#allocation10 + $0x48c] sm:$0xff] }
 0x253   : > { %2596 = vmatpush1.msra.mxu1 %v2256_v1  ;;  %vm1745_vm12 = vcmp.ge.f32.partialorder %v1527_v18, 0.0  ;;  %v1754_v24 = vmul.f32 0.2, %v1527_v18  ;;  %v1529_v51 = vadd.f32 %v1528_v49, %v8139_v48  ;;  %2577 = vmatpush2.msra.mxu0 %v2178_v41  ;;  %v1960_v1 = vld [vmem:[#allocation10 + $0x474] sm:$0xff]  ;;  %v2227_v41 = vunpack.c.h.bf16 %v1898_v23  ;;  %v1974_v49 = vld [vmem:[#allocation10 + $0x4c8] sm:$0xff]  ;;  %v1946_v46 = vld [vmem:[#allocation10 + $0x420] sm:$0xff] }
 0x254   : > { %2597 = vmatprep.subr.mxu1 %v2254_v22  ;;  %2656 = vmatprep.subr.mxu0 %v2368_v38  ;;  %v2349_v22 = vunpack.c.l.bf16 %v1980_v9  ;;  %v2226_v38 = vunpack.c.l.bf16 %v1898_v23  ;;  %v2347_v63 = vunpack.c.h.bf16 %v1978_v15  ;;  %v1962_v9 = vld [vmem:[#allocation10 + $0x480] sm:$0xff]  ;;  %v1944_v23 = vld [vmem:[#allocation10 + $0x414] sm:$0xff] }
 0x255   : > { %2598 = vmatpush1.msra.mxu1 %v2253_v21  ;;  %v1755_v50 = vmul.f32 0.2, %v1529_v51  ;;  %vm1746_vm14 = vcmp.ge.f32.partialorder %v1529_v51, 0.0  ;;  %v8152_v11 = vsel %vm1745_vm12, %v1527_v18, %v1754_v24  ;;  %v1958_v21 = vld [vmem:[#allocation10 + $0x468] sm:$0xff]  ;;  %v2320_v18 = vunpack.c.h.bf16 %v1960_v1 }
 0x256   : > { %2599 = vmatprep.subr.mxu1 %v2251_v6  ;;  %v2346_v6 = vunpack.c.l.bf16 %v1978_v15  ;;  %v2344_v24 = vunpack.c.h.bf16 %v1976_v40  ;;  %v2024_v15 = vld [vmem:[#allocation10 + $0x5f4] sm:$0xff]  ;;  %vm3260_vm12 = vcmask 736256  }
 0x257   : > { %2600 = vmatpush1.msra.mxu1 %v2250_v12  ;;  %v8154_v59 = vsel %vm1746_vm14, %v1529_v51, %v1755_v50  ;;  %v2319_v12 = vunpack.c.l.bf16 %v1960_v1  ;;  %v2317_v51 = vunpack.c.h.bf16 %v1958_v21  ;;  %v2341_v50 = vunpack.c.h.bf16 %v1974_v49  ;;  %v1942_v1 = vld [vmem:[#allocation10 + $0x408] sm:$0xff] }
 0x258   : > { %2601 = vmatprep.subr.mxu1 %v2248_v57  ;;  %2578 = vmatprep.mubr.f32.mxu0 %v8154_v59  ;;  %v2343_v57 = vunpack.c.l.bf16 %v1976_v40  ;;  %v2022_v40 = vld [vmem:[#allocation10 + $0x5e8] sm:$0xff]  ;;  %vm9823_vm14 = vcmask 744448  }
 0x259   : > { %2602 = vmatpush1.msra.mxu1 %v2247_v62  ;;  %2579 = vmatmul.mubr.f32.vlgmr.msra.gmra.mxu0 %v8152_v11  ;;  %v2316_v62 = vunpack.c.l.bf16 %v1958_v21  ;;  %v1940_v21 = vld [vmem:[#allocation10 + $0x3fc] sm:$0xff] }
 0x25a   : > { %2603 = vmatprep.subr.mxu1 %v2245_v29  ;;  %2657 = vmatpush1.msra.mxu0 %v2367_v30  ;;  %v2314_v29 = vunpack.c.h.bf16 %v1956_v43  ;;  %v2340_v30 = vunpack.c.l.bf16 %v1974_v49  ;;  %v2020_v49 = vld [vmem:[#allocation10 + $0x5dc] sm:$0xff] }
 0x25b   : > { %2604 = vmatpush1.msra.mxu1 %v2244_v7  ;;  %2658 = vmatprep.subr.mxu0 %v2365_v42  ;;  %v2313_v7 = vunpack.c.l.bf16 %v1956_v43  ;;  %v2338_v42 = vunpack.c.h.bf16 %v1972_v14  ;;  %v1938_v43 = vld [vmem:[#allocation10 + $0x3f0] sm:$0xff] }
 0x25c   : > { %2605 = vmatprep.subr.mxu1 %v2242_v54  ;;  %2659 = vmatpush1.msra.mxu0 %v2364_v53  ;;  %v2311_v54 = vunpack.c.h.bf16 %v1954_v33  ;;  %v2337_v53 = vunpack.c.l.bf16 %v1972_v14  ;;  %v2018_v14 = vld [vmem:[#allocation10 + $0x5d0] sm:$0xff] }
 0x25d   : > { %2606 = vmatpush1.msra.mxu1 %v2241_v35  ;;  %2660 = vmatprep.subr.mxu0 %v2362_v47  ;;  %v2310_v35 = vunpack.c.l.bf16 %v1954_v33  ;;  %v2335_v47 = vunpack.c.h.bf16 %v1970_v37  ;;  %v1936_v33 = vld [vmem:[#allocation10 + $0x3e4] sm:$0xff] }
 0x25e   : > { %2607 = vmatprep.subr.mxu1 %v2239_v44  ;;  %2661 = vmatpush1.msra.mxu0 %v2361_v36  ;;  %v2308_v44 = vunpack.c.h.bf16 %v1952_v56  ;;  %v2334_v36 = vunpack.c.l.bf16 %v1970_v37  ;;  %v2016_v37 = vld [vmem:[#allocation10 + $0x5c4] sm:$0xff] }
 0x25f   : > { %2608 = vmatpush1.msra.mxu1 %v2238_v13  ;;  %2662 = vmatprep.subr.mxu0 %v2359_v45  ;;  %v2307_v13 = vunpack.c.l.bf16 %v1952_v56  ;;  %v2332_v45 = vunpack.c.h.bf16 %v1968_v0  ;;  %v1934_v56 = vld [vmem:[#allocation10 + $0x3d8] sm:$0xff] }
 0x260   : > { %2609 = vmatprep.subr.mxu1 %v2236_v10  ;;  %2663 = vmatpush1.msra.mxu0 %v2358_v19  ;;  %v2305_v10 = vunpack.c.h.bf16 %v1950_v27  ;;  %v2331_v19 = vunpack.c.l.bf16 %v1968_v0  ;;  %v2014_v0 = vld [vmem:[#allocation10 + $0x5b8] sm:$0xff] }
 0x261   : > { %2610 = vmatpush1.msra.mxu1 %v2235_v28  ;;  %2664 = vmatprep.subr.mxu0 %v2356_v31  ;;  %v2304_v28 = vunpack.c.l.bf16 %v1950_v27  ;;  %v2329_v31 = vunpack.c.h.bf16 %v1966_v16  ;;  %v1932_v27 = vld [vmem:[#allocation10 + $0x3cc] sm:$0xff] }
 0x262   : > { %2611 = vmatprep.subr.mxu1 %v2233_v39  ;;  %2665 = vmatpush1.msra.mxu0 %v2355_v55  ;;  %v2302_v39 = vunpack.c.h.bf16 %v1948_v5  ;;  %v2328_v55 = vunpack.c.l.bf16 %v1966_v16  ;;  %v2012_v16 = vld [vmem:[#allocation10 + $0x5ac] sm:$0xff] }
 0x263   : > { %2612 = vmatpush1.msra.mxu1 %v2232_v2  ;;  %2666 = vmatprep.subr.mxu0 %v2353_v61  ;;  %v2301_v2 = vunpack.c.l.bf16 %v1948_v5  ;;  %v2326_v61 = vunpack.c.h.bf16 %v1964_v17  ;;  %v1930_v5 = vld [vmem:[#allocation10 + $0x3c0] sm:$0xff] }
 0x264   : > { %2613 = vmatprep.subr.mxu1 %v2230_v26  ;;  %2667 = vmatpush1.msra.mxu0 %v2352_v34  ;;  %v2299_v26 = vunpack.c.h.bf16 %v1946_v46  ;;  %v2325_v34 = vunpack.c.l.bf16 %v1964_v17  ;;  %v2010_v17 = vld [vmem:[#allocation10 + $0x5a0] sm:$0xff] }
 0x265   : > { %2614 = vmatpush1.msra.mxu1 %v2229_v52  ;;  %2668 = vmatprep.subr.mxu0 %v2350_v32  ;;  %v2298_v52 = vunpack.c.l.bf16 %v1946_v46  ;;  %v2323_v32 = vunpack.c.h.bf16 %v1962_v9  ;;  %v2398_v46 = vunpack.c.h.bf16 %v2012_v16 }
 0x266   : > { %2615 = vmatprep.subr.mxu1 %v2227_v41  ;;  %2669 = vmatpush1.msra.mxu0 %v2349_v22  ;;  %v2296_v41 = vunpack.c.h.bf16 %v1944_v23  ;;  %v2322_v22 = vunpack.c.l.bf16 %v1962_v9  ;;  %v2008_v9 = vld [vmem:[#allocation10 + $0x594] sm:$0xff] }
 0x267   : > { %2616 = vmatpush1.msra.mxu1 %v2226_v38  ;;  %2670 = vmatprep.subr.mxu0 %v2347_v63  ;;  %v2295_v38 = vunpack.c.l.bf16 %v1944_v23  ;;  %v2416_v63 = vunpack.c.h.bf16 %v2024_v15  ;;  %v2395_v23 = vunpack.c.h.bf16 %v2010_v17 }
 0x268   : > { %2617 = vmatprep.subr.mxu1 %v2320_v18  ;;  %2671 = vmatpush1.msra.mxu0 %v2346_v6  ;;  %v2293_v18 = vunpack.c.h.bf16 %v1942_v1  ;;  %v2415_v6 = vunpack.c.l.bf16 %v2024_v15  ;;  %v2392_v15 = vunpack.c.h.bf16 %v2008_v9 }
 0x269   : > { %2618 = vmatpush2.msra.mxu1 %v2319_v12  ;;  %2672 = vmatprep.subr.mxu0 %v2344_v24  ;;  %v2292_v12 = vunpack.c.l.bf16 %v1942_v1  ;;  %v2413_v24 = vunpack.c.h.bf16 %v2022_v40  ;;  %v2004_v1 = vld [vmem:[#allocation10 + $0x57c] sm:$0xff] }
 0x26a   : > { %2619 = vmatprep.subr.mxu1 %v2317_v51  ;;  %2673 = vmatpush1.msra.mxu0 %v2343_v57  ;;  %v2290_v51 = vunpack.c.h.bf16 %v1940_v21  ;;  %v2412_v57 = vunpack.c.l.bf16 %v2022_v40  ;;  %v2386_v40 = vunpack.c.h.bf16 %v2004_v1 }
 0x26b   : > { %2620 = vmatpush2.msra.mxu1 %v2316_v62  ;;  %2674 = vmatprep.subr.mxu0 %v2341_v50  ;;  %v2289_v62 = vunpack.c.l.bf16 %v1940_v21  ;;  %v2410_v50 = vunpack.c.h.bf16 %v2020_v49  ;;  %v2000_v21 = vld [vmem:[#allocation10 + $0x564] sm:$0xff] }
 0x26c   : > { %2621 = vmatprep.subr.mxu1 %v2314_v29  ;;  %2675 = vmatpush1.msra.mxu0 %v2340_v30  ;;  %v2287_v29 = vunpack.c.h.bf16 %v1938_v43  ;;  %v2409_v30 = vunpack.c.l.bf16 %v2020_v49  ;;  %v2380_v49 = vunpack.c.h.bf16 %v2000_v21 }
 0x26d   : > { %2622 = vmatpush2.msra.mxu1 %v2313_v7  ;;  %2676 = vmatprep.subr.mxu0 %v2338_v42  ;;  %v2286_v7 = vunpack.c.l.bf16 %v1938_v43  ;;  %v2407_v42 = vunpack.c.h.bf16 %v2018_v14  ;;  %v1996_v43 = vld [vmem:[#allocation10 + $0x54c] sm:$0xff] }
 0x26e   : > { %2623 = vmatprep.subr.mxu1 %v2311_v54  ;;  %2677 = vmatpush1.msra.mxu0 %v2337_v53  ;;  %v2284_v54 = vunpack.c.h.bf16 %v1936_v33  ;;  %v2406_v53 = vunpack.c.l.bf16 %v2018_v14  ;;  %v2374_v14 = vunpack.c.h.bf16 %v1996_v43 }
 0x26f   : > { %2624 = vmatpush2.msra.mxu1 %v2310_v35  ;;  %2678 = vmatprep.subr.mxu0 %v2335_v47  ;;  %v2283_v35 = vunpack.c.l.bf16 %v1936_v33  ;;  %v2404_v47 = vunpack.c.h.bf16 %v2016_v37  ;;  %v8162_v33 = vld [vmem:[#allocation10 + $0x170] ss:$12 sps:$4 sm:$0xff]  }
 0x270   : > { %2625 = vmatprep.subr.mxu1 %v2308_v44  ;;  %2679 = vmatpush1.msra.mxu0 %v2334_v36  ;;  %v2281_v44 = vunpack.c.h.bf16 %v1934_v56  ;;  %v2403_v36 = vunpack.c.l.bf16 %v2016_v37 }
 0x271   : > { %2626 = vmatpush2.msra.mxu1 %v2307_v13  ;;  %2680 = vmatprep.subr.mxu0 %v2332_v45  ;;  %v2280_v13 = vunpack.c.l.bf16 %v1934_v56  ;;  %v2401_v45 = vunpack.c.h.bf16 %v2014_v0 }
 0x272   : > { %2627 = vmatprep.subr.mxu1 %v2305_v10  ;;  %2681 = vmatpush1.msra.mxu0 %v2331_v19  ;;  %v2278_v10 = vunpack.c.h.bf16 %v1932_v27  ;;  %v2400_v19 = vunpack.c.l.bf16 %v2014_v0 }
 0x273   : > { %2628 = vmatpush2.msra.mxu1 %v2304_v28  ;;  %2682 = vmatprep.subr.mxu0 %v2329_v31  ;;  %v2277_v28 = vunpack.c.l.bf16 %v1932_v27  ;;  %v8158_v31 = vld [vmem:[#allocation10 + $0x624] sm:$0x33]  ;;  %v2028_v27 = vld [vmem:[#allocation10 + $0x60c] sm:$0xff] }
 0x274   : > { %2629 = vmatprep.subr.mxu1 %v2302_v39  ;;  %2683 = vmatpush1.msra.mxu0 %v2328_v55  ;;  %v2275_v39 = vunpack.c.h.bf16 %v1930_v5  ;;  %v2397_v55 = vunpack.c.l.bf16 %v2012_v16 }
 0x275   : > { %2630 = vmatpush2.msra.mxu1 %v2301_v2  ;;  %2684 = vmatprep.subr.mxu0 %v2326_v61  ;;  %v2274_v2 = vunpack.c.l.bf16 %v1930_v5  ;;  %v2394_v61 = vunpack.c.l.bf16 %v2010_v17  ;;  %v2422_v5 = vunpack.c.h.bf16 %v2028_v27 }
 0x276   : > { %2631 = vmatprep.subr.mxu1 %v2299_v26  ;;  %2685 = vmatpush1.msra.mxu0 %v2325_v34  ;;  %v2006_v26 = vld [vmem:[#allocation10 + $0x588] sm:$0xff]  ;;  %v2428_v34 = vunpack.c.h.bf16 %v8158_v31 }
 0x277   : > { %2632 = vmatpush2.msra.mxu1 %v2298_v52  ;;  %2686 = vmatprep.subr.mxu0 %v2323_v32  ;;  %v2391_v52 = vunpack.c.l.bf16 %v2008_v9  ;;  %v2389_v32 = vunpack.c.h.bf16 %v2006_v26  ;;  %v1801_v9 = vld [vmem:[#allocation10 + $0xb0] ss:$12 sps:$4 sm:$0xff]  }
 0x278   : > { %2633 = vmatprep.subr.mxu1 %v2296_v41  ;;  %2687 = vmatpush1.msra.mxu0 %v2322_v22  ;;  %v2388_v41 = vunpack.c.l.bf16 %v2006_v26  ;;  %v2002_v22 = vld [vmem:[#allocation10 + $0x570] sm:$0xff]  ;;  %v1829_v26 = vld [vmem:[#allocation10 + $0x158] ss:$12 sps:$4 sm:$0xff]  }
 0x279   : > { %2634 = vmatpush2.msra.mxu1 %v2295_v38  ;;  %2688 = vmatprep.subr.mxu0 %v2416_v63  ;;  %v2385_v38 = vunpack.c.l.bf16 %v2004_v1  ;;  %v2383_v63 = vunpack.c.h.bf16 %v2002_v22  ;;  %v2078_v1 = vunpack.c.l.bf16 %v1801_v9 }
 0x27a   : > { %2635 = vmatprep.subr.mxu1 %v2293_v18  ;;  %2689 = vmatpush2.msra.mxu0 %v2415_v6  ;;  %v2382_v18 = vunpack.c.l.bf16 %v2002_v22  ;;  %v1998_v6 = vld [vmem:[#allocation10 + $0x558] sm:$0xff]  ;;  %v2123_v22 = vunpack.c.h.bf16 %v1829_v26 }
 0x27b   : > { %2636 = vmatpush2.msra.mxu1 %v2292_v12  ;;  %2690 = vmatprep.subr.mxu0 %v2413_v24  ;;  %v2379_v12 = vunpack.c.l.bf16 %v2000_v21  ;;  %v2377_v24 = vunpack.c.h.bf16 %v1998_v6  ;;  %v1825_v21 = vld [vmem:[#allocation10 + $0x14c] ss:$420 sps:$4 sm:$0xff]  }
 0x27c   : > { %2637 = vmatprep.subr.mxu1 %v2290_v51  ;;  %2691 = vmatpush2.msra.mxu0 %v2412_v57  ;;  %v2376_v51 = vunpack.c.l.bf16 %v1998_v6  ;;  %v1994_v57 = vld [vmem:[#allocation10 + $0x540] sm:$0xff] }
 0x27d   : > { %2638 = vmatpush2.msra.mxu1 %v2289_v62  ;;  %2692 = vmatprep.subr.mxu0 %v2410_v50  ;;  %v2373_v62 = vunpack.c.l.bf16 %v1996_v43  ;;  %v2371_v50 = vunpack.c.h.bf16 %v1994_v57 }
 0x27e   : > { %2639 = vmatprep.subr.mxu1 %v2287_v29  ;;  %2693 = vmatpush2.msra.mxu0 %v2409_v30  ;;  %v2370_v29 = vunpack.c.l.bf16 %v1994_v57  ;;  %v2129_v30 = vunpack.c.h.bf16 %v8162_v33  ;;  %v2222_v57 = vunpack.c.h.bf16 %v1825_v21 }
 0x27f   : > { %2640 = vmatpush2.msra.mxu1 %v2286_v7  ;;  %2694 = vmatprep.subr.mxu0 %v2407_v42 }
 0x280   : > { %2641 = vmatprep.subr.mxu1 %v2284_v54  ;;  %2695 = vmatpush2.msra.mxu0 %v2406_v53  ;;  %v2030_v53 = vld [vmem:[#allocation10 + $0x618] sm:$0xff] }
 0x281   : > { %2642 = vmatpush2.msra.mxu1 %v2283_v35  ;;  %2696 = vmatprep.subr.mxu0 %v2404_v47  ;;  %v2427_v35 = vunpack.c.l.bf16 %v8158_v31  ;;  %v2424_v16 = vunpack.c.l.bf16 %v2030_v53 }
 0x282   : > { %2643 = vmatprep.subr.mxu1 %v2281_v44  ;;  %2697 = vmatpush2.msra.mxu0 %v2403_v36  ;;  %v2425_v44 = vunpack.c.h.bf16 %v2030_v53 }
 0x283   : > { %2644 = vmatpush2.msra.mxu1 %v2280_v13  ;;  %2698 = vmatprep.subr.mxu0 %v2401_v45  ;;  %v2026_v13 = vld [vmem:[#allocation10 + $0x600] sm:$0xff]  ;;  %v2421_v45 = vunpack.c.l.bf16 %v2028_v27 }
 0x284   : > { %2645 = vmatprep.subr.mxu1 %v2278_v10  ;;  %2699 = vmatpush2.msra.mxu0 %v2400_v19  ;;  %v1797_v10 = vld [vmem:[#allocation10 + $0xa4] ss:$600 sps:$4 sm:$0xff]   ;;  %v2419_v19 = vunpack.c.h.bf16 %v2026_v13  ;;  %v2418_v17 = vunpack.c.l.bf16 %v2026_v13 }
 0x285   : > { %2646 = vmatpush2.msra.mxu1 %v2277_v28  ;;  %2700 = vmatprep.subr.mxu0 %v2398_v46  ;;  %v2225_v28 = vunpack.c.h.bf16 %v1797_v10 }
 0x286   : > { %2647 = vmatprep.subr.mxu1 %v2275_v39  ;;  %2701 = vmatpush2.msra.mxu0 %v2397_v55 }
 0x287   : > { %2648 = vmatpush2.msra.mxu1 %v2274_v2  ;;  %2702 = vmatprep.subr.mxu0 %v2395_v23 }
 0x288   : > { %2703 = vmatpush2.msra.mxu0 %v2394_v61  ;;  %5780 = vmatprep.subr.msk.mxu1 %vm1265_vm8, %v2428_v34  ;;  %v2081_v61 = vunpack.c.h.bf16 %v1801_v9 }
 0x289   : > { %2704 = vmatprep.subr.mxu0 %v2392_v15  ;;  %v2126_v15 = vunpack.c.l.bf16 %v8162_v33 }
 0x28a   : > { %2705 = vmatpush2.msra.mxu0 %v2391_v52 }
 0x28b   : > { %2706 = vmatprep.subr.mxu0 %v2389_v32  ;;  %v1795_v32 = vld [vmem:[#allocation10 + $0x98] ss:$420 sps:$4 sm:$0xff]  }
 0x28c   : > { %2707 = vmatpush2.msra.mxu0 %v2388_v41  ;;  %v2072_v6 = vunpack.c.l.bf16 %v1795_v32  ;;  %v2177_v43 = vunpack.c.h.bf16 %v1795_v32 }
 0x28d   : > { %2708 = vmatprep.subr.mxu0 %v2386_v40 }
 0x28e   : > { %2709 = vmatpush2.msra.mxu0 %v2385_v38  ;;  %v2075_v38 = vunpack.c.l.bf16 %v1797_v10 }
 0x28f   : > { %2710 = vmatprep.subr.mxu0 %v2383_v63 }
 0x290   : > { %2711 = vmatpush2.msra.mxu0 %v2382_v18  ;;  %v2120_v18 = vunpack.c.l.bf16 %v1829_v26 }
 0x291   : > { %2712 = vmatprep.subr.mxu0 %v2380_v49  ;;  %v1793_v49 = vld [vmem:[#allocation10 + $0x8c] ss:$420 sps:$4 sm:$0xff]  }
 0x292   : > { %2713 = vmatpush2.msra.mxu0 %v2379_v12  ;;  %v2174_v33 = vunpack.c.h.bf16 %v1793_v49 }
 0x293   : > { %2714 = vmatprep.subr.mxu0 %v2377_v24  ;;  %v1823_v24 = vld [vmem:[#allocation10 + $0x140] ss:$420 sps:$4 sm:$0xff]  }
 0x294   : > { %2715 = vmatpush2.msra.mxu0 %v2376_v51  ;;  %v2117_v51 = vunpack.c.l.bf16 %v1825_v21 }
 0x295   : > { %2716 = vmatprep.subr.mxu0 %v2374_v14 }
 0x296   : > { %2717 = vmatpush2.msra.mxu0 %v2373_v62  ;;  %v1821_v62 = vld [vmem:[#allocation10 + $0x134] ss:$420 sps:$4 sm:$0xff]  }
 0x297   : > { %2718 = vmatprep.subr.mxu0 %v2371_v50  ;;  %v2114_v50 = vunpack.c.l.bf16 %v1823_v24  ;;  %v2216_v53 = vunpack.c.h.bf16 %v1821_v62 }
 0x298   : > { %2719 = vmatpush2.msra.mxu0 %v2370_v29  ;;  %v1789_v29 = vld [vmem:[#allocation10 + $0x74] ss:$420 sps:$4 sm:$0xff]  }
 0x299   : > { %5906 = vmatprep.subr.mxu0 %v2129_v30  ;;  %v2219_v30 = vunpack.c.h.bf16 %v1823_v24  ;;  %v2168_v27 = vunpack.c.h.bf16 %v1789_v29 }
 0x29c   : > { %v1597_v37 = vpop.f32.mrf.mxu0 }
 0x29d   : > { %v1598_v7 = vadd.f32 %v1597_v37, %v8139_v48 }
 0x29e   : > { %v1599_v56 = vpop.f32.mrf.mxu0 }
 0x29f   : > { %v1600_v42 = vadd.f32 %v1599_v56, %v8139_v48  ;;  %v1756_v54 = vmul.f32 0.2, %v1598_v7  ;;  %vm1747_vm13 = vcmp.ge.f32.partialorder %v1598_v7, 0.0 }
 0x2a1   : > { %v1757_v0 = vmul.f32 0.2, %v1600_v42  ;;  %vm1748_vm0 = vcmp.ge.f32.partialorder %v1600_v42, 0.0  ;;  %v8171_v36 = vsel %vm1747_vm13, %v1598_v7, %v1756_v54  ;;  %v1819_v7 = vld [vmem:[#allocation10 + $0x128] ss:$420 sps:$4 sm:$0xff]   ;;  %vm9824_vm13 = vmmov %vm9823_vm14 }
 0x2a2   : > { %v1787_v54 = vld [vmem:[#allocation10 + $0x68] ss:$420 sps:$4 sm:$0xff]   ;;  %v2213_v13 = vunpack.c.h.bf16 %v1819_v7 }
 0x2a3   : > { %v8168_v47 = vsel %vm1748_vm0, %v1600_v42, %v1757_v0  ;;  %v2111_v42 = vunpack.c.l.bf16 %v1821_v62  ;;  %v2063_v0 = vunpack.c.l.bf16 %v1789_v29  ;;  %v2165_v10 = vunpack.c.h.bf16 %v1787_v54 }
 0x2a4   : > { %2649 = vmatprep.mubr.f32.mxu1 %v8168_v47  ;;  %vm9825_vm0 = vcmask 752640  }
 0x2a5   : > { %2650 = vmatmul.mubr.f32.vlgmr.msra.gmra.mxu1 %v8171_v36 }
 0x2a6   : > { %5781 = vmatpush1.msk.msra.mxu1 %vm1265_vm8, %v2427_v35  ;;  %2791 = vmatprep.mubr.f32.mxu1 %v9741_v25  ;;  %v1817_v35 = vld [vmem:[#allocation10 + $0x11c] ss:$420 sps:$4 sm:$0xff]  }
 0x2a7   : > { %2753 = vmatprep.subr.mxu1 %v2425_v44  ;;  %v2108_v44 = vunpack.c.l.bf16 %v1819_v7 }
 0x2a8   : > { %2754 = vmatpush1.msra.mxu1 %v2424_v16  ;;  %v1785_v16 = vld [vmem:[#allocation10 + $0x5c] ss:$420 sps:$4 sm:$0xff]  }
 0x2a9   : > { %2755 = vmatprep.subr.mxu1 %v2422_v5  ;;  %v2060_v5 = vunpack.c.l.bf16 %v1787_v54 }
 0x2aa   : > { %2756 = vmatpush1.msra.mxu1 %v2421_v45  ;;  %v1815_v45 = vld [vmem:[#allocation10 + $0x110] ss:$420 sps:$4 sm:$0xff]  }
 0x2ab   : > { %2757 = vmatprep.subr.mxu1 %v2419_v19  ;;  %v2105_v19 = vunpack.c.l.bf16 %v1817_v35  ;;  %v2207_v9 = vunpack.c.h.bf16 %v1815_v45 }
 0x2ac   : > { %2758 = vmatpush1.msra.mxu1 %v2418_v17  ;;  %v1783_v17 = vld [vmem:[#allocation10 + $0x50] ss:$420 sps:$4 sm:$0xff]  }
 0x2ad   : > { %5941 = vmatprep.subr.mxu1 %v2225_v28  ;;  %v2057_v28 = vunpack.c.l.bf16 %v1785_v16 }
 0x2c8   : > { %v1668_v46 = vpop.f32.mrf.mxu1 }
 0x2c9   : > { %v1669_v31 = vadd.f32 %v1668_v46, %v8139_v48  ;;  %v1813_v46 = vld [vmem:[#allocation10 + $0x104] ss:$420 sps:$4 sm:$0xff]  }
 0x2ca   : > { %v1670_v39 = vpop.f32.mrf.mxu1  ;;  %v2099_v26 = vunpack.c.l.bf16 %v1813_v46 }
 0x2cb   : > { %v1671_v55 = vadd.f32 %v1670_v39, %v8139_v48  ;;  %v1758_v2 = vmul.f32 0.2, %v1669_v31  ;;  %vm1749_vm9 = vcmp.ge.f32.partialorder %v1669_v31, 0.0  ;;  %v2102_v39 = vunpack.c.l.bf16 %v1815_v45  ;;  %v1837_v45 = vld [vmem:[#allocation10 + $0x194] ss:$540 sps:$4 sm:$0xff]  }
 0x2cd   : > { %v1759_v23 = vmul.f32 0.2, %v1671_v55  ;;  %vm1750_vm3 = vcmp.ge.f32.partialorder %v1671_v55, 0.0  ;;  %v8182_v52 = vsel %vm1749_vm9, %v1669_v31, %v1758_v2  ;;  %v2162_v31 = vunpack.c.h.bf16 %v1785_v16  ;;  %v1869_v16 = vld [vmem:[#allocation10 + $0x254] ss:$540 sps:$4 sm:$0xff]  }
 0x2ce   : > { %v2054_v2 = vunpack.c.l.bf16 %v1783_v17  ;;  %vm3226_vm9 = vcmask 875520  }
 0x2cf   : > { %v8178_v34 = vsel %vm1750_vm3, %v1671_v55, %v1759_v23  ;;  %v1781_v55 = vld [vmem:[#allocation10 + $0x44] ss:$420 sps:$4 sm:$0xff]   ;;  %v1811_v23 = vld [vmem:[#allocation10 + $0xf8] ss:$420 sps:$4 sm:$0xff]   ;;  %vm9826_vm3 = vmmov %vm9825_vm0 }
 0x2d0   : > { %2720 = vmatprep.mubr.f32.mxu0 %v8178_v34  ;;  %v2051_v32 = vunpack.c.l.bf16 %v1781_v55  ;;  %v2201_v21 = vunpack.c.h.bf16 %v1811_v23 }
 0x2d1   : > { %v1739_v41 = vpop.f32.mrf.mxu0  ;;  %2721 = vmatmul.mubr.f32.vlgmr.msra.gmra.mxu0 %v8182_v52 }
 0x2d2   : > { %v1740_v40 = vadd.f32 %v1739_v41, %v8139_v48  ;;  %5907 = vmatpush3.msra.mxu0 %v2081_v61  ;;  %2862 = vmatprep.mubr.f32.mxu0 %v8142_v20  ;;  %v1791_v48 = vld [vmem:[#allocation10 + $0x80] ss:$420 sps:$4 sm:$0xff]   ;;  %v2069_v20 = vunpack.c.l.bf16 %v1793_v49  ;;  %v2159_v61 = vunpack.c.h.bf16 %v1783_v17  ;;  %v1809_v41 = vld [vmem:[#allocation10 + $0xec] ss:$420 sps:$4 sm:$0xff]  }
 0x2d3   : > { %5908 = vmatprep.subr.mxu0 %v2126_v15  ;;  %v6426_v63 = vpop.f32.mrf.mxu0  ;;  %v2066_v37 = vunpack.c.l.bf16 %v1791_v48  ;;  %v2171_v56 = vunpack.c.h.bf16 %v1791_v48  ;;  %v1779_v15 = vld [vmem:[#allocation10 + $0x38] ss:$420 sps:$4 sm:$0xff]   ;;  %v2093_v49 = vunpack.c.l.bf16 %v1809_v41  ;;  %v1867_v17 = vld [vmem:[#allocation10 + $0x248] ss:$540 sps:$4 sm:$0xff]  }
 0x2d4   : > { %vm1751_vm1 = vcmp.ge.f32.partialorder %v1740_v40, 0.0  ;;  %v1760_v12 = vmul.f32 0.2, %v1740_v40  ;;  %5909 = vmatpush3.msra.mxu0 %v2078_v1  ;;  %v2204_v1 = vunpack.c.h.bf16 %v1813_v46  ;;  %v2048_v63 = vunpack.c.l.bf16 %v1779_v15 }
 0x2d5   : > { %5910 = vmatprep.subr.mxu0 %v2123_v22  ;;  %v2156_v22 = vunpack.c.h.bf16 %v1781_v55  ;;  %v2318_v46 = vunpack.c.h.bf16 %v1869_v16  ;;  %v2180_v55 = vunpack.c.l.bf16 %v1867_v17 }
 0x2d6   : > { %v8187_v14 = vsel %vm1751_vm1, %v1740_v40, %v1760_v12  ;;  %5911 = vmatpush3.msra.mxu0 %v2075_v38  ;;  %v2096_v40 = vunpack.c.l.bf16 %v1811_v23  ;;  %v1777_v38 = vld [vmem:[#allocation10 + $0x2c] ss:$420 sps:$4 sm:$0xff]   ;;  %v1775_v12 = vld [vmem:[#allocation10 + $0x20] ss:$420 sps:$4 sm:$0xff]   ;;  %vm3214_vm1 = vcmask 883712  }
 0x2d7   : > { %5912 = vmatprep.subr.mxu0 %v2120_v18  ;;  %5782 = vmatmul.mubr.msk.f32.vlgmr.msra.gmra.mxu1 %vm2430_vm2, %v8187_v14  ;;  %v1807_v18 = vld [vmem:[#allocation10 + $0xe0] ss:$420 sps:$4 sm:$0xff]   ;;  %v2045_v24 = vunpack.c.l.bf16 %v1777_v38  ;;  %v2147_v29 = vunpack.c.h.bf16 %v1775_v12 }
 0x2d8   : > { %5913 = vmatpush3.msra.mxu0 %v2072_v6  ;;  %5942 = vmatpush3.msra.mxu1 %v2177_v43  ;;  %v2153_v6 = vunpack.c.h.bf16 %v1779_v15  ;;  %v2198_v43 = vunpack.c.h.bf16 %v1809_v41  ;;  %v2090_v48 = vunpack.c.l.bf16 %v1807_v18  ;;  %v2195_v62 = vunpack.c.h.bf16 %v1807_v18  ;;  %v1953_v15 = vld [vmem:[#allocation10 + $0x44c] ss:$420 sps:$4 sm:$0xff]   ;;  %v1949_v18 = vld [vmem:[#allocation10 + $0x434] ss:$420 sps:$4 sm:$0xff]  }
 0x2d9   : > { %5914 = vmatprep.subr.mxu0 %v2117_v51  ;;  %5943 = vmatprep.subr.mxu1 %v2222_v57  ;;  %v1805_v51 = vld [vmem:[#allocation10 + $0xd4] ss:$420 sps:$4 sm:$0xff]   ;;  %v2150_v57 = vunpack.c.h.bf16 %v1777_v38  ;;  %v2309_v38 = vunpack.c.l.bf16 %v1953_v15 }
 0x2da   : > { %2932 = vmatprep.mubr.f32.mxu1 %v8154_v59  ;;  %5915 = vmatpush3.msra.mxu0 %v2069_v20  ;;  %v2210_v59 = vunpack.c.h.bf16 %v1817_v35  ;;  %v1773_v20 = vld [vmem:[#allocation10 + $0x14] ss:$420 sps:$4 sm:$0xff]   ;;  %v2192_v7 = vunpack.c.h.bf16 %v1805_v51 }
 0x2db   : > { %5944 = vmatpush3.msra.mxu1 %v2174_v33  ;;  %5916 = vmatprep.subr.mxu0 %v2114_v50  ;;  %v2042_v33 = vunpack.c.l.bf16 %v1775_v12  ;;  %v1803_v50 = vld [vmem:[#allocation10 + $0xc8] ss:$420 sps:$4 sm:$0xff]   ;;  %v1917_v12 = vld [vmem:[#allocation10 + $0x374] ss:$420 sps:$4 sm:$0xff]  }
 0x2dc   : > { %5945 = vmatprep.subr.mxu1 %v2219_v30  ;;  %5917 = vmatpush3.msra.mxu0 %v2066_v37  ;;  %v2087_v30 = vunpack.c.l.bf16 %v1805_v51  ;;  %v1771_v37 = vld [vmem:[#allocation10 + $0x8] ss:$420 sps:$4 sm:$0xff]   ;;  %v2084_v54 = vunpack.c.l.bf16 %v1803_v50 }
 0x2dd   : > { %5946 = vmatpush3.msra.mxu1 %v2171_v56  ;;  %5918 = vmatprep.subr.mxu0 %v2111_v42  ;;  %v2039_v56 = vunpack.c.l.bf16 %v1773_v20  ;;  %v2144_v42 = vunpack.c.h.bf16 %v1773_v20  ;;  %v2036_v35 = vunpack.c.l.bf16 %v1771_v37  ;;  %v1947_v51 = vld [vmem:[#allocation10 + $0x428] ss:$420 sps:$4 sm:$0xff]  }
 0x2de   : > { %5947 = vmatprep.subr.mxu1 %v2216_v53  ;;  %5919 = vmatpush3.msra.mxu0 %v2063_v0  ;;  %v1871_v53 = vld [vmem:[#allocation10 + $0x260] ss:$540 sps:$4 sm:$0xff]   ;;  %v2189_v0 = vunpack.c.h.bf16 %v1803_v50  ;;  %v1915_v20 = vld [vmem:[#allocation10 + $0x368] ss:$420 sps:$4 sm:$0xff]   ;;  %v2360_v50 = vunpack.c.h.bf16 %v1917_v12 }
 0x2df   : > { %5948 = vmatpush3.msra.mxu1 %v2168_v27  ;;  %5920 = vmatprep.subr.mxu0 %v2108_v44  ;;  %v1839_v27 = vld [vmem:[#allocation10 + $0x1a0] ss:$540 sps:$4 sm:$0xff]   ;;  %v2141_v44 = vunpack.c.h.bf16 %v1771_v37  ;;  %v2405_v37 = vunpack.c.h.bf16 %v1947_v51 }
 0x2e0   : > { %5949 = vmatprep.subr.mxu1 %v2213_v13  ;;  %5921 = vmatpush3.msra.mxu0 %v2060_v5  ;;  %v2186_v13 = vunpack.c.l.bf16 %v1871_v53  ;;  %v2321_v5 = vunpack.c.h.bf16 %v1871_v53 }
 0x2e1   : > { %5950 = vmatpush3.msra.mxu1 %v2165_v10  ;;  %5922 = vmatprep.subr.mxu0 %v2105_v19  ;;  %v2138_v10 = vunpack.c.l.bf16 %v1839_v27  ;;  %v2273_v19 = vunpack.c.h.bf16 %v1839_v27 }
 0x2e2   : > { %5951 = vmatprep.subr.mxu1 %v2210_v59  ;;  %5923 = vmatpush3.msra.mxu0 %v2057_v28  ;;  %v2183_v59 = vunpack.c.l.bf16 %v1869_v16  ;;  %v1835_v28 = vld [vmem:[#allocation10 + $0x188] ss:$540 sps:$4 sm:$0xff]  }
 0x2e3   : > { %5952 = vmatpush3.msra.mxu1 %v2162_v31  ;;  %5924 = vmatprep.subr.mxu0 %v2102_v39  ;;  %v2135_v31 = vunpack.c.l.bf16 %v1837_v45  ;;  %v2270_v39 = vunpack.c.h.bf16 %v1837_v45  ;;  %v2132_v23 = vunpack.c.l.bf16 %v1835_v28  ;;  %v1909_v16 = vld [vmem:[#allocation10 + $0x344] ss:$420 sps:$4 sm:$0xff]   ;;  %v1939_v45 = vld [vmem:[#allocation10 + $0x3f8] ss:$420 sps:$4 sm:$0xff]  }
 0x2e4   : > { %5953 = vmatprep.subr.mxu1 %v2207_v9  ;;  %5925 = vmatpush3.msra.mxu0 %v2054_v2  ;;  %v1955_v9 = vld [vmem:[#allocation10 + $0x458] ss:$420 sps:$4 sm:$0xff]   ;;  %v2315_v2 = vunpack.c.h.bf16 %v1867_v17 }
 0x2e5   : > { %5954 = vmatpush3.msra.mxu1 %v2159_v61  ;;  %5926 = vmatprep.subr.mxu0 %v2099_v26  ;;  %v1923_v61 = vld [vmem:[#allocation10 + $0x398] ss:$420 sps:$4 sm:$0xff]   ;;  %v2267_v26 = vunpack.c.h.bf16 %v1835_v28  ;;  %v2243_v28 = vunpack.c.l.bf16 %v1909_v16 }
 0x2e6   : > { %5955 = vmatprep.subr.mxu1 %v2204_v1  ;;  %5927 = vmatpush3.msra.mxu0 %v2051_v32  ;;  %v2417_v1 = vunpack.c.h.bf16 %v1955_v9  ;;  %v1921_v32 = vld [vmem:[#allocation10 + $0x38c] ss:$420 sps:$4 sm:$0xff]   ;;  %v2264_v41 = vunpack.c.l.bf16 %v1923_v61  ;;  %v1907_v17 = vld [vmem:[#allocation10 + $0x338] ss:$420 sps:$4 sm:$0xff]  }
 0x2e7   : > { %5956 = vmatpush3.msra.mxu1 %v2156_v22  ;;  %5928 = vmatprep.subr.mxu0 %v2096_v40  ;;  %v2369_v22 = vunpack.c.h.bf16 %v1923_v61  ;;  %v1951_v40 = vld [vmem:[#allocation10 + $0x440] ss:$420 sps:$4 sm:$0xff]   ;;  %v2345_v61 = vunpack.c.h.bf16 %v1907_v17 }
 0x2e8   : > { %5957 = vmatprep.subr.mxu1 %v2201_v21  ;;  %5929 = vmatpush3.msra.mxu0 %v2048_v63  ;;  %v1919_v21 = vld [vmem:[#allocation10 + $0x380] ss:$420 sps:$4 sm:$0xff]   ;;  %v2261_v63 = vunpack.c.l.bf16 %v1921_v32 }
 0x2e9   : > { %5958 = vmatpush3.msra.mxu1 %v2153_v6  ;;  %5930 = vmatprep.subr.mxu0 %v2093_v49  ;;  %v2366_v6 = vunpack.c.h.bf16 %v1921_v32  ;;  %v2306_v49 = vunpack.c.l.bf16 %v1951_v40  ;;  %v1933_v32 = vld [vmem:[#allocation10 + $0x3d4] ss:$420 sps:$4 sm:$0xff]  }
 0x2ea   : > { %5959 = vmatprep.subr.mxu1 %v2198_v43  ;;  %5931 = vmatpush3.msra.mxu0 %v2045_v24  ;;  %v2411_v43 = vunpack.c.h.bf16 %v1951_v40  ;;  %v2258_v24 = vunpack.c.l.bf16 %v1919_v21  ;;  %v1901_v40 = vld [vmem:[#allocation10 + $0x314] ss:$420 sps:$4 sm:$0xff]  }
 0x2eb   : > { %5960 = vmatpush3.msra.mxu1 %v2150_v57  ;;  %5932 = vmatprep.subr.mxu0 %v2090_v48  ;;  %v2363_v57 = vunpack.c.h.bf16 %v1919_v21  ;;  %v2303_v48 = vunpack.c.l.bf16 %v1949_v18 }
 0x2ec   : > { %5961 = vmatprep.subr.mxu1 %v2195_v62  ;;  %5933 = vmatpush3.msra.mxu0 %v2042_v33  ;;  %v2255_v62 = vunpack.c.l.bf16 %v1917_v12  ;;  %v1945_v33 = vld [vmem:[#allocation10 + $0x41c] ss:$420 sps:$4 sm:$0xff]   ;;  %v2231_v12 = vunpack.c.l.bf16 %v1901_v40 }
 0x2ed   : > { %5962 = vmatpush3.msra.mxu1 %v2147_v29  ;;  %5934 = vmatprep.subr.mxu0 %v2087_v30  ;;  %v2300_v29 = vunpack.c.l.bf16 %v1947_v51  ;;  %v1913_v30 = vld [vmem:[#allocation10 + $0x35c] ss:$420 sps:$4 sm:$0xff]   ;;  %v2402_v53 = vunpack.c.h.bf16 %v1945_v33 }
 0x2ee   : > { %5963 = vmatprep.subr.mxu1 %v2192_v7  ;;  %5935 = vmatpush3.msra.mxu0 %v2039_v56  ;;  %v2252_v7 = vunpack.c.l.bf16 %v1915_v20  ;;  %v1943_v56 = vld [vmem:[#allocation10 + $0x410] ss:$420 sps:$4 sm:$0xff]   ;;  %v2354_v27 = vunpack.c.h.bf16 %v1913_v30 }
 0x2ef   : > { %5964 = vmatpush3.msra.mxu1 %v2144_v42  ;;  %5936 = vmatprep.subr.mxu0 %v2084_v54  ;;  %v2297_v42 = vunpack.c.l.bf16 %v1945_v33  ;;  %v1911_v54 = vld [vmem:[#allocation10 + $0x350] ss:$420 sps:$4 sm:$0xff]  }
 0x2f0   : > { %5965 = vmatprep.subr.mxu1 %v2189_v0  ;;  %5937 = vmatpush3.msra.mxu0 %v2036_v35  ;;  %v2249_v0 = vunpack.c.l.bf16 %v1913_v30  ;;  %v1941_v35 = vld [vmem:[#allocation10 + $0x404] ss:$420 sps:$4 sm:$0xff]   ;;  %v1999_v51 = vld [vmem:[#allocation10 + $0x554] ss:$12 sps:$4 sm:$0xff]  }
 0x2f1   : > { %5966 = vmatpush3.msra.mxu1 %v2141_v44  ;;  %2863 = vmatmul.mubr.f32.vlgmr.msra.gmra.mxu0 %v8147_v58  ;;  %v2312_v58 = vunpack.c.l.bf16 %v1955_v9  ;;  %v2294_v44 = vunpack.c.l.bf16 %v1943_v56  ;;  %v2393_v9 = vunpack.c.h.bf16 %v1939_v45  ;;  %v2378_v33 = vunpack.c.h.bf16 %v1999_v51 }
 0x2f2   : > { %5967 = vmatprep.subr.mxu1 %v2186_v13  ;;  %5976 = vmatprep.subr.mxu0 %v2321_v5  ;;  %v2399_v13 = vunpack.c.h.bf16 %v1943_v56  ;;  %v2246_v5 = vunpack.c.l.bf16 %v1911_v54 }
 0x2f3   : > { %5968 = vmatpush3.msra.mxu1 %v2138_v10  ;;  %5977 = vmatpush3.msra.mxu0 %v2273_v19  ;;  %v2351_v10 = vunpack.c.h.bf16 %v1911_v54  ;;  %v2291_v19 = vunpack.c.l.bf16 %v1941_v35  ;;  %v2027_v54 = vld [vmem:[#allocation10 + $0x608] sm:$0xf] }
 0x2f4   : > { %3002 = vmatprep.mubr.f32.mxu0 %v8168_v47  ;;  %5969 = vmatprep.subr.mxu1 %v2183_v59  ;;  %v2414_v47 = vunpack.c.h.bf16 %v1953_v15  ;;  %v2396_v59 = vunpack.c.h.bf16 %v1941_v35  ;;  %v1903_v15 = vld [vmem:[#allocation10 + $0x320] ss:$420 sps:$4 sm:$0xff]   ;;  %v2420_v35 = vunpack.c.l.bf16 %v2027_v54 }
 0x2f5   : > { %5978 = vmatprep.subr.mxu0 %v2318_v46  ;;  %5970 = vmatpush3.msra.mxu1 %v2135_v31  ;;  %v1937_v46 = vld [vmem:[#allocation10 + $0x3ec] ss:$420 sps:$4 sm:$0xff]   ;;  %v2348_v31 = vunpack.c.h.bf16 %v1909_v16  ;;  %v2234_v21 = vunpack.c.l.bf16 %v1903_v15 }
 0x2f6   : > { %5979 = vmatpush3.msra.mxu0 %v2270_v39  ;;  %5971 = vmatprep.subr.mxu1 %v2180_v55  ;;  %v2288_v39 = vunpack.c.l.bf16 %v1939_v45  ;;  %v1905_v55 = vld [vmem:[#allocation10 + $0x32c] ss:$420 sps:$4 sm:$0xff]  }
 0x2f7   : > { %5980 = vmatprep.subr.mxu0 %v2315_v2  ;;  %5972 = vmatpush3.msra.mxu1 %v2132_v23  ;;  %v2240_v2 = vunpack.c.l.bf16 %v1907_v17  ;;  %v1935_v23 = vld [vmem:[#allocation10 + $0x3e0] ss:$420 sps:$4 sm:$0xff]  }
 0x2f8   : > { %5981 = vmatpush3.msra.mxu0 %v2267_v26  ;;  %2933 = vmatmul.mubr.f32.vlgmr.msra.gmra.mxu1 %v8152_v11  ;;  %v2408_v11 = vunpack.c.h.bf16 %v1949_v18  ;;  %v2285_v26 = vunpack.c.l.bf16 %v1937_v46  ;;  %v2279_v18 = vunpack.c.l.bf16 %v1933_v32 }
 0x2f9   : > { %5982 = vmatprep.subr.mxu0 %v2312_v58  ;;  %6011 = vmatprep.subr.mxu1 %v2417_v1  ;;  %v2390_v58 = vunpack.c.h.bf16 %v1937_v46  ;;  %v2237_v1 = vunpack.c.l.bf16 %v1905_v55 }
 0x2fa   : > { %5983 = vmatpush3.msra.mxu0 %v2264_v41  ;;  %6012 = vmatpush3.msra.mxu1 %v2369_v22  ;;  %v2342_v41 = vunpack.c.h.bf16 %v1905_v55  ;;  %v2282_v22 = vunpack.c.l.bf16 %v1935_v23 }
 0x2fb   : > { %3072 = vmatprep.mubr.f32.mxu1 %v8178_v34  ;;  %5984 = vmatprep.subr.mxu0 %v2309_v38  ;;  %v2357_v34 = vunpack.c.h.bf16 %v1915_v20  ;;  %v2387_v38 = vunpack.c.h.bf16 %v1935_v23  ;;  %v1967_v20 = vld [vmem:[#allocation10 + $0x494] ss:$12 sps:$4 sm:$0xff]  }
 0x2fc   : > { %6013 = vmatprep.subr.mxu1 %v2414_v47  ;;  %5985 = vmatpush3.msra.mxu0 %v2261_v63  ;;  %v1931_v47 = vld [vmem:[#allocation10 + $0x3c8] ss:$420 sps:$4 sm:$0xff]   ;;  %v2339_v63 = vunpack.c.h.bf16 %v1903_v15  ;;  %v2327_v56 = vunpack.c.l.bf16 %v1967_v20 }
 0x2fd   : > { %6014 = vmatpush3.msra.mxu1 %v2366_v6  ;;  %5986 = vmatprep.subr.mxu0 %v2306_v49  ;;  %v1899_v6 = vld [vmem:[#allocation10 + $0x308] ss:$420 sps:$4 sm:$0xff]   ;;  %v2384_v49 = vunpack.c.h.bf16 %v1933_v32 }
 0x2fe   : > { %6015 = vmatprep.subr.mxu1 %v2411_v43  ;;  %5987 = vmatpush3.msra.mxu0 %v2258_v24  ;;  %v2336_v43 = vunpack.c.h.bf16 %v1901_v40  ;;  %v2276_v24 = vunpack.c.l.bf16 %v1931_v47 }
 0x2ff   : > { %6016 = vmatpush3.msra.mxu1 %v2363_v57  ;;  %5988 = vmatprep.subr.mxu0 %v2303_v48  ;;  %v2381_v57 = vunpack.c.h.bf16 %v1931_v47  ;;  %v2228_v48 = vunpack.c.l.bf16 %v1899_v6 }
 0x300   : > { %6017 = vmatprep.subr.mxu1 %v2408_v11  ;;  %5989 = vmatpush3.msra.mxu0 %v2255_v62  ;;  %v2033_v11 = vld [vmem:[#allocation10 + $0x62c] sm:$0x3]  ;;  %v2333_v62 = vunpack.c.h.bf16 %v1899_v6 }
 0x301   : > { %6018 = vmatpush3.msra.mxu1 %v2360_v50  ;;  %5990 = vmatprep.subr.mxu0 %v2300_v29  ;;  %v2031_v50 = vld [vmem:[#allocation10 + $0x548] ss:$216 sps:$4 sm:$0xff]   ;;  %v2330_v29 = vunpack.c.h.bf16 %v1967_v20  ;;  %v2429_v30 = vunpack.c.l.bf16 %v2033_v11 }
 0x302   : > { %6019 = vmatprep.subr.mxu1 %v2405_v37  ;;  %5991 = vmatpush3.msra.mxu0 %v2252_v7  ;;  %v2375_v37 = vunpack.c.l.bf16 %v1999_v51  ;;  %v1963_v7 = vld [vmem:[#allocation10 + $0x488] ss:$396 sps:$4 sm:$0xff]  }
 0x303   : > { %6020 = vmatpush3.msra.mxu1 %v2357_v34  ;;  %5992 = vmatprep.subr.mxu0 %v2297_v42  ;;  %v2426_v34 = vunpack.c.h.bf16 %v2031_v50  ;;  %v2372_v42 = vunpack.c.l.bf16 %v2031_v50 }
 0x304   : > { %6021 = vmatprep.subr.mxu1 %v2402_v53  ;;  %5993 = vmatpush3.msra.mxu0 %v2249_v0  ;;  %v2324_v53 = vunpack.c.l.bf16 %v1963_v7  ;;  %v2423_v0 = vunpack.c.h.bf16 %v1963_v7 }
 0x305   : > { %6022 = vmatpush3.msra.mxu1 %v2354_v27  ;;  %5994 = vmatprep.subr.mxu0 %v2294_v44 }
 0x306   : > { %6023 = vmatprep.subr.mxu1 %v2399_v13  ;;  %5995 = vmatpush3.msra.mxu0 %v2246_v5 }
 0x307   : > { %6024 = vmatpush3.msra.mxu1 %v2351_v10  ;;  %5996 = vmatprep.subr.mxu0 %v2291_v19 }
 0x308   : > { %6025 = vmatprep.subr.mxu1 %v2396_v59  ;;  %5997 = vmatpush3.msra.mxu0 %v2243_v28 }
 0x309   : > { %6026 = vmatpush3.msra.mxu1 %v2348_v31  ;;  %5998 = vmatprep.subr.mxu0 %v2288_v39 }
 0x30a   : > { %6027 = vmatprep.subr.mxu1 %v2393_v9  ;;  %5999 = vmatpush3.msra.mxu0 %v2240_v2 }
 0x30b   : > { %6028 = vmatpush3.msra.mxu1 %v2345_v61  ;;  %6000 = vmatprep.subr.mxu0 %v2285_v26 }
 0x30c   : > { %6029 = vmatprep.subr.mxu1 %v2390_v58  ;;  %6001 = vmatpush3.msra.mxu0 %v2237_v1 }
 0x30d   : > { %6030 = vmatpush3.msra.mxu1 %v2342_v41  ;;  %6002 = vmatprep.subr.mxu0 %v2282_v22 }
 0x30e   : > { %6031 = vmatprep.subr.mxu1 %v2387_v38  ;;  %6003 = vmatpush3.msra.mxu0 %v2234_v21 }
 0x30f   : > { %6032 = vmatpush3.msra.mxu1 %v2339_v63  ;;  %6004 = vmatprep.subr.mxu0 %v2279_v18 }
 0x310   : > { %6033 = vmatprep.subr.mxu1 %v2384_v49  ;;  %6005 = vmatpush3.msra.mxu0 %v2231_v12  ;;  %v8292_v49 = vld [vmem:[#allocation5] sm:$0xff]  ;;  %v3328_v12 = vld [vmem:[%s9638_s7] sm:$0xff] }
 0x311   : > { %6034 = vmatpush3.msra.mxu1 %v2336_v43  ;;  %6006 = vmatprep.subr.mxu0 %v2276_v24  ;;  %v3329_v43 = vld [vmem:[%s9638_s7 + $0x8] sm:$0xff] }
 0x312   : > { %6035 = vmatprep.subr.mxu1 %v2381_v57  ;;  %6007 = vmatpush3.msra.mxu0 %v2228_v48 }
 0x313   : > { %6036 = vmatpush3.msra.mxu1 %v2333_v62  ;;  %3003 = vmatmul.mubr.f32.vlgmr.msra.gmra.mxu0 %v8171_v36  ;;  %v2509_v36 = vpop.f32.mrf.mxu1 }
 0x314   : > { %6037 = vmatprep.subr.mxu1 %v2378_v33  ;;  %6427 = vmatprep.subr.mxu0 %v9741_v25 }
 0x315   : > { %6038 = vmatpush3.msra.mxu1 %v2330_v29  ;;  %6428 = vmatpush3.msk.msra.mxu0 %vm1265_vm8, %v2429_v30  ;;  %v2511_v44 = vpop.f32.mrf.mxu1 }
 0x316   : > { %6039 = vmatprep.subr.mxu1 %v2375_v37  ;;  %6429 = vmatprep.subr.mxu0 %v9741_v25 }
 0x317   : > { %6040 = vmatpush3.msra.mxu1 %v2327_v56  ;;  %6430 = vmatpush3.msra.mxu0 %v2426_v34 }
 0x318   : > { %6041 = vmatprep.subr.mxu1 %v2372_v42  ;;  %6431 = vmatprep.subr.mxu0 %v9741_v25 }
 0x319   : > { %6042 = vmatpush3.msra.mxu1 %v2324_v53  ;;  %6432 = vmatpush3.msra.mxu0 %v2423_v0  ;;  %v2580_v27 = vpop.f32.mrf.mxu0 }
 0x31a   : > { %3073 = vmatmul.mubr.f32.vlgmr.msra.gmra.mxu1 %v8182_v52  ;;  %6433 = vmatprep.subr.mxu0 %v9741_v25  ;;  %v2581_v5 = vadd.f32 %v2580_v27, %v2509_v36 }
 0x31b   : > { %6434 = vmatpush3.msra.mxu0 %v2420_v35  ;;  %6435 = vmatprep.mubr.msk.f32.mxu0 %vm6905_vm7, %v9741_v25  ;;  %v2582_v16 = vpop.f32.mrf.mxu0  ;;  %vm3320_vm7 = vcmask 580608  }
 0x31c   : > { %6436 = vmatmul.mubr.msk.f32.vlgmr.msra.gmra.mxu0 %vm2430_vm2, %v8187_v14  ;;  %3404 = vmatprep.mubr.f32.mxu1 %v9741_v25  ;;  %v2583_v14 = vadd.f32 %v2582_v16, %v2511_v44  ;;  %vm3202_vm2 = vcmask 891904  }
 0x31d   : > { %6470 = vmatprep.mubr.f32.mxu0 %v8292_v49 }
 0x365   : > { %v2651_v13 = vpop.f32.mrf.mxu1 }
 0x366   : > { %v2652_v10 = vadd.f32 %v2651_v13, %v2581_v5 }
 0x367   : > { %v2653_v52 = vpop.f32.mrf.mxu1 }
 0x368   : > { %v2654_v46 = vadd.f32 %v2653_v52, %v2583_v14 }
 0x391   : > { %v2722_v45 = vpop.f32.mrf.mxu0 }
 0x392   : > { %v2723_v19 = vadd.f32 %v2722_v45, %v2652_v10 }
 0x393   : > { %v2724_v28 = vpop.f32.mrf.mxu0 }
 0x394   : > { %v2725_v39 = vadd.f32 %v2724_v28, %v2654_v46 }
 0x397   : > { %v2793_v17 = vpop.f32.mrf.mxu1 }
 0x398   : > { %v8208_v59 = vadd.f32 %v2793_v17, %v2723_v19 }
 0x399   : > { %v2795_v31 = vpop.f32.mrf.mxu1 }
 0x39a   : > { %3302 = vrot.lane.b32.xlu1 %v8208_v59, %s6906_s27  ;;  %3314 = vrot.lane.b32.xlu0 %v8208_v59, %s6907_s28  ;;  %v8238_v55 = vadd.f32 %v2795_v31, %v2725_v39 }
 0x39e   : > { %3278 = vrot.lane.b32.xlu1 %v8208_v59, %s6908_s10  ;;  %3290 = vrot.lane.b32.xlu0 %v8208_v59, %s6909_s18 }
 0x3a2   : > { %3254 = vrot.lane.b32.xlu1 %v8208_v59, %s6910_s20  ;;  %3266 = vrot.lane.b32.xlu0 %v8208_v59, %s6911_s19 }
 0x3a6   : > { %3232 = vrot.lane.b32.xlu1 %v8208_v59, %s9740_s22  ;;  %3243 = vrot.lane.b32.xlu0 %v8208_v59, %s9683_s21 }
 0x3aa   : > { %3208 = vrot.lane.b32.xlu1 %v8208_v59, %s9690_s1  ;;  %3220 = vrot.lane.b32.xlu0 %v8208_v59, %s9702_s0 }
 0x3ae   : > { %3184 = vrot.lane.b32.xlu1 %v8208_v59, %s9686_s24  ;;  %3196 = vrot.lane.b32.xlu0 %v8208_v59, %s9688_s23 }
 0x3b1   : > { %v5938_v9 = vpop.f32.mrf.mxu0 }
 0x3b2   : > { %3162 = vrot.lane.b32.xlu1 %v8208_v59, %s9684_s30  ;;  %3173 = vrot.lane.b32.xlu0 %v8208_v59, %s9708_s25 }
 0x3b3   : > { %v5939_v23 = vpop.f32.mrf.mxu0 }
 0x3b4   : > { %v5940_v1 = vadd.f32 %v5939_v23, %v5938_v9 }
 0x3b6   : > { %3304 = vrot.lane.b32.xlu1 %v8238_v55, %s6906_s27  ;;  %3316 = vrot.lane.b32.xlu0 %v8238_v55, %s6907_s28 }
 0x3b8   : > { %v5973_v2 = vpop.f32.mrf.mxu1 }
 0x3ba   : > { %3280 = vrot.lane.b32.xlu1 %v8238_v55, %s6908_s10  ;;  %3292 = vrot.lane.b32.xlu0 %v8238_v55, %s6909_s18  ;;  %v5974_v26 = vpop.f32.mrf.mxu1 }
 0x3bb   : > { %v5975_v58 = vadd.f32 %v5974_v26, %v5973_v2 }
 0x3bd   : > { %v2935_v22 = vadd.f32 %v5975_v58, %v5940_v1 }
 0x3be   : > { %3256 = vrot.lane.b32.xlu1 %v8238_v55, %s6910_s20  ;;  %3268 = vrot.lane.b32.xlu0 %v8238_v55, %s6911_s19 }
 0x3c2   : > { %3234 = vrot.lane.b32.xlu1 %v8238_v55, %s9740_s22  ;;  %3245 = vrot.lane.b32.xlu0 %v8238_v55, %s9683_s21  ;;  %s9820_s21 = smov 127  }
 0x3c6   : > { %3210 = vrot.lane.b32.xlu1 %v8238_v55, %s9690_s1  ;;  %3222 = vrot.lane.b32.xlu0 %v8238_v55, %s9702_s0 }
 0x3ca   : > { %3186 = vrot.lane.b32.xlu1 %v8238_v55, %s9686_s24  ;;  %3198 = vrot.lane.b32.xlu0 %v8238_v55, %s9688_s23 }
 0x3ce   : > { %3164 = vrot.lane.b32.xlu1 %v8238_v55, %s9684_s30  ;;  %3175 = vrot.lane.b32.xlu0 %v8238_v55, %s9708_s25  ;;  %s9821_s30 = smov 91  }
 0x3d2   : > { %3153 = vrot.lane.b32.xlu0 %v8238_v55, %s9820_s21 }
 0x3d3   : > { %v6008_v61 = vpop.f32.mrf.mxu0 }
 0x3d5   : > { %v6009_v15 = vpop.f32.mrf.mxu0 }
 0x3d6   : > { %v6010_v32 = vadd.f32 %v6009_v15, %v6008_v61 }
 0x3d8   : > { %v3005_v21 = vadd.f32 %v6010_v32, %v2935_v22 }
 0x3da   : > { %v6043_v41 = vpop.f32.mrf.mxu1 }
 0x3dc   : > { %v6044_v40 = vpop.f32.mrf.mxu1  ;;  %v3144_v38 = vpop.f32.mrf.mxu0 }
 0x3dd   : > { %v6045_v47 = vadd.f32 %v6044_v40, %v6043_v41 }
 0x3de   : > { %v6437_v63 = vpop.f32.mrf.mxu0 }
 0x3df   : > { %v3075_v18 = vadd.f32 %v6045_v47, %v3005_v21 }
 0x3e1   : > { %v8270_v6 = vadd.f32 %v3144_v38, %v3075_v18 }
 0x3e3   : > { %3318 = vrot.lane.b32.xlu1 %v8270_v6, %s6907_s28  ;;  %3306 = vrot.lane.b32.xlu0 %v8270_v6, %s6906_s27  ;;  %s6922_s27 = smov 105   ;;  %s6923_s28 = smov 117  }
 0x3e7   : > { %3294 = vrot.lane.b32.xlu1 %v8270_v6, %s6909_s18  ;;  %3282 = vrot.lane.b32.xlu0 %v8270_v6, %s6908_s10  ;;  %s6917_s10 = smov 95   ;;  %s6918_s18 = smov 97  }
 0x3eb   : > { %3270 = vrot.lane.b32.xlu1 %v8270_v6, %s6911_s19  ;;  %3258 = vrot.lane.b32.xlu0 %v8270_v6, %s6910_s20  ;;  %s9704_s20 = smov 115   ;;  %s6920_s19 = smov 98  }
 0x3ef   : > { %3247 = vrot.lane.b32.xlu1 %v8270_v6, %s9821_s30  ;;  %3236 = vrot.lane.b32.xlu0 %v8270_v6, %s9740_s22  ;;  %s9822_s30 = smov 126   ;;  %s9710_s22 = smov 116  }
 0x3f3   : > { %3224 = vrot.lane.b32.xlu1 %v8270_v6, %s9702_s0  ;;  %3212 = vrot.lane.b32.xlu0 %v8270_v6, %s9690_s1  ;;  %s6925_s1 = smov 118  }
 0x3f7   : > { %3200 = vrot.lane.b32.xlu1 %v8270_v6, %s9688_s23  ;;  %3188 = vrot.lane.b32.xlu0 %v8270_v6, %s9686_s24  ;;  %s6916_s24 = smov 96   ;;  %s6924_s23 = smov 106  }
 0x3fb   : > { %3177 = vrot.lane.b32.xlu1 %v8270_v6, %s9708_s25  ;;  %3166 = vrot.lane.b32.xlu0 %v8270_v6, %s9822_s30 }
 0x3ff   : > { %3155 = vrot.lane.b32.xlu1 %v8270_v6, %s9820_s21  ;;  %3151 = vrot.lane.b32.xlu0 %v8208_v59, %s9820_s21 }
 0x403   : > { %3332 = vperm.xlu1 %6637, %v3328_v12   ;;  %3337 = vperm.xlu0 %6638, %v3329_v43  }
 0x40c   : > { %v3303_v24 = vpop.permute.xlu1 %3302  ;;  %v3315_v51 = vpop.permute.xlu0 %3314 }
 0x410   : > { %v3279_v57 = vpop.permute.xlu1 %3278  ;;  %v3291_v48 = vpop.permute.xlu0 %3290 }
 0x414   : > { %v8313_v20 = vpop.permute.xlu1 %3254  ;;  %v8315_v11 = vpop.permute.xlu0 %3266 }
 0x418   : > { %v8317_v62 = vpop.permute.xlu1 %3232  ;;  %v8319_v33 = vpop.permute.xlu0 %3243 }
 0x41c   : > { %v8321_v50 = vpop.permute.xlu1 %3208  ;;  %v8323_v29 = vpop.permute.xlu0 %3220 }
 0x420   : > { %v8325_v30 = vpop.permute.xlu0 %3196  ;;  %v8327_v37 = vpop.permute.xlu1 %3184 }
 0x424   : > { %v8329_v7 = vpop.permute.xlu0 %3173  ;;  %v8331_v56 = vpop.permute.xlu1 %3162 }
 0x428   : > { %v3317_v34 = vpop.permute.xlu0 %3316  ;;  %v3305_v42 = vpop.permute.xlu1 %3304 }
 0x429   : > { %v3321_v28 = vsel %vm3320_vm7, %v3315_v51, %v3317_v34  ;;  %v3309_v9 = vsel %vm3308_vm4, %v3303_v24, %v3305_v42 }
 0x42c   : > { %v3293_v54 = vpop.permute.xlu0 %3292  ;;  %v3281_v53 = vpop.permute.xlu1 %3280 }
 0x42d   : > { %v3297_v23 = vsel %vm3296_vm6, %v3291_v48, %v3293_v54  ;;  %v3285_v58 = vsel %vm3284_vm10, %v3279_v57, %v3281_v53 }
 0x430   : > { %v3269_v0 = vpop.permute.xlu0 %3268  ;;  %v3257_v35 = vpop.permute.xlu1 %3256 }
 0x431   : > { %v3273_v32 = vsel %vm3272_vm11, %v8315_v11, %v3269_v0  ;;  %v3261_v38 = vsel %vm3260_vm12, %v8313_v20, %v3257_v35 }
 0x434   : > { %v8333_v36 = vpop.permute.xlu0 %3245  ;;  %v8335_v27 = vpop.permute.xlu1 %3234 }
 0x435   : > { %v3249_v47 = vsel %vm9824_vm13, %v8319_v33, %v8333_v36  ;;  %v3238_v43 = vsel %vm9826_vm3, %v8317_v62, %v8335_v27 }
 0x438   : > { %v8337_v44 = vpop.permute.xlu0 %3222  ;;  %v8339_v16 = vpop.permute.xlu1 %3210 }
 0x439   : > { %v3227_v51 = vsel %vm3226_vm9, %v8323_v29, %v8337_v44  ;;  %v3215_v11 = vsel %vm3214_vm1, %v8321_v50, %v8339_v16 }
 0x43c   : > { %v8341_v13 = vpop.permute.xlu0 %3198  ;;  %v8343_v5 = vpop.permute.xlu1 %3186 }
 0x43d   : > { %v3203_v33 = vsel %vm3202_vm2, %v8325_v30, %v8341_v13 }
 0x440   : > { %v8345_v45 = vpop.permute.xlu0 %3175  ;;  %v8347_v10 = vpop.permute.xlu1 %3164 }
 0x444   : > { %v8349_v52 = vpop.permute.xlu0 %3153 }
 0x455   : > { %v3319_v19 = vpop.permute.xlu1 %3318  ;;  %v3307_v17 = vpop.permute.xlu0 %3306 }
 0x456   : > { %6438 = vmatprep.subr.mxu0 %v3319_v19  ;;  %v3322_v14 = vsel %vm3320_vm7, %v3317_v34, %v3319_v19  ;;  %v3310_v46 = vsel %vm3308_vm4, %v3305_v42, %v3307_v17  ;;  %vm3190_vm7 = vcmask 900096   ;;  %vm9827_vm4 = vcmask 1022976  }
 0x457   : > { %3340 = vmatprep.subr.mxu1 %v3322_v14  ;;  %6439 = vmatpush3.msra.mxu0 %v3319_v19  ;;  %v3191_v50 = vsel %vm3190_vm7, %v8327_v37, %v8343_v5 }
 0x458   : > { %3341 = vmatpush1.msra.mxu1 %v3321_v28  ;;  %6440 = vmatprep.subr.mxu0 %v3307_v17 }
 0x459   : > { %v3295_v31 = vpop.permute.xlu1 %3294  ;;  %3342 = vmatprep.subr.mxu1 %v3310_v46  ;;  %6441 = vmatpush3.msra.mxu0 %v3307_v17  ;;  %v3283_v39 = vpop.permute.xlu0 %3282 }
 0x45a   : > { %3343 = vmatpush1.msra.mxu1 %v3309_v9  ;;  %6442 = vmatprep.subr.mxu0 %v3295_v31  ;;  %v3298_v2 = vsel %vm3296_vm6, %v3293_v54, %v3295_v31  ;;  %v3286_v61 = vsel %vm3284_vm10, %v3281_v53, %v3283_v39  ;;  %vm9828_vm6 = vmmov %vm9827_vm4 }
 0x45b   : > { %3344 = vmatprep.subr.mxu1 %v3298_v2  ;;  %6443 = vmatpush3.msra.mxu0 %v3295_v31  ;;  %v3179_v30 = vsel %vm9828_vm6, %v8329_v7, %v8345_v45 }
 0x45c   : > { %3345 = vmatpush1.msra.mxu1 %v3297_v23  ;;  %6444 = vmatprep.subr.mxu0 %v3283_v39 }
 0x45d   : > { %v3271_v26 = vpop.permute.xlu1 %3270  ;;  %3346 = vmatprep.subr.mxu1 %v3286_v61  ;;  %6445 = vmatpush3.msra.mxu0 %v3283_v39  ;;  %v3259_v15 = vpop.permute.xlu0 %3258 }
 0x45e   : > { %3347 = vmatpush1.msra.mxu1 %v3285_v58  ;;  %6446 = vmatprep.subr.mxu0 %v3271_v26  ;;  %v3274_v1 = vsel %vm3272_vm11, %v3269_v0, %v3271_v26  ;;  %v3262_v41 = vsel %vm3260_vm12, %v3257_v35, %v3259_v15  ;;  %v3168_v35 = vsel %vm743_vm5, %v8331_v56, %v8347_v10  ;;  %v3492_v56 = vld [vmem:[%s9645_s14] sm:$0x7] }
 0x45f   : > { %3348 = vmatprep.subr.mxu1 %v3274_v1  ;;  %6447 = vmatpush3.msra.mxu0 %v3271_v26 }
 0x460   : > { %3349 = vmatpush1.msra.mxu1 %v3273_v32  ;;  %6448 = vmatprep.subr.mxu0 %v3259_v15 }
 0x461   : > { %v3248_v22 = vpop.permute.xlu1 %3247  ;;  %3350 = vmatprep.subr.mxu1 %v3262_v41  ;;  %6449 = vmatpush3.msra.mxu0 %v3259_v15  ;;  %v3237_v40 = vpop.permute.xlu0 %3236 }
 0x462   : > { %3351 = vmatpush1.msra.mxu1 %v3261_v38  ;;  %6450 = vmatprep.subr.mxu0 %v3248_v22  ;;  %v3250_v21 = vsel %vm9823_vm14, %v8333_v36, %v3248_v22  ;;  %v3239_v63 = vsel %vm9825_vm0, %v8335_v27, %v3237_v40  ;;  %v3327_v27 = vld [vmem:[#allocation5 + $0x8] sm:$0xff]  ;;  %vm4039_vm0 = vcmask 547840  }
 0x463   : > { %3352 = vmatprep.subr.mxu1 %v3250_v21  ;;  %6451 = vmatpush3.msra.mxu0 %v3248_v22 }
 0x464   : > { %3353 = vmatpush1.msra.mxu1 %v3249_v47  ;;  %6452 = vmatprep.subr.mxu0 %v3237_v40 }
 0x465   : > { %v3225_v18 = vpop.permute.xlu1 %3224  ;;  %3354 = vmatprep.subr.mxu1 %v3239_v63  ;;  %6453 = vmatpush3.msra.mxu0 %v3237_v40  ;;  %v3213_v12 = vpop.permute.xlu0 %3212 }
 0x466   : > { %3355 = vmatpush1.msra.mxu1 %v3238_v43  ;;  %6454 = vmatprep.subr.mxu0 %v3225_v18  ;;  %v3228_v24 = vsel %vm3226_vm9, %v8337_v44, %v3225_v18  ;;  %v3216_v57 = vsel %vm3214_vm1, %v8339_v16, %v3213_v12  ;;  %v8399_v16 = vrot.slane %v3492_v56, %v7163_v8 }
 0x467   : > { %3356 = vmatprep.subr.mxu1 %v3228_v24  ;;  %6455 = vmatpush3.msra.mxu0 %v3225_v18 }
 0x468   : > { %3357 = vmatpush1.msra.mxu1 %v3227_v51  ;;  %6456 = vmatprep.subr.mxu0 %v3213_v12 }
 0x469   : > { %v3201_v48 = vpop.permute.xlu1 %3200  ;;  %3358 = vmatprep.subr.mxu1 %v3216_v57  ;;  %6457 = vmatpush3.msra.mxu0 %v3213_v12  ;;  %v3189_v20 = vpop.permute.xlu0 %3188 }
 0x46a   : > { %3359 = vmatpush1.msra.mxu1 %v3215_v11  ;;  %6458 = vmatprep.subr.mxu0 %v3201_v48  ;;  %v3204_v62 = vsel %vm3202_vm2, %v8341_v13, %v3201_v48  ;;  %v3192_v29 = vsel %vm3190_vm7, %v8343_v5, %v3189_v20  ;;  %v5891_v11 = vld [vmem:[%s9643_s12 + $0x38] sm:$0xff]   ;;  %vm4727_vm2 = vcmask 121856  }
 0x46b   : > { %3360 = vmatprep.subr.mxu1 %v3204_v62  ;;  %6459 = vmatpush3.msra.mxu0 %v3201_v48  ;;  %v5899_v48 = vld [vmem:[%s9643_s12 + $0x78] sm:$0xff]   ;;  %v5836_v62 = vunpack.c.h.bf16 %v5891_v11 }
 0x46c   : > { %3361 = vmatpush1.msra.mxu1 %v3203_v33  ;;  %6460 = vmatprep.subr.mxu0 %v3189_v20  ;;  %v5867_v33 = vunpack.c.l.bf16 %v5899_v48 }
 0x46d   : > { %v3178_v34 = vpop.permute.xlu1 %3177  ;;  %3362 = vmatprep.subr.mxu1 %v3192_v29  ;;  %6461 = vmatpush3.msra.mxu0 %v3189_v20  ;;  %v3167_v42 = vpop.permute.xlu0 %3166  ;;  %v5868_v20 = vunpack.c.h.bf16 %v5899_v48  ;;  %v5835_v29 = vunpack.c.l.bf16 %v5891_v11 }
 0x46e   : > { %3363 = vmatpush1.msra.mxu1 %v3191_v50  ;;  %6462 = vmatprep.subr.mxu0 %v3178_v34  ;;  %v3180_v54 = vsel %vm9827_vm4, %v8345_v45, %v3178_v34  ;;  %v3169_v53 = vsel %vm743_vm5, %v8347_v10, %v3167_v42  ;;  %v8404_v45 = vrot.slane %v3492_v56, %v7137_v3  ;;  %vm3516_vm5 = vcmask 89088   ;;  %v5890_v50 = vld [vmem:[%s9643_s12 + $0x30] sm:$0xff]  }
 0x46f   : > { %3364 = vmatprep.subr.mxu1 %v3180_v54  ;;  %6463 = vmatpush3.msra.mxu0 %v3178_v34  ;;  %v8411_v10 = vrot.slane %v3492_v56, %v7145_v4  ;;  %v5898_v34 = vld [vmem:[%s9643_s12 + $0x70] sm:$0xff]   ;;  %v5832_v54 = vunpack.c.h.bf16 %v5890_v50  ;;  %v5896_v56 = vld [vmem:[%s9643_s12 + $0x60] sm:$0xff]  }
 0x470   : > { %3365 = vmatpush1.msra.mxu1 %v3179_v30  ;;  %6464 = vmatprep.subr.mxu0 %v3167_v42  ;;  %v5863_v30 = vunpack.c.l.bf16 %v5898_v34 }
 0x471   : > { %v3156_v0 = vpop.permute.xlu1 %3155  ;;  %3366 = vmatprep.subr.mxu1 %v3169_v53  ;;  %6465 = vmatpush3.msra.mxu0 %v3167_v42  ;;  %v3152_v37 = vpop.permute.xlu0 %3151  ;;  %v5864_v42 = vunpack.c.h.bf16 %v5898_v34  ;;  %v5831_v53 = vunpack.c.l.bf16 %v5890_v50 }
 0x472   : > { %v3157_v36 = vsel %vm707_vm15, %v3152_v37, %v8349_v52  ;;  %3367 = vmatpush1.msra.mxu1 %v3168_v35  ;;  %6466 = vmatprep.subr.mxu0 %v3156_v0  ;;  %v3158_v7 = vsel %vm707_vm15, %v8349_v52, %v3156_v0  ;;  %v5889_v35 = vld [vmem:[%s9643_s12 + $0x28] sm:$0xff]  }
 0x473   : > { %3368 = vmatprep.subr.mxu1 %v3158_v7  ;;  %6467 = vmatpush3.msra.mxu0 %v3156_v0  ;;  %v5897_v0 = vld [vmem:[%s9643_s12 + $0x68] sm:$0xff]  }
 0x474   : > { %3369 = vmatpush1.msra.mxu1 %v3157_v36  ;;  %6468 = vmatprep.subr.mxu0 %v8270_v6  ;;  %v5860_v37 = vunpack.c.h.bf16 %v5897_v0  ;;  %v5828_v36 = vunpack.c.h.bf16 %v5889_v35  ;;  %v5859_v7 = vunpack.c.l.bf16 %v5897_v0 }
 0x475   : > { %3370 = vmatprep.subr.mxu1 %v8238_v55  ;;  %6469 = vmatpush3.msra.mxu0 %v8270_v6 }
 0x476   : > { %3371 = vmatpush1.msra.mxu1 %v8208_v59  ;;  %6471 = vmatmul.mubr.f32.vlgmr.msra.gmra.mxu0 %v3327_v27 }
 0x477   : > { %3405 = vmatmul.mubr.f32.vlgmr.msra.gmra.mxu1 %v8292_v49  ;;  %6069 = vmatprep.subr.mxu1 %v5868_v20 }
 0x478   : > { %3410 = vmatprep.mubr.f32.mxu1 %v9741_v25  ;;  %6070 = vmatpush3.msra.mxu1 %v5836_v62 }
 0x479   : > { %6071 = vmatprep.subr.mxu1 %v5867_v33 }
 0x47a   : > { %6072 = vmatpush3.msra.mxu1 %v5835_v29 }
 0x47b   : > { %3411 = vmatmul.mubr.f32.gmra.mxu1 %v3327_v27  ;;  %6073 = vmatprep.subr.mxu1 %v5864_v42  ;;  %v5827_v27 = vunpack.c.l.bf16 %v5889_v35 }
 0x47c   : > { %6074 = vmatpush3.msra.mxu1 %v5832_v54 }
 0x47d   : > { %6075 = vmatprep.subr.mxu1 %v5863_v30 }
 0x47e   : > { %v3338_v13 = vpop.permute.xlu0 %3337  ;;  %v3333_v55 = vpop.permute.xlu1 %3332  ;;  %6076 = vmatpush3.msra.mxu1 %v5831_v53 }
 0x47f   : > { %6077 = vmatprep.subr.mxu1 %v5860_v37 }
 0x480   : > { %6078 = vmatpush3.msra.mxu1 %v5828_v36 }
 0x481   : > { %6079 = vmatprep.subr.mxu1 %v5859_v7 }
 0x482   : > { %6080 = vmatpush3.msra.mxu1 %v5827_v27 }
 0x536   : > { %v6472_v44 = vpop.f32.mrf.mxu0 }
 0x537   : > { %v3406_v5 = vpop.f32.mrf.mxu1  ;;  %v8406_v49 = vadd.f32 %v6472_v44, %v3338_v13  ;;  %v5856_v44 = vunpack.c.h.bf16 %v5896_v56 }
 0x538   : > { %v8401_v6 = vadd.f32 %v3406_v5, %v3333_v55  ;;  %v3483_v59 = vpop.f32.mrf.mxu0  ;;  %v5855_v5 = vunpack.c.l.bf16 %v5896_v56 }
 0x539   : > { %v8408_v25 = vadd.f32 %v3483_v59, %v3333_v55  ;;  %v3408_v52 = vpop.f32.mrf.mxu1  ;;  %v3514_v23 = vmul.f32 %v8411_v10, %v8406_v49  ;;  %6081 = vmatprep.subr.mxu1 %v5856_v44 }
 0x53a   : > { %v3509_v19 = vmul.f32 %v8399_v16, %v8401_v6  ;;  %v8415_v17 = vadd.f32 %v3408_v52, %v3333_v55  ;;  %v5895_v52 = vld [vmem:[%s9643_s12 + $0x58] sm:$0xff]  }
 0x53b   : > { %v3511_v14 = vmul.f32 %v8411_v10, %v8408_v25  ;;  %v3412_v28 = vpop.f32.mrf.mxu1  ;;  %v3533_v38 = vmul.f32 %v3514_v23, %v8406_v49  ;;  %v3522_v12 = vsel %vm3516_vm5, %v3514_v23, 0.0 }
 0x53c   : > { %v3510_v46 = vmul.f32 %v8404_v45, %v8415_v17  ;;  %v8421_v31 = vadd.f32 %v3412_v28, %v3338_v13  ;;  %v3528_v39 = vmul.f32 %v3509_v19, %v8401_v6  ;;  %v5851_v28 = vunpack.c.l.bf16 %v5895_v52 }
 0x53d   : > { %v3530_v9 = vmul.f32 %v3511_v14, %v8408_v25  ;;  %v3414_v2 = vpop.f32.mrf.mxu1  ;;  %v3517_v1 = vsel %vm3516_vm5, %v3511_v14, 0.0  ;;  %v3540_v51 = vsel %vm3516_vm5, %v3533_v38, 0.0  ;;  %v5887_v14 = vld [vmem:[%s9643_s12 + $0x18] sm:$0xff]  }
 0x53e   : > { %v3529_v61 = vmul.f32 %v3510_v46, %v8415_v17  ;;  %v3512_v26 = vmul.f32 %v8399_v16, %v8421_v31  ;;  %v8430_v15 = vadd.f32 %v3414_v2, %v3338_v13  ;;  %v3515_v58 = vadd.f32 %v3510_v46, %v3509_v19  ;;  %v5888_v13 = vld [vmem:[%s9643_s12 + $0x20] sm:$0xff]   ;;  %v5894_v46 = vld [vmem:[%s9643_s12 + $0x50] sm:$0xff]  }
 0x53f   : > { %v3535_v40 = vsel %vm3516_vm5, %v3530_v9, 0.0  ;;  %v5824_v55 = vunpack.c.h.bf16 %v5888_v13  ;;  %v5823_v59 = vunpack.c.l.bf16 %v5888_v13  ;;  %v5852_v19 = vunpack.c.h.bf16 %v5895_v52 }
 0x540   : > { %v3513_v32 = vmul.f32 %v8404_v45, %v8430_v15  ;;  %v3518_v41 = vadd.f32 %v3517_v1, %v3515_v58  ;;  %v3534_v22 = vadd.f32 %v3529_v61, %v3528_v39  ;;  %v3531_v21 = vmul.f32 %v3512_v26, %v8421_v31  ;;  %v5886_v39 = vld [vmem:[%s9643_s12 + $0x10] sm:$0xff]   ;;  %v5885_v1 = vld [vmem:[%s9643_s12 + $0x8] sm:$0xff]  }
 0x541   : > { %6082 = vmatpush3.msra.mxu1 %v5824_v55  ;;  %v5820_v9 = vunpack.c.h.bf16 %v5887_v14  ;;  %v5819_v2 = vunpack.c.l.bf16 %v5887_v14  ;;  %v5848_v23 = vunpack.c.h.bf16 %v5894_v46  ;;  %v5816_v61 = vunpack.c.h.bf16 %v5886_v39 }
 0x542   : > { %v3532_v47 = vmul.f32 %v3513_v32, %v8430_v15  ;;  %3519 = vadd.xlane.f32.xlu1 %v3518_v41  ;;  %v3536_v63 = vadd.f32 %v3535_v40, %v3534_v22  ;;  %v3521_v18 = vadd.f32 %v3513_v32, %v3512_v26  ;;  %6083 = vmatprep.subr.mxu1 %v5855_v5  ;;  %v5893_v26 = vld [vmem:[%s9643_s12 + $0x48] sm:$0xff]   ;;  %v5847_v58 = vunpack.c.l.bf16 %v5894_v46  ;;  %v5892_v40 = vld [vmem:[%s9643_s12 + $0x40] sm:$0xff]  }
 0x543   : > { %6084 = vmatpush3.msra.mxu1 %v5823_v59  ;;  %v5815_v32 = vunpack.c.l.bf16 %v5886_v39  ;;  %v5844_v41 = vunpack.c.h.bf16 %v5893_v26  ;;  %v5812_v22 = vunpack.c.h.bf16 %v5885_v1  ;;  %v5843_v38 = vunpack.c.l.bf16 %v5893_v26 }
 0x544   : > { %3537 = vadd.xlane.f32.xlu0 %v3536_v63  ;;  %v3523_v43 = vadd.f32 %v3522_v12, %v3521_v18  ;;  %v3539_v24 = vadd.f32 %v3532_v47, %v3531_v21  ;;  %6085 = vmatprep.subr.mxu1 %v5852_v19  ;;  %v5806_v21 = vld [vmem:[%s9643_s12] sm:$0xff]   ;;  %v5811_v47 = vunpack.c.l.bf16 %v5885_v1  ;;  %v5840_v63 = vunpack.c.h.bf16 %v5892_v40 }
 0x545   : > { %6086 = vmatpush3.msra.mxu1 %v5820_v9  ;;  %v5808_v18 = vunpack.c.h.bf16 %v5806_v21  ;;  %v5839_v12 = vunpack.c.l.bf16 %v5892_v40 }
 0x546   : > { %3524 = vadd.xlane.f32.xlu1 %v3523_v43  ;;  %v3541_v57 = vadd.f32 %v3540_v51, %v3539_v24  ;;  %6087 = vmatprep.subr.mxu1 %v5851_v28  ;;  %v5807_v43 = vunpack.c.l.bf16 %v5806_v21  ;;  %v3625_v24 = vld [vmem:[%s9643_s12 + $0x84] sm:$0x3] }
 0x547   : > { %6088 = vmatpush3.msra.mxu1 %v5819_v2  ;;  %v3659_v51 = vunpack.c.l.bf16 %v3625_v24 }
 0x548   : > { %3542 = vadd.xlane.f32.xlu0 %v3541_v57  ;;  %6089 = vmatprep.subr.mxu1 %v5848_v23  ;;  %v3624_v57 = vld [vmem:[%s9643_s12 + $0x80] sm:$0xf] }
 0x549   : > { %6090 = vmatpush3.msra.mxu1 %v5816_v61  ;;  %6473 = vmatprep.subr.msk.mxu0 %vm1265_vm8, %v3659_v51  ;;  %v3658_v48 = vunpack.c.l.bf16 %v3624_v57  ;;  %v3912_v57 = vld [vmem:[#allocation7 + $0x8] sm:$0xff] }
 0x54a   : > { %6091 = vmatprep.subr.mxu1 %v5847_v58  ;;  %6474 = vmatpush3.msk.msra.mxu0 %vm1265_vm8, %v3659_v51 }
 0x54b   : > { %6092 = vmatpush3.msra.mxu1 %v5815_v32  ;;  %6475 = vmatprep.subr.mxu0 %v3658_v48 }
 0x54c   : > { %6093 = vmatprep.subr.mxu1 %v5844_v41  ;;  %6476 = vmatpush3.msra.mxu0 %v3658_v48  ;;  %v3919_v48 = vld [vmem:[%s9639_s8] sm:$0xff] }
 0x54d   : > { %6094 = vmatpush3.msra.mxu1 %v5812_v22 }
 0x54e   : > { %6095 = vmatprep.subr.mxu1 %v5843_v38 }
 0x54f   : > { %6096 = vmatpush3.msra.mxu1 %v5811_v47 }
 0x550   : > { %6097 = vmatprep.subr.mxu1 %v5840_v63 }
 0x551   : > { %6098 = vmatpush3.msra.mxu1 %v5808_v18 }
 0x552   : > { %6099 = vmatprep.subr.mxu1 %v5839_v12 }
 0x553   : > { %6100 = vmatpush3.msra.mxu1 %v5807_v43 }
 0x5cb   : > { %v3520_v20 = vpop.xlane.xlu1 %3519 }
 0x5cc   : > { %v3526_v11 = vmul.f32 0.0044444446, %v3520_v20  ;;  %v3921_v20 = vld [vmem:[%s9639_s8 + $0x10] sm:$0xff] }
 0x5cd   : > { %v3538_v62 = vpop.xlane.xlu0 %3537 }
 0x5ce   : > { %v3546_v33 = vmul.f32 %v3526_v11, %v3526_v11  ;;  %v3544_v29 = vmul.f32 0.0044444446, %v3538_v62  ;;  %v3552_v27 = vsub.f32 %v8401_v6, %v3526_v11  ;;  %v3553_v56 = vsub.f32 %v8415_v17, %v3526_v11  ;;  %v3922_v62 = vld [vmem:[%s9639_s8 + $0x18] sm:$0xff] }
 0x5cf   : > { %v3525_v34 = vpop.xlane.xlu1 %3524  ;;  %v3554_v44 = vsub.f32 %v8408_v25, %v3526_v11  ;;  %v3920_v11 = vld [vmem:[%s9639_s8 + $0x8] sm:$0xff] }
 0x5d0   : > { %v3527_v42 = vmul.f32 0.0044444446, %v3525_v34  ;;  %v3548_v50 = vsub.f32 %v3544_v29, %v3546_v33 }
 0x5d1   : > { %v3543_v54 = vpop.xlane.xlu0 %3542 }
 0x5d2   : > { %v3547_v30 = vmul.f32 %v3527_v42, %v3527_v42  ;;  %v3550_v53 = vmax.f32 %v3548_v50, 0.0  ;;  %v3545_v0 = vmul.f32 0.0044444446, %v3543_v54  ;;  %v3555_v46 = vsub.f32 %v8421_v31, %v3527_v42 }
 0x5d3   : > { %v3556_v39 = vsub.f32 %v8430_v15, %v3527_v42  ;;  %v3557_v6 = vsub.f32 %v8406_v49, %v3527_v42 }
 0x5d4   : > { %v3558_v37 = vadd.f32 1e-05, %v3550_v53  ;;  %v3549_v35 = vsub.f32 %v3545_v0, %v3547_v30 }
 0x5d6   : > { %6639 = vrsqrt.f32 %v3558_v37  ;;  %v3551_v36 = vmax.f32 %v3549_v35, 0.0 }
 0x5d8   : > { %v3559_v7 = vadd.f32 1e-05, %v3551_v36 }
 0x5da   : > { %6641 = vrsqrt.f32 %v3559_v7 }
 0x5e3   : > { %v6640_v13 = vpop.eup %6639 }
 0x5e4   : > { %v3563_v55 = vmul.f32 %v6640_v13, %v3553_v56  ;;  %v3564_v5 = vmul.f32 %v6640_v13, %v3554_v44  ;;  %v3562_v59 = vmul.f32 %v6640_v13, %v3552_v27 }
 0x5e6   : > { %v3569_v52 = vmul.f32 %v3563_v55, %v8404_v45  ;;  %v3570_v19 = vmul.f32 %v3564_v5, %v8411_v10  ;;  %v3568_v14 = vmul.f32 %v3562_v59, %v8399_v16 }
 0x5e7   : > { %v6642_v28 = vpop.eup %6641 }
 0x5e8   : > { %vm3575_vm15 = vcmp.ge.f32.partialorder %v3569_v52, 0.0  ;;  %v3581_v17 = vmul.f32 0.2, %v3569_v52  ;;  %vm3576_vm10 = vcmp.ge.f32.partialorder %v3570_v19, 0.0  ;;  %v3582_v25 = vmul.f32 0.2, %v3570_v19 }
 0x5e9   : > { %vm3574_vm11 = vcmp.ge.f32.partialorder %v3568_v14, 0.0  ;;  %v3580_v9 = vmul.f32 0.2, %v3568_v14  ;;  %v3566_v2 = vmul.f32 %v6642_v28, %v3556_v39  ;;  %v3567_v23 = vmul.f32 %v6642_v28, %v3557_v6 }
 0x5ea   : > { %v3587_v61 = vsel %vm3575_vm15, %v3569_v52, %v3581_v17  ;;  %v3588_v26 = vsel %vm3576_vm10, %v3570_v19, %v3582_v25  ;;  %v3565_v58 = vmul.f32 %v6642_v28, %v3555_v46 }
 0x5eb   : > { %3733 = vmatprep.mubr.f32.mxu1 %v3587_v61  ;;  %6477 = vmatprep.mubr.msk.f32.mxu0 %vm3516_vm5, %v3588_v26  ;;  %v3586_v1 = vsel %vm3574_vm11, %v3568_v14, %v3580_v9  ;;  %v3572_v31 = vmul.f32 %v3566_v2, %v8404_v45  ;;  %v3573_v15 = vmul.f32 %v3567_v23, %v8411_v10  ;;  %v3911_v2 = vld [vmem:[#allocation7] sm:$0xff]  ;;  %v3914_v23 = vld [vmem:[#allocation7 + $0x18] sm:$0xff]  ;;  %v3913_v61 = vld [vmem:[#allocation7 + $0x10] sm:$0xff] }
 0x5ec   : > { %3734 = vmatmul.mubr.f32.vlgmr.msra.gmra.mxu1 %v3586_v1  ;;  %v3571_v49 = vmul.f32 %v3565_v58, %v8399_v16  ;;  %v3916_v26 = vld [vmem:[#allocation7 + $0x28] sm:$0xff]  ;;  %v3915_v58 = vld [vmem:[#allocation7 + $0x20] sm:$0xff]  ;;  %v3918_v1 = vld [vmem:[#allocation7 + $0x38] sm:$0xff] }
 0x5ed   : > { %vm3578_vm12 = vcmp.ge.f32.partialorder %v3572_v31, 0.0  ;;  %v3584_v32 = vmul.f32 0.2, %v3572_v31  ;;  %vm3579_vm14 = vcmp.ge.f32.partialorder %v3573_v15, 0.0  ;;  %v3585_v41 = vmul.f32 0.2, %v3573_v15 }
 0x5ee   : > { %vm3577_vm13 = vcmp.ge.f32.partialorder %v3571_v49, 0.0  ;;  %v3583_v22 = vmul.f32 0.2, %v3571_v49 }
 0x5ef   : > { %v3590_v40 = vsel %vm3578_vm12, %v3572_v31, %v3584_v32  ;;  %v3591_v38 = vsel %vm3579_vm14, %v3573_v15, %v3585_v41  ;;  %v3917_v31 = vld [vmem:[#allocation7 + $0x30] sm:$0xff]  ;;  %vm4920_vm14 = vcmask 56320  }
 0x5f0   : > { %3738 = vmatprep.mubr.f32.mxu1 %v3590_v40  ;;  %6478 = vmatmul.mubr.msk.f32.vlgmr.msra.gmra.mxu0 %vm3516_vm5, %v3591_v38  ;;  %v3589_v21 = vsel %vm3577_vm13, %v3571_v49, %v3583_v22  ;;  %v8576_v40 = vld [vmem:[%s9646_s15] ss:$0 sm:$0xff]  ;;  %vm4929_vm13 = vcmask 179200  }
 0x5f1   : > { %3739 = vmatmul.mubr.f32.gmra.mxu1 %v3589_v21  ;;  %4007 = vmatprep.mubr.f32.mxu0 %v3912_v57 }
 0x6ac   : > { %v6101_v47 = vpop.f32.mrf.mxu1 }
 0x6ae   : > { %v6102_v45 = vpop.f32.mrf.mxu1 }
 0x6af   : > { %v6103_v63 = vadd.f32 %v6102_v45, %v6101_v47 }
 0x6b0   : > { %v6479_v10 = vpop.f32.mrf.mxu0 }
 0x6b1   : > { %v6104_v16 = vpop.f32.mrf.mxu1 }
 0x6b2   : > { %v3810_v18 = vpop.f32.mrf.mxu0 }
 0x6b3   : > { %v8511_v12 = vadd.f32 %v6103_v63, %v3810_v18  ;;  %v6105_v43 = vpop.f32.mrf.mxu1 }
 0x6b4   : > { %v6106_v24 = vadd.f32 %v6105_v43, %v6104_v16 }
 0x6b5   : > { %3899 = vrot.lane.b32.xlu0 %v8511_v12, %s6916_s24  ;;  %3905 = vrot.lane.b32.xlu1 %v8511_v12, %s6917_s10 }
 0x6b6   : > { %v8529_v51 = vadd.f32 %v6479_v10, %v6106_v24 }
 0x6b9   : > { %3893 = vrot.lane.b32.xlu0 %v8511_v12, %s6918_s18  ;;  %3857 = vrot.lane.b32.xlu1 %v8511_v12, %s9704_s20 }
 0x6bd   : > { %3887 = vrot.lane.b32.xlu0 %v8511_v12, %s6920_s19  ;;  %3851 = vrot.lane.b32.xlu1 %v8511_v12, %s9710_s22 }
 0x6c1   : > { %3881 = vrot.lane.b32.xlu0 %v8511_v12, %s6922_s27  ;;  %3845 = vrot.lane.b32.xlu1 %v8511_v12, %s6923_s28 }
 0x6c5   : > { %3875 = vrot.lane.b32.xlu0 %v8511_v12, %s6924_s23  ;;  %3839 = vrot.lane.b32.xlu1 %v8511_v12, %s6925_s1 }
 0x6c9   : > { %3869 = vrot.lane.b32.xlu0 %v8511_v12, %s9702_s0  ;;  %3833 = vrot.lane.b32.xlu1 %v8511_v12, %s9708_s25 }
 0x6cd   : > { %3827 = vrot.lane.b32.xlu1 %v8511_v12, %s9822_s30  ;;  %3859 = vrot.lane.b32.xlu0 %v8529_v51, %s9704_s20 }
 0x6d1   : > { %3901 = vrot.lane.b32.xlu0 %v8529_v51, %s6916_s24  ;;  %3907 = vrot.lane.b32.xlu1 %v8529_v51, %s6917_s10  ;;  %s9829_s24 = smov 108   ;;  %s9700_s10 = smov 121  }
 0x6d5   : > { %3895 = vrot.lane.b32.xlu0 %v8529_v51, %s6918_s18  ;;  %3853 = vrot.lane.b32.xlu1 %v8529_v51, %s9710_s22  ;;  %s9694_s18 = smov 119  }
 0x6d9   : > { %3889 = vrot.lane.b32.xlu0 %v8529_v51, %s6920_s19  ;;  %3847 = vrot.lane.b32.xlu1 %v8529_v51, %s6923_s28  ;;  %s9696_s19 = smov 113   ;;  %s9692_s28 = smov 114  }
 0x6dd   : > { %3883 = vrot.lane.b32.xlu0 %v8529_v51, %s6922_s27  ;;  %3841 = vrot.lane.b32.xlu1 %v8529_v51, %s6925_s1  ;;  %s9698_s27 = smov 120   ;;  %s9830_s1 = smov 109  }
 0x6e1   : > { %3877 = vrot.lane.b32.xlu0 %v8529_v51, %s6924_s23  ;;  %3835 = vrot.lane.b32.xlu1 %v8529_v51, %s9708_s25  ;;  %s9706_s23 = smov 122  }
 0x6e5   : > { %3871 = vrot.lane.b32.xlu0 %v8529_v51, %s9702_s0  ;;  %3829 = vrot.lane.b32.xlu1 %v8529_v51, %s9822_s30 }
 0x6e9   : > { %3865 = vrot.lane.b32.xlu0 %v8529_v51, %s9829_s24  ;;  %3823 = vrot.lane.b32.xlu1 %v8529_v51, %s9820_s21 }
 0x6ed   : > { %3925 = vperm.xlu0 %6638, %v3919_v48   ;;  %3821 = vrot.lane.b32.xlu1 %v8511_v12, %s9820_s21 }
 0x6f1   : > { %3935 = vperm.xlu0 %6638, %v3921_v20   ;;  %3863 = vrot.lane.b32.xlu1 %v8511_v12, %s9829_s24 }
 0x6f5   : > { %3930 = vperm.xlu1 %6637, %v3920_v11  }
 0x6f9   : > { %3940 = vperm.xlu1 %6637, %v3922_v62  }
 0x727   : > { %v3900_v33 = vpop.permute.xlu0 %3899  ;;  %v3906_v29 = vpop.permute.xlu1 %3905 }
 0x72b   : > { %v3894_v34 = vpop.permute.xlu0 %3893  ;;  %v3858_v42 = vpop.permute.xlu1 %3857 }
 0x72f   : > { %v3888_v50 = vpop.permute.xlu0 %3887  ;;  %v3852_v54 = vpop.permute.xlu1 %3851 }
 0x733   : > { %v3882_v30 = vpop.permute.xlu0 %3881  ;;  %v3846_v53 = vpop.permute.xlu1 %3845 }
 0x737   : > { %v3876_v0 = vpop.permute.xlu0 %3875  ;;  %v3840_v37 = vpop.permute.xlu1 %3839 }
 0x73b   : > { %v3870_v35 = vpop.permute.xlu0 %3869  ;;  %v3834_v36 = vpop.permute.xlu1 %3833 }
 0x73f   : > { %v3828_v7 = vpop.permute.xlu1 %3827  ;;  %v3860_v27 = vpop.permute.xlu0 %3859 }
 0x743   : > { %v3902_v56 = vpop.permute.xlu0 %3901  ;;  %v3908_v44 = vpop.permute.xlu1 %3907 }
 0x744   : > { %6111 = vmatprep.subr.mxu0 %v3908_v44 }
 0x745   : > { %6112 = vmatpush3.msra.mxu0 %v3860_v27 }
 0x746   : > { %6113 = vmatprep.subr.mxu0 %v3906_v29 }
 0x747   : > { %v3896_v13 = vpop.permute.xlu0 %3895  ;;  %6114 = vmatpush3.msra.mxu0 %v3858_v42  ;;  %v3854_v55 = vpop.permute.xlu1 %3853 }
 0x748   : > { %6115 = vmatprep.subr.mxu0 %v3902_v56  ;;  %v4128_v56 = vld [vmem:[#allocation11 + $0x20] sm:$0x3] }
 0x749   : > { %6116 = vmatpush3.msra.mxu0 %v3854_v55  ;;  %v4137_v44 = vunpack.c.l.bf16 %v4128_v56 }
 0x74a   : > { %6117 = vmatprep.subr.mxu0 %v3900_v33 }
 0x74b   : > { %v3890_v5 = vpop.permute.xlu0 %3889  ;;  %6118 = vmatpush3.msra.mxu0 %v3852_v54  ;;  %v3848_v59 = vpop.permute.xlu1 %3847  ;;  %6480 = vmatprep.subr.msk.mxu1 %vm1265_vm8, %v4137_v44 }
 0x74c   : > { %6119 = vmatprep.subr.mxu0 %v3896_v13  ;;  %v5902_v13 = vld [vmem:[#allocation11 + $0x18] sm:$0xff]   ;;  %6481 = vmatpush3.msk.msra.mxu1 %vm1265_vm8, %v4137_v44 }
 0x74d   : > { %6120 = vmatpush3.msra.mxu0 %v3848_v59  ;;  %v5884_v55 = vunpack.c.h.bf16 %v5902_v13  ;;  %v5901_v59 = vld [vmem:[#allocation11 + $0x10] sm:$0xff]  }
 0x74e   : > { %6121 = vmatprep.subr.mxu0 %v3894_v34 }
 0x74f   : > { %v3884_v52 = vpop.permute.xlu0 %3883  ;;  %6122 = vmatpush3.msra.mxu0 %v3846_v53  ;;  %v3842_v19 = vpop.permute.xlu1 %3841  ;;  %6482 = vmatprep.subr.mxu1 %v5884_v55 }
 0x750   : > { %6123 = vmatprep.subr.mxu0 %v3890_v5  ;;  %v5883_v5 = vunpack.c.l.bf16 %v5902_v13  ;;  %6483 = vmatpush3.msra.mxu1 %v5884_v55 }
 0x751   : > { %6124 = vmatpush3.msra.mxu0 %v3842_v19  ;;  %v5879_v19 = vunpack.c.l.bf16 %v5901_v59 }
 0x752   : > { %6125 = vmatprep.subr.mxu0 %v3888_v50  ;;  %6484 = vmatprep.subr.mxu1 %v5883_v5 }
 0x753   : > { %6126 = vmatpush3.msra.mxu0 %v3840_v37  ;;  %v3836_v14 = vpop.permute.xlu1 %3835  ;;  %v3878_v28 = vpop.permute.xlu0 %3877  ;;  %6485 = vmatpush3.msra.mxu1 %v5883_v5 }
 0x754   : > { %6127 = vmatprep.subr.mxu0 %v3884_v52  ;;  %v5880_v52 = vunpack.c.h.bf16 %v5901_v59 }
 0x755   : > { %6128 = vmatpush3.msra.mxu0 %v3836_v14  ;;  %v5900_v14 = vld [vmem:[#allocation11 + $0x8] sm:$0xff]  }
 0x756   : > { %6129 = vmatprep.subr.mxu0 %v3882_v30  ;;  %6486 = vmatprep.subr.mxu1 %v5880_v52 }
 0x757   : > { %6130 = vmatpush3.msra.mxu0 %v3834_v36  ;;  %v3830_v46 = vpop.permute.xlu1 %3829  ;;  %v3872_v39 = vpop.permute.xlu0 %3871  ;;  %6487 = vmatpush3.msra.mxu1 %v5880_v52 }
 0x758   : > { %6131 = vmatprep.subr.mxu0 %v3878_v28  ;;  %v5876_v28 = vunpack.c.h.bf16 %v5900_v14  ;;  %6488 = vmatprep.subr.mxu1 %v5879_v19 }
 0x759   : > { %6132 = vmatpush3.msra.mxu0 %v3830_v46  ;;  %v5870_v46 = vld [vmem:[#allocation11] sm:$0xff]   ;;  %6489 = vmatpush3.msra.mxu1 %v5879_v19 }
 0x75a   : > { %6133 = vmatprep.subr.mxu0 %v3876_v0  ;;  %6490 = vmatprep.subr.mxu1 %v5876_v28 }
 0x75b   : > { %6134 = vmatpush3.msra.mxu0 %v3828_v7  ;;  %v3824_v6 = vpop.permute.xlu1 %3823  ;;  %v3866_v25 = vpop.permute.xlu0 %3865  ;;  %6491 = vmatpush3.msra.mxu1 %v5876_v28 }
 0x75c   : > { %6135 = vmatprep.subr.mxu0 %v3872_v39  ;;  %v5875_v39 = vunpack.c.l.bf16 %v5900_v14 }
 0x75d   : > { %6136 = vmatpush3.msra.mxu0 %v3824_v6  ;;  %v5872_v6 = vunpack.c.h.bf16 %v5870_v46 }
 0x75e   : > { %6137 = vmatprep.subr.mxu0 %v3870_v35  ;;  %6492 = vmatprep.subr.mxu1 %v5875_v39 }
 0x75f   : > { %v3822_v17 = vpop.permute.xlu1 %3821  ;;  %6493 = vmatpush3.msra.mxu1 %v5875_v39 }
 0x760   : > { %6138 = vmatpush3.msra.mxu0 %v3822_v17  ;;  %v5871_v17 = vunpack.c.l.bf16 %v5870_v46  ;;  %6494 = vmatprep.subr.mxu1 %v5872_v6 }
 0x761   : > { %6139 = vmatprep.subr.mxu0 %v3866_v25  ;;  %6495 = vmatpush3.msra.mxu1 %v5872_v6 }
 0x762   : > { %6140 = vmatpush3.msra.mxu0 %v8529_v51  ;;  %6496 = vmatprep.subr.mxu1 %v5871_v17 }
 0x763   : > { %v3864_v9 = vpop.permute.xlu1 %3863  ;;  %6497 = vmatpush3.msra.mxu1 %v5871_v17 }
 0x764   : > { %6141 = vmatprep.subr.mxu0 %v3864_v9 }
 0x765   : > { %6142 = vmatpush3.msra.mxu0 %v8511_v12 }
 0x766   : > { %4008 = vmatmul.mubr.f32.vlgmr.msra.gmra.mxu0 %v3911_v2 }
 0x767   : > { %4012 = vmatprep.mubr.f32.mxu0 %v3914_v23 }
 0x768   : > { %v3926_v41 = vpop.permute.xlu0 %3925 }
 0x76a   : > { %4013 = vmatmul.mubr.f32.gmra.mxu0 %v3913_v61 }
 0x76b   : > { %4017 = vmatprep.mubr.f32.mxu0 %v3916_v26 }
 0x76c   : > { %v3936_v57 = vpop.permute.xlu0 %3935 }
 0x76e   : > { %4018 = vmatmul.mubr.f32.gmra.mxu0 %v3915_v58 }
 0x76f   : > { %4022 = vmatprep.mubr.f32.mxu0 %v3918_v1 }
 0x770   : > { %v3931_v63 = vpop.permute.xlu1 %3930 }
 0x772   : > { %4023 = vmatmul.mubr.f32.gmra.mxu0 %v3917_v31 }
 0x774   : > { %v3941_v50 = vpop.permute.xlu1 %3940 }
 0x826   : > { %v6143_v15 = vpop.f32.mrf.mxu0 }
 0x828   : > { %v6144_v49 = vpop.f32.mrf.mxu0 }
 0x829   : > { %v6145_v32 = vadd.f32 %v6144_v49, %v6143_v15 }
 0x82a   : > { %v6146_v22 = vpop.f32.mrf.mxu0 }
 0x82b   : > { %v8578_v38 = vadd.f32 %v6145_v32, %v3926_v41 }
 0x82c   : > { %v6147_v21 = vpop.f32.mrf.mxu0 }
 0x82d   : > { %v6148_v47 = vadd.f32 %v6147_v21, %v6146_v22  ;;  %v4035_v45 = vmul.f32 %v8576_v40, %v8578_v38 }
 0x82e   : > { %v6149_v10 = vpop.f32.mrf.mxu0 }
 0x82f   : > { %v8582_v18 = vadd.f32 %v6148_v47, %v3931_v63  ;;  %v4040_v12 = vsel %vm4039_vm0, %v4035_v45, 0.0  ;;  %v4056_v16 = vmul.f32 %v4035_v45, %v8578_v38 }
 0x830   : > { %v6150_v43 = vpop.f32.mrf.mxu0  ;;  %4041 = vadd.xlane.f32.xlu0 %v4040_v12 }
 0x831   : > { %v6151_v24 = vadd.f32 %v6150_v43, %v6149_v10  ;;  %v4036_v51 = vmul.f32 %v8576_v40, %v8582_v18  ;;  %v4060_v11 = vsel %vm4039_vm0, %v4056_v16, 0.0 }
 0x832   : > { %v6152_v48 = vpop.f32.mrf.mxu0 }
 0x833   : > { %v8588_v20 = vadd.f32 %v6151_v24, %v3936_v57  ;;  %v4043_v62 = vsel %vm4039_vm0, %v4036_v51, 0.0  ;;  %v4057_v33 = vmul.f32 %v4036_v51, %v8582_v18 }
 0x834   : > { %v6153_v29 = vpop.f32.mrf.mxu0  ;;  %4061 = vadd.xlane.f32.xlu0 %v4060_v11  ;;  %4044 = vadd.xlane.f32.xlu1 %v4043_v62 }
 0x835   : > { %v6154_v34 = vadd.f32 %v6153_v29, %v6152_v48  ;;  %v4037_v42 = vmul.f32 %v8576_v40, %v8588_v20  ;;  %v4063_v30 = vsel %vm4039_vm0, %v4057_v33, 0.0 }
 0x837   : > { %v8595_v54 = vadd.f32 %v6154_v34, %v3941_v50  ;;  %v4046_v53 = vsel %vm4039_vm0, %v4037_v42, 0.0  ;;  %v4058_v0 = vmul.f32 %v4037_v42, %v8588_v20 }
 0x838   : > { %4064 = vadd.xlane.f32.xlu0 %v4063_v30  ;;  %4047 = vadd.xlane.f32.xlu1 %v4046_v53 }
 0x839   : > { %v4038_v37 = vmul.f32 %v8576_v40, %v8595_v54  ;;  %v4066_v35 = vsel %vm4039_vm0, %v4058_v0, 0.0 }
 0x83b   : > { %v4049_v36 = vsel %vm4039_vm0, %v4038_v37, 0.0  ;;  %v4059_v7 = vmul.f32 %v4038_v37, %v8595_v54 }
 0x83c   : > { %4067 = vadd.xlane.f32.xlu1 %v4066_v35  ;;  %4050 = vadd.xlane.f32.xlu0 %v4049_v36 }
 0x83d   : > { %v4069_v27 = vsel %vm4039_vm0, %v4059_v7, 0.0 }
 0x840   : > { %4070 = vadd.xlane.f32.xlu0 %v4069_v27 }
 0x8b9   : > { %v4042_v25 = vpop.xlane.xlu0 %4041 }
 0x8ba   : > { %v4052_v9 = vmul.f32 0.020408163, %v4042_v25  ;;  %v4423_v25 = vld [vmem:[%s9635_s4 + $0x8] sm:$0xff] }
 0x8bb   : > { %4566 = vmatprep.mubr.f32.mxu0 %v4423_v25 }
 0x8bc   : > { %v4076_v61 = vmul.f32 %v4052_v9, %v4052_v9  ;;  %v4088_v50 = vsub.f32 %v8578_v38, %v4052_v9  ;;  %v4425_v9 = vld [vmem:[%s9635_s4 + $0x18] sm:$0xff] }
 0x8bd   : > { %v4062_v2 = vpop.xlane.xlu0 %4061  ;;  %v4045_v23 = vpop.xlane.xlu1 %4044 }
 0x8be   : > { %v4072_v26 = vmul.f32 0.020408163, %v4062_v2  ;;  %v4053_v58 = vmul.f32 0.020408163, %v4045_v23  ;;  %v4461_v2 = vld [vmem:[%s9640_s9 + $0x38] sm:$0xff] }
 0x8c0   : > { %v4080_v1 = vsub.f32 %v4072_v26, %v4076_v61  ;;  %v4077_v32 = vmul.f32 %v4053_v58, %v4053_v58  ;;  %v4089_v0 = vsub.f32 %v8582_v18, %v4053_v58  ;;  %v4459_v26 = vld [vmem:[%s9640_s9 + $0x28] sm:$0xff] }
 0x8c1   : > { %v4065_v31 = vpop.xlane.xlu0 %4064  ;;  %v4048_v15 = vpop.xlane.xlu1 %4047 }
 0x8c2   : > { %v4084_v49 = vmax.f32 %v4080_v1, 0.0  ;;  %v4073_v41 = vmul.f32 0.020408163, %v4065_v31  ;;  %v4054_v22 = vmul.f32 0.020408163, %v4048_v15  ;;  %v4457_v31 = vld [vmem:[%s9640_s9 + $0x18] sm:$0xff] }
 0x8c3   : > { %v4460_v15 = vld [vmem:[%s9640_s9 + $0x30] sm:$0xff] }
 0x8c4   : > { %v4092_v21 = vadd.f32 1e-05, %v4084_v49  ;;  %v4081_v47 = vsub.f32 %v4073_v41, %v4077_v32  ;;  %v4078_v45 = vmul.f32 %v4054_v22, %v4054_v22  ;;  %v4090_v27 = vsub.f32 %v8588_v20, %v4054_v22  ;;  %v4455_v41 = vld [vmem:[%s9640_s9 + $0x8] sm:$0xff]  ;;  %v4458_v22 = vld [vmem:[%s9640_s9 + $0x20] sm:$0xff] }
 0x8c5   : > { %v4051_v63 = vpop.xlane.xlu0 %4050  ;;  %v4068_v10 = vpop.xlane.xlu1 %4067 }
 0x8c6   : > { %6643 = vrsqrt.f32 %v4092_v21  ;;  %v4085_v12 = vmax.f32 %v4081_v47, 0.0  ;;  %v4055_v16 = vmul.f32 0.020408163, %v4051_v63  ;;  %v4074_v43 = vmul.f32 0.020408163, %v4068_v10 }
 0x8c8   : > { %v4093_v24 = vadd.f32 1e-05, %v4085_v12  ;;  %v4082_v51 = vsub.f32 %v4074_v43, %v4078_v45  ;;  %v4079_v48 = vmul.f32 %v4055_v16, %v4055_v16  ;;  %v4091_v5 = vsub.f32 %v8595_v54, %v4055_v16  ;;  %v4456_v45 = vld [vmem:[%s9640_s9 + $0x10] sm:$0xff]  ;;  %v4454_v12 = vld [vmem:[%s9640_s9] sm:$0xff] }
 0x8c9   : > { %v4071_v57 = vpop.xlane.xlu0 %4070 }
 0x8ca   : > { %6645 = vrsqrt.f32 %v4093_v24  ;;  %v4086_v11 = vmax.f32 %v4082_v51, 0.0  ;;  %v4075_v62 = vmul.f32 0.020408163, %v4071_v57 }
 0x8cc   : > { %v4094_v33 = vadd.f32 1e-05, %v4086_v11  ;;  %v4083_v29 = vsub.f32 %v4075_v62, %v4079_v48 }
 0x8ce   : > { %6647 = vrsqrt.f32 %v4094_v33  ;;  %v4087_v34 = vmax.f32 %v4083_v29, 0.0 }
 0x8d0   : > { %v4095_v42 = vadd.f32 1e-05, %v4087_v34 }
 0x8d2   : > { %6649 = vrsqrt.f32 %v4095_v42 }
 0x8d3   : > { %v6644_v30 = vpop.eup %6643 }
 0x8d4   : > { %v4100_v53 = vmul.f32 %v6644_v30, %v4088_v50 }
 0x8d6   : > { %v4104_v37 = vmul.f32 %v8576_v40, %v4100_v53 }
 0x8d7   : > { %v6646_v35 = vpop.eup %6645 }
 0x8d8   : > { %vm4108_vm8 = vcmp.ge.f32.partialorder %v4104_v37, 0.0  ;;  %v4112_v36 = vmul.f32 0.2, %v4104_v37  ;;  %v4101_v7 = vmul.f32 %v6646_v35, %v4089_v0 }
 0x8da   : > { %v4116_v56 = vsel %vm4108_vm8, %v4104_v37, %v4112_v36  ;;  %v4105_v44 = vmul.f32 %v8576_v40, %v4101_v7 }
 0x8db   : > { %v6648_v13 = vpop.eup %6647  ;;  %6498 = vmatprep.mubr.msk.f32.mxu1 %vm4039_vm0, %v4116_v56 }
 0x8dc   : > { %vm4109_vm9 = vcmp.ge.f32.partialorder %v4105_v44, 0.0  ;;  %v4113_v38 = vmul.f32 0.2, %v4105_v44  ;;  %v4102_v55 = vmul.f32 %v6648_v13, %v4090_v27 }
 0x8de   : > { %v4117_v18 = vsel %vm4109_vm9, %v4105_v44, %v4113_v38  ;;  %v4106_v59 = vmul.f32 %v8576_v40, %v4102_v55 }
 0x8df   : > { %v6650_v52 = vpop.eup %6649  ;;  %6499 = vmatmul.mubr.msk.f32.vlgmr.msra.gmra.mxu1 %vm4039_vm0, %v4117_v18 }
 0x8e0   : > { %vm4110_vm3 = vcmp.ge.f32.partialorder %v4106_v59, 0.0  ;;  %v4114_v19 = vmul.f32 0.2, %v4106_v59  ;;  %v4103_v20 = vmul.f32 %v6650_v52, %v4091_v5 }
 0x8e2   : > { %v4118_v14 = vsel %vm4110_vm3, %v4106_v59, %v4114_v19  ;;  %v4107_v28 = vmul.f32 %v8576_v40, %v4103_v20 }
 0x8e3   : > { %6501 = vmatprep.mubr.msk.f32.mxu1 %vm4039_vm0, %v4118_v14 }
 0x8e4   : > { %vm4111_vm1 = vcmp.ge.f32.partialorder %v4107_v28, 0.0  ;;  %v4115_v46 = vmul.f32 0.2, %v4107_v28 }
 0x8e6   : > { %v4119_v39 = vsel %vm4111_vm1, %v4107_v28, %v4115_v46 }
 0x8e7   : > { %6502 = vmatmul.mubr.msk.f32.gmra.mxu1 %vm4039_vm0, %v4119_v39  ;;  %vm5638_vm0 = vcmask 57344  }
 0x8e8   : > { %4671 = vmatprep.mubr.f32.mxu1 %v4425_v9 }
 0x99f   : > { %v8620_v54 = vpop.f32.mrf.mxu1 }
 0x9a0   : > { %4412 = vrot.lane.b32.xlu1 %v8620_v54, %s9702_s0  ;;  %4316 = vrot.lane.b32.xlu0 %v8620_v54, %s9694_s18 }
 0x9a1   : > { %v8646_v40 = vpop.f32.mrf.mxu1 }
 0x9a4   : > { %4364 = vrot.lane.b32.xlu1 %v8620_v54, %s9696_s19  ;;  %4268 = vrot.lane.b32.xlu0 %v8620_v54, %s9708_s25 }
 0x9a7   : > { %v8668_v6 = vpop.f32.mrf.mxu1 }
 0x9a8   : > { %4400 = vrot.lane.b32.xlu1 %v8620_v54, %s9829_s24  ;;  %4304 = vrot.lane.b32.xlu0 %v8620_v54, %s9698_s27 }
 0x9a9   : > { %v8702_v17 = vpop.f32.mrf.mxu1 }
 0x9ac   : > { %4352 = vrot.lane.b32.xlu1 %v8620_v54, %s9692_s28  ;;  %4256 = vrot.lane.b32.xlu0 %v8620_v54, %s9822_s30 }
 0x9b0   : > { %4388 = vrot.lane.b32.xlu1 %v8620_v54, %s9830_s1  ;;  %4292 = vrot.lane.b32.xlu0 %v8620_v54, %s9700_s10 }
 0x9b4   : > { %4340 = vrot.lane.b32.xlu1 %v8620_v54, %s9704_s20  ;;  %4244 = vrot.lane.b32.xlu0 %v8620_v54, %s9820_s21 }
 0x9b8   : > { %4410 = vrot.lane.b32.xlu1 %v8646_v40, %s9702_s0  ;;  %4314 = vrot.lane.b32.xlu0 %v8646_v40, %s9694_s18 }
 0x9bc   : > { %4362 = vrot.lane.b32.xlu1 %v8646_v40, %s9696_s19  ;;  %4266 = vrot.lane.b32.xlu0 %v8646_v40, %s9708_s25 }
 0x9c0   : > { %4398 = vrot.lane.b32.xlu1 %v8646_v40, %s9829_s24  ;;  %4302 = vrot.lane.b32.xlu0 %v8646_v40, %s9698_s27 }
 0x9c4   : > { %4350 = vrot.lane.b32.xlu1 %v8646_v40, %s9692_s28  ;;  %4254 = vrot.lane.b32.xlu0 %v8646_v40, %s9822_s30 }
 0x9c8   : > { %4386 = vrot.lane.b32.xlu1 %v8646_v40, %s9830_s1  ;;  %4290 = vrot.lane.b32.xlu0 %v8646_v40, %s9700_s10 }
 0x9cc   : > { %4242 = vrot.lane.b32.xlu0 %v8646_v40, %s9820_s21  ;;  %4320 = vrot.lane.b32.xlu1 %v8668_v6, %s9694_s18 }
 0x9d0   : > { %4338 = vrot.lane.b32.xlu0 %v8646_v40, %s9704_s20  ;;  %4416 = vrot.lane.b32.xlu1 %v8668_v6, %s9702_s0 }
 0x9d4   : > { %4272 = vrot.lane.b32.xlu0 %v8668_v6, %s9708_s25  ;;  %4368 = vrot.lane.b32.xlu1 %v8668_v6, %s9696_s19 }
 0x9d8   : > { %4308 = vrot.lane.b32.xlu0 %v8668_v6, %s9698_s27  ;;  %4404 = vrot.lane.b32.xlu1 %v8668_v6, %s9829_s24 }
 0x9dc   : > { %4260 = vrot.lane.b32.xlu0 %v8668_v6, %s9822_s30  ;;  %4356 = vrot.lane.b32.xlu1 %v8668_v6, %s9692_s28  ;;  %s9831_s28 = smov 110  }
 0x9e0   : > { %4296 = vrot.lane.b32.xlu0 %v8668_v6, %s9700_s10  ;;  %4392 = vrot.lane.b32.xlu1 %v8668_v6, %s9830_s1 }
 0x9e4   : > { %4248 = vrot.lane.b32.xlu0 %v8668_v6, %s9820_s21  ;;  %4344 = vrot.lane.b32.xlu1 %v8668_v6, %s9704_s20 }
 0x9e8   : > { %4284 = vrot.lane.b32.xlu0 %v8668_v6, %s9706_s23  ;;  %4332 = vrot.lane.b32.xlu1 %v8668_v6, %s9710_s22 }
 0x9ec   : > { %4380 = vrot.lane.b32.xlu0 %v8668_v6, %s9831_s28  ;;  %4318 = vrot.lane.b32.xlu1 %v8702_v17, %s9694_s18  ;;  %s9832_s18 = smov 114  }
 0x9f0   : > { %4270 = vrot.lane.b32.xlu0 %v8702_v17, %s9708_s25  ;;  %4414 = vrot.lane.b32.xlu1 %v8702_v17, %s9702_s0  ;;  %s9840_s25 = smov 113   ;;  %s9855_s0 = smov 116  }
 0x9f4   : > { %4306 = vrot.lane.b32.xlu0 %v8702_v17, %s9698_s27  ;;  %4366 = vrot.lane.b32.xlu1 %v8702_v17, %s9696_s19  ;;  %s9838_s19 = smov 120   ;;  %s9839_s27 = smov 122  }
 0x9f8   : > { %4258 = vrot.lane.b32.xlu0 %v8702_v17, %s9822_s30  ;;  %4402 = vrot.lane.b32.xlu1 %v8702_v17, %s9829_s24 }
 0x9fc   : > { %4294 = vrot.lane.b32.xlu0 %v8702_v17, %s9700_s10  ;;  %4354 = vrot.lane.b32.xlu1 %v8702_v17, %s9832_s18  ;;  %s6932_s10 = smov 7  }
 0xa00   : > { %4246 = vrot.lane.b32.xlu0 %v8702_v17, %s9820_s21  ;;  %4278 = vrot.lane.b32.xlu1 %v8646_v40, %s9706_s23 }
 0xa04   : > { %4280 = vrot.lane.b32.xlu0 %v8620_v54, %s9706_s23  ;;  %4390 = vrot.lane.b32.xlu1 %v8702_v17, %s9830_s1 }
 0xa08   : > { %4376 = vrot.lane.b32.xlu0 %v8620_v54, %s9831_s28  ;;  %4342 = vrot.lane.b32.xlu1 %v8702_v17, %s9704_s20  ;;  %s9834_s20 = smov 119  }
 0xa0c   : > { %4330 = vrot.lane.b32.xlu0 %v8702_v17, %s9710_s22  ;;  %4282 = vrot.lane.b32.xlu1 %v8702_v17, %s9706_s23  ;;  %s9836_s23 = smov 107  }
 0xa10   : > { %4374 = vrot.lane.b32.xlu0 %v8646_v40, %s9831_s28  ;;  %4378 = vrot.lane.b32.xlu1 %v8702_v17, %s9831_s28 }
 0xa12   : > { %v8753_v23 = vpop.permute.xlu0 %4316  ;;  %v8755_v61 = vpop.permute.xlu1 %4412 }
 0xa14   : > { %4499 = vperm.xlu0 %6638, %v4461_v2   ;;  %4328 = vrot.lane.b32.xlu1 %v8620_v54, %s9710_s22 }
 0xa16   : > { %v4269_v58 = vpop.permute.xlu0 %4268  ;;  %v8762_v1 = vpop.permute.xlu1 %4364 }
 0xa18   : > { %4489 = vperm.xlu0 %6638, %v4459_v26   ;;  %4326 = vrot.lane.b32.xlu1 %v8646_v40, %s9710_s22  ;;  %s9841_s22 = smov 115  }
 0xa1a   : > { %v8772_v49 = vpop.permute.xlu0 %4304  ;;  %v8774_v32 = vpop.permute.xlu1 %4400 }
 0xa1c   : > { %4479 = vperm.xlu0 %6638, %v4457_v31   ;;  %4494 = vperm.xlu1 %6637, %v4460_v15  }
 0xa1e   : > { %v8782_v21 = vpop.permute.xlu0 %4256  ;;  %v8784_v47 = vpop.permute.xlu1 %4352 }
 0xa20   : > { %4469 = vperm.xlu0 %6638, %v4455_v41   ;;  %4484 = vperm.xlu1 %6637, %v4458_v22   ;;  %v4431_v22 = vld [vmem:[%s9635_s4 + $0x48] sm:$0xff] }
 0xa22   : > { %v8789_v63 = vpop.permute.xlu0 %4292  ;;  %v8791_v10 = vpop.permute.xlu1 %4388 }
 0xa24   : > { %4474 = vperm.xlu1 %6637, %v4456_v45   ;;  %v4429_v45 = vld [vmem:[%s9635_s4 + $0x38] sm:$0xff] }
 0xa26   : > { %v8796_v16 = vpop.permute.xlu0 %4244  ;;  %v8798_v43 = vpop.permute.xlu1 %4340 }
 0xa28   : > { %4464 = vperm.xlu1 %6637, %v4454_v12   ;;  %v4434_v12 = vld [vmem:[%s9635_s4 + $0x60] sm:$0xff] }
 0xa2a   : > { %v4315_v24 = vpop.permute.xlu0 %4314  ;;  %v4411_v51 = vpop.permute.xlu1 %4410 }
 0xa2e   : > { %v4267_v57 = vpop.permute.xlu0 %4266  ;;  %v4363_v48 = vpop.permute.xlu1 %4362 }
 0xa32   : > { %v4303_v11 = vpop.permute.xlu0 %4302  ;;  %v8800_v62 = vpop.permute.xlu1 %4398 }
 0xa36   : > { %v4255_v33 = vpop.permute.xlu0 %4254  ;;  %v8802_v29 = vpop.permute.xlu1 %4350 }
 0xa3a   : > { %v8804_v34 = vpop.permute.xlu0 %4290  ;;  %v8806_v42 = vpop.permute.xlu1 %4386 }
 0xa3e   : > { %v8808_v50 = vpop.permute.xlu0 %4242  ;;  %v4321_v30 = vpop.permute.xlu1 %4320 }
 0xa3f   : > { %6168 = vmatprep.subr.mxu0 %v4321_v30  ;;  %v4451_v30 = vld [vmem:[%s9635_s4 + $0xe8] sm:$0xff] }
 0xa42   : > { %v8810_v53 = vpop.permute.xlu0 %4338  ;;  %v4417_v0 = vpop.permute.xlu1 %4416 }
 0xa43   : > { %6224 = vmatprep.subr.mxu1 %v4417_v0  ;;  %v4450_v0 = vld [vmem:[%s9635_s4 + $0xe0] sm:$0xff] }
 0xa46   : > { %v4273_v37 = vpop.permute.xlu0 %4272  ;;  %v4369_v35 = vpop.permute.xlu1 %4368 }
 0xa47   : > { %6169 = vmatpush3.msra.mxu0 %v4273_v37  ;;  %6225 = vmatpush3.msra.mxu1 %v4369_v35  ;;  %v4449_v37 = vld [vmem:[%s9635_s4 + $0xd8] sm:$0xff]  ;;  %v4448_v35 = vld [vmem:[%s9635_s4 + $0xd0] sm:$0xff] }
 0xa4a   : > { %v4309_v36 = vpop.permute.xlu0 %4308  ;;  %v4405_v7 = vpop.permute.xlu1 %4404 }
 0xa4e   : > { %v4261_v27 = vpop.permute.xlu0 %4260  ;;  %v4357_v56 = vpop.permute.xlu1 %4356 }
 0xa52   : > { %v4297_v44 = vpop.permute.xlu0 %4296  ;;  %v4393_v13 = vpop.permute.xlu1 %4392 }
 0xa56   : > { %v4249_v38 = vpop.permute.xlu0 %4248  ;;  %v4345_v55 = vpop.permute.xlu1 %4344 }
 0xa5a   : > { %v4285_v5 = vpop.permute.xlu0 %4284  ;;  %v8812_v18 = vpop.permute.xlu1 %4332 }
 0xa5e   : > { %v8814_v59 = vpop.permute.xlu0 %4380  ;;  %v4319_v52 = vpop.permute.xlu1 %4318 }
 0xa5f   : > { %6170 = vmatprep.subr.mxu0 %v4319_v52 }
 0xa62   : > { %v4271_v19 = vpop.permute.xlu0 %4270  ;;  %v4415_v20 = vpop.permute.xlu1 %4414 }
 0xa63   : > { %6171 = vmatpush3.msra.mxu0 %v4271_v19  ;;  %6226 = vmatprep.subr.mxu1 %v4415_v20 }
 0xa64   : > { %6172 = vmatprep.subr.mxu0 %v8753_v23 }
 0xa65   : > { %6173 = vmatpush3.msra.mxu0 %v4269_v58 }
 0xa66   : > { %v4307_v14 = vpop.permute.xlu0 %4306  ;;  %6174 = vmatprep.subr.mxu0 %v4315_v24  ;;  %v4367_v28 = vpop.permute.xlu1 %4366  ;;  %v4432_v24 = vld [vmem:[%s9635_s4 + $0x50] sm:$0xff] }
 0xa67   : > { %6175 = vmatpush3.msra.mxu0 %v4267_v57  ;;  %6227 = vmatpush3.msra.mxu1 %v4367_v28  ;;  %v4437_v57 = vld [vmem:[%s9635_s4 + $0x78] sm:$0xff] }
 0xa68   : > { %6176 = vmatprep.subr.mxu0 %v4309_v36  ;;  %6228 = vmatprep.subr.mxu1 %v8755_v61  ;;  %v4453_v36 = vld [vmem:[%s9635_s4 + $0xf8] sm:$0xff] }
 0xa69   : > { %6177 = vmatpush3.msra.mxu0 %v4261_v27  ;;  %6229 = vmatpush3.msra.mxu1 %v8762_v1 }
 0xa6a   : > { %v4259_v46 = vpop.permute.xlu0 %4258  ;;  %6178 = vmatprep.subr.mxu0 %v4307_v14  ;;  %6230 = vmatprep.subr.mxu1 %v4411_v51  ;;  %v4403_v39 = vpop.permute.xlu1 %4402  ;;  %v4438_v51 = vld [vmem:[%s9635_s4 + $0x80] sm:$0xff] }
 0xa6b   : > { %6179 = vmatpush3.msra.mxu0 %v4259_v46  ;;  %6231 = vmatpush3.msra.mxu1 %v4363_v48  ;;  %v4443_v48 = vld [vmem:[%s9635_s4 + $0xa8] sm:$0xff] }
 0xa6c   : > { %6180 = vmatprep.subr.mxu0 %v8772_v49  ;;  %6232 = vmatprep.subr.mxu1 %v4405_v7  ;;  %v4422_v49 = vld [vmem:[%s9635_s4] sm:$0xff]  ;;  %v4452_v7 = vld [vmem:[%s9635_s4 + $0xf0] sm:$0xff] }
 0xa6d   : > { %6181 = vmatpush3.msra.mxu0 %v8782_v21  ;;  %6233 = vmatpush3.msra.mxu1 %v4357_v56 }
 0xa6e   : > { %v4295_v25 = vpop.permute.xlu0 %4294  ;;  %6182 = vmatprep.subr.mxu0 %v4303_v11  ;;  %6234 = vmatprep.subr.mxu1 %v4403_v39  ;;  %v4355_v9 = vpop.permute.xlu1 %4354  ;;  %v4436_v11 = vld [vmem:[%s9635_s4 + $0x70] sm:$0xff] }
 0xa6f   : > { %6183 = vmatpush3.msra.mxu0 %v4255_v33  ;;  %6235 = vmatpush3.msra.mxu1 %v4355_v9  ;;  %v4441_v33 = vld [vmem:[%s9635_s4 + $0x98] sm:$0xff] }
 0xa70   : > { %6184 = vmatprep.subr.mxu0 %v4297_v44  ;;  %6236 = vmatprep.subr.mxu1 %v8774_v32  ;;  %v4427_v32 = vld [vmem:[%s9635_s4 + $0x28] sm:$0xff] }
 0xa71   : > { %6185 = vmatpush3.msra.mxu0 %v4249_v38  ;;  %6237 = vmatpush3.msra.mxu1 %v8784_v47  ;;  %v4430_v47 = vld [vmem:[%s9635_s4 + $0x40] sm:$0xff] }
 0xa72   : > { %v4247_v2 = vpop.permute.xlu0 %4246  ;;  %6186 = vmatprep.subr.mxu0 %v4295_v25  ;;  %6238 = vmatprep.subr.mxu1 %v8800_v62  ;;  %v4279_v23 = vpop.permute.xlu1 %4278  ;;  %v4442_v62 = vld [vmem:[%s9635_s4 + $0xa0] sm:$0xff] }
 0xa73   : > { %6187 = vmatpush3.msra.mxu0 %v4247_v2  ;;  %6239 = vmatpush3.msra.mxu1 %v8802_v29  ;;  %v4447_v29 = vld [vmem:[%s9635_s4 + $0xc8] sm:$0xff] }
 0xa74   : > { %6188 = vmatprep.subr.mxu0 %v8789_v63  ;;  %6240 = vmatprep.subr.mxu1 %v4393_v13  ;;  %v4435_v63 = vld [vmem:[%s9635_s4 + $0x68] sm:$0xff] }
 0xa75   : > { %6189 = vmatpush3.msra.mxu0 %v8796_v16  ;;  %6241 = vmatpush3.msra.mxu1 %v4345_v55  ;;  %v4433_v16 = vld [vmem:[%s9635_s4 + $0x58] sm:$0xff] }
 0xa76   : > { %v4281_v61 = vpop.permute.xlu0 %4280  ;;  %6190 = vmatprep.subr.mxu0 %v8804_v34  ;;  %v4391_v26 = vpop.permute.xlu1 %4390  ;;  %v4440_v34 = vld [vmem:[%s9635_s4 + $0x90] sm:$0xff] }
 0xa77   : > { %6191 = vmatpush3.msra.mxu0 %v8808_v50  ;;  %6242 = vmatprep.subr.mxu1 %v4391_v26  ;;  %v4445_v50 = vld [vmem:[%s9635_s4 + $0xb8] sm:$0xff] }
 0xa78   : > { %6192 = vmatprep.subr.mxu0 %v4285_v5 }
 0xa79   : > { %6193 = vmatpush3.msra.mxu0 %v8668_v6 }
 0xa7a   : > { %v4343_v58 = vpop.permute.xlu1 %4342  ;;  %v4377_v1 = vpop.permute.xlu0 %4376 }
 0xa7b   : > { %6243 = vmatpush3.msra.mxu1 %v4343_v58 }
 0xa7c   : > { %6244 = vmatprep.subr.mxu1 %v8791_v10  ;;  %v4428_v10 = vld [vmem:[%s9635_s4 + $0x30] sm:$0xff] }
 0xa7d   : > { %6245 = vmatpush3.msra.mxu1 %v8798_v43  ;;  %v4439_v43 = vld [vmem:[%s9635_s4 + $0x88] sm:$0xff] }
 0xa7e   : > { %6246 = vmatprep.subr.mxu1 %v8806_v42  ;;  %v4283_v31 = vpop.permute.xlu1 %4282  ;;  %v4331_v15 = vpop.permute.xlu0 %4330  ;;  %v4446_v42 = vld [vmem:[%s9635_s4 + $0xc0] sm:$0xff] }
 0xa7f   : > { %6194 = vmatprep.subr.mxu0 %v4283_v31  ;;  %6247 = vmatpush3.msra.mxu1 %v8810_v53  ;;  %v4444_v53 = vld [vmem:[%s9635_s4 + $0xb0] sm:$0xff] }
 0xa80   : > { %6195 = vmatpush3.msra.mxu0 %v8702_v17  ;;  %6248 = vmatprep.subr.mxu1 %v8814_v59 }
 0xa81   : > { %6196 = vmatprep.subr.mxu0 %v4281_v61  ;;  %6249 = vmatpush3.msra.mxu1 %v8812_v18  ;;  %v8935_v61 = vld [vmem:[#allocation13] ss:$0 sm:$0xff] }
 0xa82   : > { %6197 = vmatpush3.msra.mxu0 %v8620_v54  ;;  %v4379_v6 = vpop.permute.xlu1 %4378  ;;  %v4426_v54 = vld [vmem:[%s9635_s4 + $0x20] sm:$0xff]  ;;  %v4375_v41 = vpop.permute.xlu0 %4374 }
 0xa83   : > { %6198 = vmatprep.subr.mxu0 %v4279_v23  ;;  %6250 = vmatprep.subr.mxu1 %v4379_v6 }
 0xa84   : > { %6199 = vmatpush3.msra.mxu0 %v8646_v40  ;;  %6251 = vmatpush3.msra.mxu1 %v4331_v15  ;;  %v4424_v40 = vld [vmem:[%s9635_s4 + $0x10] sm:$0xff] }
 0xa85   : > { %4567 = vmatmul.mubr.f32.vlgmr.msra.gmra.mxu0 %v4422_v49  ;;  %6252 = vmatprep.subr.mxu1 %v4377_v1 }
 0xa86   : > { %v4329_v17 = vpop.permute.xlu1 %4328  ;;  %4571 = vmatprep.mubr.f32.mxu0 %v4427_v32 }
 0xa87   : > { %6253 = vmatpush3.msra.mxu1 %v4329_v17 }
 0xa88   : > { %6254 = vmatprep.subr.mxu1 %v4375_v41 }
 0xa89   : > { %4572 = vmatmul.mubr.f32.gmra.mxu0 %v4426_v54 }
 0xa8a   : > { %v4327_v21 = vpop.permute.xlu1 %4326  ;;  %4576 = vmatprep.mubr.f32.mxu0 %v4431_v22 }
 0xa8b   : > { %6255 = vmatpush3.msra.mxu1 %v4327_v21 }
 0xa8c   : > { %4672 = vmatmul.mubr.f32.vlgmr.msra.gmra.mxu1 %v4424_v40 }
 0xa8d   : > { %4577 = vmatmul.mubr.f32.gmra.mxu0 %v4430_v47  ;;  %4676 = vmatprep.mubr.f32.mxu1 %v4429_v45 }
 0xa8e   : > { %4581 = vmatprep.mubr.f32.mxu0 %v4435_v63 }
 0xa8f   : > { %v8931_v56 = vpop.permute.xlu0 %4499 }
 0xa90   : > { %4677 = vmatmul.mubr.f32.gmra.mxu1 %v4428_v10 }
 0xa91   : > { %4582 = vmatmul.mubr.f32.gmra.mxu0 %v4434_v12  ;;  %4681 = vmatprep.mubr.f32.mxu1 %v4433_v16 }
 0xa92   : > { %4586 = vmatprep.mubr.f32.mxu0 %v4439_v43 }
 0xa93   : > { %v8933_v38 = vpop.permute.xlu0 %4489 }
 0xa94   : > { %4682 = vmatmul.mubr.f32.gmra.mxu1 %v4432_v24 }
 0xa95   : > { %4587 = vmatmul.mubr.f32.gmra.mxu0 %v4438_v51  ;;  %4686 = vmatprep.mubr.f32.mxu1 %v4437_v57 }
 0xa96   : > { %4591 = vmatprep.mubr.f32.mxu0 %v4443_v48 }
 0xa97   : > { %v8929_v27 = vpop.permute.xlu1 %4494  ;;  %v4480_v19 = vpop.permute.xlu0 %4479 }
 0xa98   : > { %4687 = vmatmul.mubr.f32.gmra.mxu1 %v4436_v11 }
 0xa99   : > { %4592 = vmatmul.mubr.f32.gmra.mxu0 %v4442_v62  ;;  %4691 = vmatprep.mubr.f32.mxu1 %v4441_v33 }
 0xa9a   : > { %4596 = vmatprep.mubr.f32.mxu0 %v4447_v29 }
 0xa9b   : > { %v4485_v44 = vpop.permute.xlu1 %4484  ;;  %v4470_v1 = vpop.permute.xlu0 %4469 }
 0xa9c   : > { %4692 = vmatmul.mubr.f32.gmra.mxu1 %v4440_v34 }
 0xa9d   : > { %4597 = vmatmul.mubr.f32.gmra.mxu0 %v4446_v42  ;;  %4696 = vmatprep.mubr.f32.mxu1 %v4445_v50 }
 0xa9e   : > { %4601 = vmatprep.mubr.f32.mxu0 %v4451_v30 }
 0xa9f   : > { %v4475_v5 = vpop.permute.xlu1 %4474 }
 0xaa0   : > { %4697 = vmatmul.mubr.f32.gmra.mxu1 %v4444_v53 }
 0xaa1   : > { %4602 = vmatmul.mubr.f32.gmra.mxu0 %v4450_v0  ;;  %4701 = vmatprep.mubr.f32.mxu1 %v4449_v37 }
 0xaa3   : > { %v4465_v28 = vpop.permute.xlu1 %4464 }
 0xaa4   : > { %4702 = vmatmul.mubr.f32.gmra.mxu1 %v4448_v35 }
 0xaa5   : > { %4706 = vmatprep.mubr.f32.mxu1 %v4453_v36 }
 0xaa8   : > { %4707 = vmatmul.mubr.f32.gmra.mxu1 %v4452_v7 }
 0xb45   : > { %v6200_v13 = vpop.f32.mrf.mxu0 }
 0xb47   : > { %v6201_v55 = vpop.f32.mrf.mxu0 }
 0xb48   : > { %v6202_v59 = vadd.f32 %v6201_v55, %v6200_v13 }
 0xb49   : > { %v6203_v18 = vpop.f32.mrf.mxu0 }
 0xb4a   : > { %v4569_v39 = vadd.f32 %v6202_v59, %v4465_v28 }
 0xb4b   : > { %v6204_v52 = vpop.f32.mrf.mxu0 }
 0xb4c   : > { %v6256_v20 = vpop.f32.mrf.mxu1  ;;  %v6205_v25 = vadd.f32 %v6204_v52, %v6203_v18 }
 0xb4d   : > { %v6206_v14 = vpop.f32.mrf.mxu0 }
 0xb4e   : > { %v6257_v46 = vpop.f32.mrf.mxu1  ;;  %v4574_v15 = vadd.f32 %v6205_v25, %v4470_v1 }
 0xb4f   : > { %v6258_v9 = vadd.f32 %v6257_v46, %v6256_v20  ;;  %v6207_v2 = vpop.f32.mrf.mxu0 }
 0xb50   : > { %v6259_v23 = vpop.f32.mrf.mxu1  ;;  %v6208_v6 = vadd.f32 %v6207_v2, %v6206_v14 }
 0xb51   : > { %v8937_v26 = vadd.f32 %v6258_v9, %v4569_v39  ;;  %v6209_v58 = vpop.f32.mrf.mxu0 }
 0xb52   : > { %v6260_v31 = vpop.f32.mrf.mxu1  ;;  %v4579_v45 = vadd.f32 %v6208_v6, %v4475_v5 }
 0xb53   : > { %v6261_v49 = vadd.f32 %v6260_v31, %v6259_v23  ;;  %v6210_v32 = vpop.f32.mrf.mxu0  ;;  %v4719_v17 = vmul.f32 %v8935_v61, %v8937_v26 }
 0xb54   : > { %v6262_v54 = vpop.f32.mrf.mxu1  ;;  %v6211_v63 = vadd.f32 %v6210_v32, %v6209_v58 }
 0xb55   : > { %v8941_v41 = vadd.f32 %v6261_v49, %v4574_v15  ;;  %v6212_v22 = vpop.f32.mrf.mxu0  ;;  %v4728_v40 = vsel %vm4727_vm2, %v4719_v17, 0.0  ;;  %v4760_v21 = vmul.f32 %v4719_v17, %v8937_v26 }
 0xb56   : > { %v6263_v47 = vpop.f32.mrf.mxu1  ;;  %4729 = vadd.xlane.f32.xlu0 %v4728_v40  ;;  %v4584_v33 = vadd.f32 %v6211_v63, %v4480_v19 }
 0xb57   : > { %v6264_v10 = vadd.f32 %v6263_v47, %v6262_v54  ;;  %v6213_v12 = vpop.f32.mrf.mxu0  ;;  %v4720_v16 = vmul.f32 %v8935_v61, %v8941_v41  ;;  %v4768_v57 = vsel %vm4727_vm2, %v4760_v21, 0.0 }
 0xb58   : > { %v6265_v43 = vpop.f32.mrf.mxu1  ;;  %v6214_v11 = vadd.f32 %v6213_v12, %v6212_v22 }
 0xb59   : > { %v8947_v24 = vadd.f32 %v6264_v10, %v4579_v45  ;;  %v6215_v51 = vpop.f32.mrf.mxu0  ;;  %v4761_v48 = vmul.f32 %v4720_v16, %v8941_v41  ;;  %v4731_v37 = vsel %vm4727_vm2, %v4720_v16, 0.0 }
 0xb5a   : > { %v6266_v62 = vpop.f32.mrf.mxu1  ;;  %4769 = vadd.xlane.f32.xlu0 %v4768_v57  ;;  %v4589_v36 = vadd.f32 %v6214_v11, %v4485_v44 }
 0xb5b   : > { %v6267_v29 = vadd.f32 %v6266_v62, %v6265_v43  ;;  %v6216_v34 = vpop.f32.mrf.mxu0  ;;  %v4771_v42 = vsel %vm4727_vm2, %v4761_v48, 0.0  ;;  %v4721_v50 = vmul.f32 %v8935_v61, %v8947_v24 }
 0xb5c   : > { %v6268_v30 = vpop.f32.mrf.mxu1  ;;  %4772 = vadd.xlane.f32.xlu1 %v4771_v42  ;;  %v6217_v13 = vadd.f32 %v6216_v34, %v6215_v51 }
 0xb5d   : > { %v8954_v53 = vadd.f32 %v6267_v29, %v4584_v33  ;;  %v6218_v0 = vpop.f32.mrf.mxu0  ;;  %v4762_v35 = vmul.f32 %v4721_v50, %v8947_v24  ;;  %v4734_v14 = vsel %vm4727_vm2, %v4721_v50, 0.0 }
 0xb5e   : > { %v6269_v7 = vpop.f32.mrf.mxu1  ;;  %4732 = vadd.xlane.f32.xlu0 %v4731_v37  ;;  %v4594_v39 = vadd.f32 %v6217_v13, %v8933_v38 }
 0xb5f   : > { %v6270_v55 = vadd.f32 %v6269_v7, %v6268_v30  ;;  %v6219_v5 = vpop.f32.mrf.mxu0  ;;  %v4774_v18 = vsel %vm4727_vm2, %v4762_v35, 0.0  ;;  %v4722_v59 = vmul.f32 %v8935_v61, %v8954_v53 }
 0xb60   : > { %v6271_v52 = vpop.f32.mrf.mxu1  ;;  %4775 = vadd.xlane.f32.xlu1 %v4774_v18  ;;  %v6220_v44 = vadd.f32 %v6219_v5, %v6218_v0 }
 0xb61   : > { %v8961_v19 = vadd.f32 %v6270_v55, %v4589_v36  ;;  %v6221_v20 = vpop.f32.mrf.mxu0  ;;  %v4763_v28 = vmul.f32 %v4722_v59, %v8954_v53  ;;  %v4737_v31 = vsel %vm4727_vm2, %v4722_v59, 0.0 }
 0xb62   : > { %v6272_v46 = vpop.f32.mrf.mxu1  ;;  %4735 = vadd.xlane.f32.xlu0 %v4734_v14  ;;  %v4599_v6 = vadd.f32 %v6220_v44, %v8929_v27 }
 0xb63   : > { %v6273_v25 = vadd.f32 %v6272_v46, %v6271_v52  ;;  %v4777_v9 = vsel %vm4727_vm2, %v4763_v28, 0.0  ;;  %v4723_v2 = vmul.f32 %v8935_v61, %v8961_v19  ;;  %v6222_v23 = vpop.f32.mrf.mxu0 }
 0xb64   : > { %v6274_v58 = vpop.f32.mrf.mxu1  ;;  %4778 = vadd.xlane.f32.xlu1 %v4777_v9  ;;  %v6223_v38 = vadd.f32 %v6222_v23, %v6221_v20 }
 0xb65   : > { %v8969_v1 = vadd.f32 %v6273_v25, %v4594_v39  ;;  %v4764_v15 = vmul.f32 %v4723_v2, %v8961_v19  ;;  %v4740_v21 = vsel %vm4727_vm2, %v4723_v2, 0.0 }
 0xb66   : > { %v6275_v49 = vpop.f32.mrf.mxu1  ;;  %4738 = vadd.xlane.f32.xlu0 %v4737_v31  ;;  %v4604_v27 = vadd.f32 %v6223_v38, %v8931_v56 }
 0xb67   : > { %v6276_v32 = vadd.f32 %v6275_v49, %v6274_v58  ;;  %v4780_v17 = vsel %vm4727_vm2, %v4764_v15, 0.0  ;;  %v4724_v54 = vmul.f32 %v8935_v61, %v8969_v1 }
 0xb68   : > { %v6277_v22 = vpop.f32.mrf.mxu1  ;;  %4781 = vadd.xlane.f32.xlu1 %v4780_v17 }
 0xb69   : > { %v8977_v40 = vadd.f32 %v6276_v32, %v4599_v6  ;;  %v4765_v47 = vmul.f32 %v4724_v54, %v8969_v1  ;;  %v4743_v43 = vsel %vm4727_vm2, %v4724_v54, 0.0 }
 0xb6a   : > { %v6278_v45 = vpop.f32.mrf.mxu1  ;;  %4741 = vadd.xlane.f32.xlu0 %v4740_v21 }
 0xb6b   : > { %v6279_v63 = vadd.f32 %v6278_v45, %v6277_v22  ;;  %v4783_v10 = vsel %vm4727_vm2, %v4765_v47, 0.0  ;;  %v4725_v12 = vmul.f32 %v8935_v61, %v8977_v40 }
 0xb6c   : > { %4784 = vadd.xlane.f32.xlu1 %v4783_v10 }
 0xb6d   : > { %v8985_v16 = vadd.f32 %v6279_v63, %v4604_v27  ;;  %v4746_v51 = vsel %vm4727_vm2, %v4725_v12, 0.0  ;;  %v4766_v48 = vmul.f32 %v4725_v12, %v8977_v40 }
 0xb6e   : > { %4744 = vadd.xlane.f32.xlu0 %v4743_v43 }
 0xb6f   : > { %v4726_v57 = vmul.f32 %v8935_v61, %v8985_v16  ;;  %v4786_v62 = vsel %vm4727_vm2, %v4766_v48, 0.0 }
 0xb70   : > { %4747 = vadd.xlane.f32.xlu1 %v4746_v51 }
 0xb71   : > { %v4749_v56 = vsel %vm4727_vm2, %v4726_v57, 0.0  ;;  %v4767_v11 = vmul.f32 %v4726_v57, %v8985_v16 }
 0xb72   : > { %4750 = vadd.xlane.f32.xlu0 %v4749_v56 }
 0xb73   : > { %v4789_v33 = vsel %vm4727_vm2, %v4767_v11, 0.0 }
 0xb74   : > { %4787 = vadd.xlane.f32.xlu1 %v4786_v62 }
 0xb76   : > { %4790 = vadd.xlane.f32.xlu0 %v4789_v33 }
 0xbdf   : > { %v4730_v29 = vpop.xlane.xlu0 %4729 }
 0xbe0   : > { %v4752_v34 = vmul.f32 0.11111111, %v4730_v29 }
 0xbe2   : > { %v4800_v50 = vmul.f32 %v4752_v34, %v4752_v34  ;;  %v4824_v12 = vsub.f32 %v8937_v26, %v4752_v34 }
 0xbe3   : > { %v4770_v42 = vpop.xlane.xlu0 %4769 }
 0xbe4   : > { %v4792_v30 = vmul.f32 0.11111111, %v4770_v42 }
 0xbe5   : > { %v4773_v0 = vpop.xlane.xlu1 %4772 }
 0xbe6   : > { %v4808_v37 = vsub.f32 %v4792_v30, %v4800_v50  ;;  %v4793_v5 = vmul.f32 0.11111111, %v4773_v0 }
 0xbe7   : > { %v4733_v35 = vpop.xlane.xlu0 %4732 }
 0xbe8   : > { %v4816_v36 = vmax.f32 %v4808_v37, 0.0  ;;  %v4753_v7 = vmul.f32 0.11111111, %v4733_v35 }
 0xbe9   : > { %v4776_v13 = vpop.xlane.xlu1 %4775 }
 0xbea   : > { %v4832_v55 = vadd.f32 1e-05, %v4816_v36  ;;  %v4801_v18 = vmul.f32 %v4753_v7, %v4753_v7  ;;  %v4794_v44 = vmul.f32 0.11111111, %v4776_v13  ;;  %v4825_v26 = vsub.f32 %v8941_v41, %v4753_v7 }
 0xbeb   : > { %v4736_v59 = vpop.xlane.xlu0 %4735 }
 0xbec   : > { %6651 = vrsqrt.f32 %v4832_v55  ;;  %v4809_v52 = vsub.f32 %v4793_v5, %v4801_v18  ;;  %v8996_v20 = vmul.f32 0.11111111, %v4736_v59 }
 0xbed   : > { %v4779_v14 = vpop.xlane.xlu1 %4778 }
 0xbee   : > { %v4817_v28 = vmax.f32 %v4809_v52, 0.0  ;;  %v4802_v46 = vmul.f32 %v8996_v20, %v8996_v20  ;;  %v4795_v31 = vmul.f32 0.11111111, %v4779_v14  ;;  %v4826_v7 = vsub.f32 %v8947_v24, %v8996_v20 }
 0xbef   : > { %v4739_v39 = vpop.xlane.xlu0 %4738 }
 0xbf0   : > { %v4833_v25 = vadd.f32 1e-05, %v4817_v28  ;;  %v4810_v9 = vsub.f32 %v4794_v44, %v4802_v46  ;;  %v9000_v2 = vmul.f32 0.11111111, %v4739_v39 }
 0xbf1   : > { %v4782_v23 = vpop.xlane.xlu1 %4781 }
 0xbf2   : > { %6653 = vrsqrt.f32 %v4833_v25  ;;  %v4818_v58 = vmax.f32 %v4810_v9, 0.0  ;;  %v4803_v15 = vmul.f32 %v9000_v2, %v9000_v2  ;;  %v4796_v22 = vmul.f32 0.11111111, %v4782_v23 }
 0xbf3   : > { %v4742_v6 = vpop.xlane.xlu0 %4741 }
 0xbf4   : > { %v4834_v49 = vadd.f32 1e-05, %v4818_v58  ;;  %v4811_v38 = vsub.f32 %v4795_v31, %v4803_v15  ;;  %v9004_v32 = vmul.f32 0.11111111, %v4742_v6  ;;  %v4827_v31 = vsub.f32 %v8954_v53, %v9000_v2 }
 0xbf5   : > { %v4785_v17 = vpop.xlane.xlu1 %4784 }
 0xbf6   : > { %6655 = vrsqrt.f32 %v4834_v49  ;;  %v4819_v54 = vmax.f32 %v4811_v38, 0.0  ;;  %v4804_v21 = vmul.f32 %v9004_v32, %v9004_v32  ;;  %v4797_v57 = vmul.f32 0.11111111, %v4785_v17 }
 0xbf7   : > { %v4745_v47 = vpop.xlane.xlu0 %4744  ;;  %v4828_v17 = vsub.f32 %v8961_v19, %v9004_v32 }
 0xbf8   : > { %v4835_v45 = vadd.f32 1e-05, %v4819_v54  ;;  %v4812_v27 = vsub.f32 %v4796_v22, %v4804_v21  ;;  %v9008_v63 = vmul.f32 0.11111111, %v4745_v47 }
 0xbf9   : > { %v6652_v10 = vpop.eup %6651  ;;  %v4748_v43 = vpop.xlane.xlu1 %4747 }
 0xbfa   : > { %6657 = vrsqrt.f32 %v4835_v45  ;;  %v4820_v51 = vmax.f32 %v4812_v27, 0.0  ;;  %v4805_v48 = vmul.f32 %v9008_v63, %v9008_v63  ;;  %v9013_v56 = vmul.f32 0.11111111, %v4748_v43 }
 0xbfb   : > { %v4751_v11 = vpop.xlane.xlu0 %4750  ;;  %v4848_v62 = vmul.f32 %v6652_v10, %v4824_v12  ;;  %v4829_v47 = vsub.f32 %v8969_v1, %v9008_v63 }
 0xbfc   : > { %v4836_v33 = vadd.f32 1e-05, %v4820_v51  ;;  %v4813_v29 = vsub.f32 %v4797_v57, %v4805_v48  ;;  %v9015_v42 = vmul.f32 0.11111111, %v4751_v11  ;;  %v4806_v37 = vmul.f32 %v9013_v56, %v9013_v56 }
 0xbfd   : > { %v4788_v50 = vpop.xlane.xlu1 %4787  ;;  %v4856_v30 = vmul.f32 %v8935_v61, %v4848_v62  ;;  %v4830_v43 = vsub.f32 %v8977_v40, %v9013_v56 }
 0xbfe   : > { %6659 = vrsqrt.f32 %v4836_v33  ;;  %v4821_v34 = vmax.f32 %v4813_v29, 0.0  ;;  %v4798_v35 = vmul.f32 0.11111111, %v4788_v50  ;;  %v4807_v18 = vmul.f32 %v9015_v42, %v9015_v42 }
 0xbff   : > { %v6654_v0 = vpop.eup %6653  ;;  %v4791_v36 = vpop.xlane.xlu0 %4790  ;;  %vm4864_vm7 = vcmp.ge.f32.partialorder %v4856_v30, 0.0  ;;  %v4872_v13 = vmul.f32 0.2, %v4856_v30  ;;  %v4831_v57 = vsub.f32 %v8985_v16, %v9015_v42 }
 0xc00   : > { %v4849_v55 = vmul.f32 %v6654_v0, %v4825_v26  ;;  %v4837_v5 = vadd.f32 1e-05, %v4821_v34  ;;  %v4799_v59 = vmul.f32 0.11111111, %v4791_v36  ;;  %v4814_v52 = vsub.f32 %v4798_v35, %v4806_v37 }
 0xc01   : > { %v4880_v14 = vsel %vm4864_vm7, %v4856_v30, %v4872_v13 }
 0xc02   : > { %v4857_v41 = vmul.f32 %v8935_v61, %v4849_v55  ;;  %6661 = vrsqrt.f32 %v4837_v5  ;;  %v4815_v28 = vsub.f32 %v4799_v59, %v4807_v18  ;;  %4896 = vrot.lane.b32.xlu1 %v4880_v14, %s6932_s10  ;;  %v4822_v46 = vmax.f32 %v4814_v52, 0.0 }
 0xc03   : > { %v6656_v44 = vpop.eup %6655 }
 0xc04   : > { %v4850_v39 = vmul.f32 %v6656_v44, %v4826_v7  ;;  %v4823_v25 = vmax.f32 %v4815_v28, 0.0  ;;  %vm4865_vm4 = vcmp.ge.f32.partialorder %v4857_v41, 0.0  ;;  %v4873_v9 = vmul.f32 0.2, %v4857_v41 }
 0xc05   : > { %v4838_v23 = vadd.f32 1e-05, %v4822_v46 }
 0xc06   : > { %v4858_v58 = vmul.f32 %v8935_v61, %v4850_v39  ;;  %v4839_v15 = vadd.f32 1e-05, %v4823_v25  ;;  %v4881_v6 = vsel %vm4865_vm4, %v4857_v41, %v4873_v9 }
 0xc07   : > { %v6658_v24 = vpop.eup %6657  ;;  %6663 = vrsqrt.f32 %v4838_v23  ;;  %4898 = vrot.lane.b32.xlu0 %v4881_v6, %s6932_s10 }
 0xc08   : > { %v4851_v20 = vmul.f32 %v6658_v24, %v4827_v31  ;;  %6665 = vrsqrt.f32 %v4839_v15  ;;  %vm4866_vm6 = vcmp.ge.f32.partialorder %v4858_v58, 0.0  ;;  %v4874_v49 = vmul.f32 0.2, %v4858_v58 }
 0xc0a   : > { %v4859_v38 = vmul.f32 %v8935_v61, %v4851_v20  ;;  %v4882_v54 = vsel %vm4866_vm6, %v4858_v58, %v4874_v49 }
 0xc0b   : > { %v6660_v22 = vpop.eup %6659  ;;  %4900 = vrot.lane.b32.xlu1 %v4882_v54, %s6932_s10 }
 0xc0c   : > { %v4852_v53 = vmul.f32 %v6660_v22, %v4828_v17  ;;  %vm4867_vm5 = vcmp.ge.f32.partialorder %v4859_v38, 0.0  ;;  %v4875_v2 = vmul.f32 0.2, %v4859_v38 }
 0xc0e   : > { %v4860_v21 = vmul.f32 %v8935_v61, %v4852_v53  ;;  %v4883_v45 = vsel %vm4867_vm5, %v4859_v38, %v4875_v2 }
 0xc0f   : > { %v6662_v27 = vpop.eup %6661  ;;  %4902 = vrot.lane.b32.xlu0 %v4883_v45, %s6932_s10 }
 0xc10   : > { %v4853_v10 = vmul.f32 %v6662_v27, %v4829_v47  ;;  %vm4868_vm15 = vcmp.ge.f32.partialorder %v4860_v21, 0.0  ;;  %v4876_v12 = vmul.f32 0.2, %v4860_v21 }
 0xc12   : > { %v4861_v19 = vmul.f32 %v8935_v61, %v4853_v10  ;;  %v4884_v32 = vsel %vm4868_vm15, %v4860_v21, %v4876_v12 }
 0xc13   : > { %4904 = vrot.lane.b32.xlu1 %v4884_v32, %s6932_s10 }
 0xc14   : > { %v6664_v51 = vpop.eup %6663  ;;  %vm4869_vm10 = vcmp.ge.f32.partialorder %v4861_v19, 0.0  ;;  %v4877_v1 = vmul.f32 0.2, %v4861_v19 }
 0xc15   : > { %v6666_v63 = vpop.eup %6665  ;;  %v4854_v48 = vmul.f32 %v6664_v51, %v4830_v43 }
 0xc16   : > { %v4885_v11 = vsel %vm4869_vm10, %v4861_v19, %v4877_v1  ;;  %v4855_v62 = vmul.f32 %v6666_v63, %v4831_v57 }
 0xc17   : > { %4906 = vrot.lane.b32.xlu1 %v4885_v11, %s6932_s10  ;;  %v4862_v33 = vmul.f32 %v8935_v61, %v4854_v48 }
 0xc18   : > { %v4863_v29 = vmul.f32 %v8935_v61, %v4855_v62 }
 0xc19   : > { %vm4870_vm11 = vcmp.ge.f32.partialorder %v4862_v33, 0.0  ;;  %v4878_v40 = vmul.f32 0.2, %v4862_v33 }
 0xc1a   : > { %vm4871_vm12 = vcmp.ge.f32.partialorder %v4863_v29, 0.0  ;;  %v4879_v56 = vmul.f32 0.2, %v4863_v29 }
 0xc1b   : > { %v4886_v50 = vsel %vm4870_vm11, %v4862_v33, %v4878_v40 }
 0xc1c   : > { %4908 = vrot.lane.b32.xlu0 %v4886_v50, %s6932_s10  ;;  %v4887_v16 = vsel %vm4871_vm12, %v4863_v29, %v4879_v56 }
 0xc1d   : > { %4910 = vrot.lane.b32.xlu1 %v4887_v16, %s6932_s10 }
 0xc74   : > { %v4897_v42 = vpop.permute.xlu1 %4896 }
 0xc75   : > { %v9051_v30 = vsel %vm4920_vm14, 0.0, %v4897_v42 }
 0xc76   : > { %9833 = vst [vmem:[#allocation20_spill] sm:$0xff] %v9051_v30  ;;  %v9055_v26 = vsel %vm4929_vm13, %v9051_v30, 0.0 }
 0xc77   : > { %5090 = vrot.lane.b32.xlu1 %v9055_v26, %s9834_s20  ;;  %4994 = vrot.lane.b32.xlu0 %v9055_v26, %s9835_s3 }
 0xc79   : > { %v4899_v61 = vpop.permute.xlu0 %4898 }
 0xc7a   : > { %v9070_v34 = vsel %vm4920_vm14, 0.0, %v4899_v61 }
 0xc7b   : > { %4970 = vrot.lane.b32.xlu1 %v9055_v26, %s9822_s30  ;;  %4946 = vrot.lane.b32.xlu0 %v9055_v26, %s9820_s21  ;;  %v9078_v0 = vsel %vm4929_vm13, %v9070_v34, 0.0 }
 0xc7d   : > { %v4901_v37 = vpop.permute.xlu1 %4900 }
 0xc7e   : > { %v9097_v35 = vsel %vm4920_vm14, 0.0, %v4901_v37  ;;  %v9353_v37 = vld [vmem:[#allocation8] sm:$0xff] }
 0xc7f   : > { %5282 = vrot.lane.b32.xlu1 %v9055_v26, %s9836_s23  ;;  %5042 = vrot.lane.b32.xlu0 %v9055_v26, %s9837_s2  ;;  %v9105_v36 = vsel %vm4929_vm13, %v9097_v35, 0.0 }
 0xc81   : > { %v4903_v13 = vpop.permute.xlu0 %4902 }
 0xc82   : > { %v9128_v55 = vsel %vm4920_vm14, 0.0, %v4903_v13  ;;  %v5325_v13 = vrot.slane %v9353_v37, %v7137_v3 }
 0xc83   : > { %5234 = vrot.lane.b32.xlu1 %v9055_v26, %s9830_s1  ;;  %5066 = vrot.lane.b32.xlu0 %v9055_v26, %s9838_s19  ;;  %v9136_v5 = vsel %vm4929_vm13, %v9128_v55, 0.0 }
 0xc84   : > { %5422 = vmatprep.mubr.f32.mxu0 %v5325_v13 }
 0xc85   : > { %v4905_v18 = vpop.permute.xlu1 %4904 }
 0xc86   : > { %v9155_v59 = vsel %vm4920_vm14, 0.0, %v4905_v18  ;;  %v9860_v18 = vld [vmem:[#allocation18_spill] sm:$0xff] }
 0xc87   : > { %5092 = vrot.lane.b32.xlu1 %v9078_v0, %s9834_s20  ;;  %5018 = vrot.lane.b32.xlu0 %v9055_v26, %s9839_s27  ;;  %v9163_v52 = vsel %vm4929_vm13, %v9155_v59, 0.0 }
 0xc89   : > { %v4907_v14 = vpop.permute.xlu1 %4906 }
 0xc8a   : > { %v9186_v41 = vsel %vm4920_vm14, 0.0, %v4907_v14  ;;  %v9861_v14 = vsub.s32 3, %v9860_v18 }
 0xc8b   : > { %5044 = vrot.lane.b32.xlu1 %v9078_v0, %s9837_s2  ;;  %5186 = vrot.lane.b32.xlu0 %v9055_v26, %s9840_s25  ;;  %v9194_v7 = vsel %vm4929_vm13, %v9186_v41, 0.0 }
 0xc8e   : > { %v4909_v28 = vpop.permute.xlu0 %4908 }
 0xc8f   : > { %5020 = vrot.lane.b32.xlu1 %v9078_v0, %s9839_s27  ;;  %5138 = vrot.lane.b32.xlu0 %v9055_v26, %s9841_s22  ;;  %v4911_v44 = vpop.permute.xlu1 %4910  ;;  %v9221_v23 = vsel %vm4920_vm14, 0.0, %v4909_v28 }
 0xc90   : > { %v4936_v15 = vsel %vm4929_vm13, %v9221_v23, 0.0  ;;  %v9287_v19 = vsel %vm4920_vm14, 0.0, %v4911_v44 }
 0xc91   : > { %v9298_v51 = vsel %vm4929_vm13, %v9287_v19, 0.0 }
 0xc93   : > { %5284 = vrot.lane.b32.xlu1 %v9078_v0, %s9836_s23  ;;  %4996 = vrot.lane.b32.xlu0 %v9078_v0, %s9835_s3 }
 0xc97   : > { %5236 = vrot.lane.b32.xlu1 %v9078_v0, %s9830_s1  ;;  %4948 = vrot.lane.b32.xlu0 %v9078_v0, %s9820_s21 }
 0xc9b   : > { %4972 = vrot.lane.b32.xlu0 %v9078_v0, %s9822_s30  ;;  %5094 = vrot.lane.b32.xlu1 %v9105_v36, %s9834_s20 }
 0xc9f   : > { %5068 = vrot.lane.b32.xlu0 %v9078_v0, %s9838_s19  ;;  %5046 = vrot.lane.b32.xlu1 %v9105_v36, %s9837_s2 }
 0xca3   : > { %5188 = vrot.lane.b32.xlu0 %v9078_v0, %s9840_s25  ;;  %4974 = vrot.lane.b32.xlu1 %v9105_v36, %s9822_s30 }
 0xca7   : > { %5140 = vrot.lane.b32.xlu0 %v9078_v0, %s9841_s22  ;;  %5070 = vrot.lane.b32.xlu1 %v9105_v36, %s9838_s19 }
 0xcab   : > { %5286 = vrot.lane.b32.xlu1 %v9105_v36, %s9836_s23  ;;  %4998 = vrot.lane.b32.xlu0 %v9105_v36, %s9835_s3 }
 0xcaf   : > { %5238 = vrot.lane.b32.xlu1 %v9105_v36, %s9830_s1  ;;  %4950 = vrot.lane.b32.xlu0 %v9105_v36, %s9820_s21 }
 0xcb3   : > { %5096 = vrot.lane.b32.xlu1 %v9136_v5, %s9834_s20  ;;  %5022 = vrot.lane.b32.xlu0 %v9105_v36, %s9839_s27 }
 0xcb7   : > { %5048 = vrot.lane.b32.xlu1 %v9136_v5, %s9837_s2  ;;  %5190 = vrot.lane.b32.xlu0 %v9105_v36, %s9840_s25 }
 0xcbb   : > { %5024 = vrot.lane.b32.xlu1 %v9136_v5, %s9839_s27  ;;  %5142 = vrot.lane.b32.xlu0 %v9105_v36, %s9841_s22 }
 0xcbf   : > { %5288 = vrot.lane.b32.xlu1 %v9136_v5, %s9836_s23  ;;  %5000 = vrot.lane.b32.xlu0 %v9136_v5, %s9835_s3 }
 0xcc3   : > { %5240 = vrot.lane.b32.xlu1 %v9136_v5, %s9830_s1  ;;  %4952 = vrot.lane.b32.xlu0 %v9136_v5, %s9820_s21 }
 0xcc7   : > { %4976 = vrot.lane.b32.xlu0 %v9136_v5, %s9822_s30  ;;  %5098 = vrot.lane.b32.xlu1 %v9163_v52, %s9834_s20 }
 0xccb   : > { %5072 = vrot.lane.b32.xlu0 %v9136_v5, %s9838_s19  ;;  %5050 = vrot.lane.b32.xlu1 %v9163_v52, %s9837_s2 }
 0xccf   : > { %5192 = vrot.lane.b32.xlu0 %v9136_v5, %s9840_s25  ;;  %4978 = vrot.lane.b32.xlu1 %v9163_v52, %s9822_s30 }
 0xcd3   : > { %5144 = vrot.lane.b32.xlu0 %v9136_v5, %s9841_s22  ;;  %5074 = vrot.lane.b32.xlu1 %v9163_v52, %s9838_s19 }
 0xcd7   : > { %5290 = vrot.lane.b32.xlu1 %v9163_v52, %s9836_s23  ;;  %5002 = vrot.lane.b32.xlu0 %v9163_v52, %s9835_s3 }
 0xcdb   : > { %5242 = vrot.lane.b32.xlu1 %v9163_v52, %s9830_s1  ;;  %4954 = vrot.lane.b32.xlu0 %v9163_v52, %s9820_s21 }
 0xcdf   : > { %5026 = vrot.lane.b32.xlu0 %v9163_v52, %s9839_s27  ;;  %5100 = vrot.lane.b32.xlu1 %v9194_v7, %s9834_s20 }
 0xce3   : > { %5194 = vrot.lane.b32.xlu0 %v9163_v52, %s9840_s25  ;;  %5052 = vrot.lane.b32.xlu1 %v9194_v7, %s9837_s2 }
 0xce7   : > { %5146 = vrot.lane.b32.xlu0 %v9163_v52, %s9841_s22  ;;  %5028 = vrot.lane.b32.xlu1 %v9194_v7, %s9839_s27 }
 0xce9   : > { %v9208_v46 = vpop.permute.xlu0 %4994  ;;  %v9210_v39 = vpop.permute.xlu1 %5090 }
 0xceb   : > { %5292 = vrot.lane.b32.xlu1 %v9194_v7, %s9836_s23  ;;  %5004 = vrot.lane.b32.xlu0 %v9194_v7, %s9835_s3 }
 0xced   : > { %v9216_v25 = vpop.permute.xlu0 %4946  ;;  %v9218_v9 = vpop.permute.xlu1 %4970 }
 0xcee   : > { %9842 = vst [vmem:[#allocation21_spill] sm:$0xff] %v9218_v9 }
 0xcef   : > { %5244 = vrot.lane.b32.xlu1 %v9194_v7, %s9830_s1  ;;  %4956 = vrot.lane.b32.xlu0 %v9194_v7, %s9820_s21 }
 0xcf1   : > { %v9227_v58 = vpop.permute.xlu0 %5042  ;;  %v9229_v31 = vpop.permute.xlu1 %5282 }
 0xcf2   : > { %9843 = vst [vmem:[#allocation22_spill] sm:$0xff] %v9229_v31 }
 0xcf3   : > { %5102 = vrot.lane.b32.xlu1 %v4936_v15, %s9834_s20  ;;  %4980 = vrot.lane.b32.xlu0 %v9194_v7, %s9822_s30 }
 0xcf5   : > { %v9236_v6 = vpop.permute.xlu0 %5066  ;;  %v9238_v24 = vpop.permute.xlu1 %5234 }
 0xcf6   : > { %9844 = vst [vmem:[#allocation23_spill] sm:$0xff] %v9236_v6  ;;  %9845 = vst [vmem:[#allocation24_spill] sm:$0xff] %v9238_v24 }
 0xcf7   : > { %5054 = vrot.lane.b32.xlu1 %v4936_v15, %s9837_s2  ;;  %5076 = vrot.lane.b32.xlu0 %v9194_v7, %s9838_s19 }
 0xcf9   : > { %v9243_v20 = vpop.permute.xlu0 %5018  ;;  %v9245_v49 = vpop.permute.xlu1 %5092 }
 0xcfa   : > { %9846 = vst [vmem:[#allocation25_spill] sm:$0xff] %v9243_v20 }
 0xcfb   : > { %4982 = vrot.lane.b32.xlu1 %v4936_v15, %s9822_s30  ;;  %5196 = vrot.lane.b32.xlu0 %v9194_v7, %s9840_s25 }
 0xcfd   : > { %v9250_v38 = vpop.permute.xlu0 %5186  ;;  %v9252_v17 = vpop.permute.xlu1 %5044 }
 0xcfe   : > { %9847 = vst [vmem:[#allocation26_spill] sm:$0xff] %v9250_v38 }
 0xcff   : > { %5078 = vrot.lane.b32.xlu1 %v4936_v15, %s9838_s19  ;;  %5148 = vrot.lane.b32.xlu0 %v9194_v7, %s9841_s22 }
 0xd01   : > { %v9257_v54 = vpop.permute.xlu0 %5138  ;;  %v9259_v22 = vpop.permute.xlu1 %5020 }
 0xd02   : > { %9848 = vst [vmem:[#allocation27_spill] sm:$0xff] %v9257_v54  ;;  %9849 = vst [vmem:[#allocation28_spill] sm:$0xff] %v9259_v22 }
 0xd03   : > { %5294 = vrot.lane.b32.xlu1 %v4936_v15, %s9836_s23  ;;  %5172 = vrot.lane.b32.xlu0 %v9194_v7, %s9832_s18 }
 0xd05   : > { %v9264_v53 = vpop.permute.xlu0 %4996  ;;  %v9266_v2 = vpop.permute.xlu1 %5284 }
 0xd06   : > { %9850 = vst [vmem:[#allocation29_spill] sm:$0xff] %v9266_v2 }
 0xd07   : > { %5246 = vrot.lane.b32.xlu1 %v4936_v15, %s9830_s1  ;;  %5006 = vrot.lane.b32.xlu0 %v4936_v15, %s9835_s3 }
 0xd09   : > { %v9270_v21 = vpop.permute.xlu0 %4948  ;;  %v9272_v47 = vpop.permute.xlu1 %5236 }
 0xd0a   : > { %9851 = vst [vmem:[#allocation30_spill] sm:$0xff] %v9272_v47 }
 0xd0b   : > { %5270 = vrot.lane.b32.xlu1 %v4936_v15, %s9829_s24  ;;  %4958 = vrot.lane.b32.xlu0 %v4936_v15, %s9820_s21 }
 0xd0d   : > { %v9276_v45 = vpop.permute.xlu0 %4972  ;;  %v9278_v27 = vpop.permute.xlu1 %5094 }
 0xd0f   : > { %5222 = vrot.lane.b32.xlu1 %v4936_v15, %s9831_s28  ;;  %5030 = vrot.lane.b32.xlu0 %v4936_v15, %s9839_s27 }
 0xd11   : > { %v9282_v10 = vpop.permute.xlu0 %5068  ;;  %v9284_v12 = vpop.permute.xlu1 %5046 }
 0xd13   : > { %5268 = vrot.lane.b32.xlu1 %v9194_v7, %s9829_s24  ;;  %5198 = vrot.lane.b32.xlu0 %v4936_v15, %s9840_s25 }
 0xd15   : > { %v9292_v32 = vpop.permute.xlu0 %5188  ;;  %v9294_v43 = vpop.permute.xlu1 %4974 }
 0xd16   : > { %9852 = vst [vmem:[#allocation31_spill] sm:$0xff] %v9292_v32 }
 0xd17   : > { %5150 = vrot.lane.b32.xlu0 %v4936_v15, %s9841_s22  ;;  %4960 = vrot.lane.b32.xlu1 %v9298_v51, %s9820_s21 }
 0xd19   : > { %v9303_v57 = vpop.permute.xlu0 %5140  ;;  %v9305_v1 = vpop.permute.xlu1 %5070 }
 0xd1a   : > { %9853 = vst [vmem:[#allocation32_spill] sm:$0xff] %v9303_v57 }
 0xd1b   : > { %5174 = vrot.lane.b32.xlu0 %v4936_v15, %s9832_s18  ;;  %5104 = vrot.lane.b32.xlu1 %v9298_v51, %s9834_s20 }
 0xd1d   : > { %v9310_v63 = vpop.permute.xlu0 %4998  ;;  %v9312_v48 = vpop.permute.xlu1 %5286 }
 0xd1e   : > { %9854 = vst [vmem:[#allocation33_spill] sm:$0xff] %v9312_v48 }
 0xd1f   : > { %5126 = vrot.lane.b32.xlu0 %v4936_v15, %s9855_s0  ;;  %5056 = vrot.lane.b32.xlu1 %v9298_v51, %s9837_s2 }
 0xd21   : > { %v9317_v11 = vpop.permute.xlu0 %4950  ;;  %v9319_v62 = vpop.permute.xlu1 %5238 }
 0xd22   : > { %9856 = vst [vmem:[#allocation34_spill] sm:$0xff] %v9319_v62 }
 0xd23   : > { %5220 = vrot.lane.b32.xlu1 %v9194_v7, %s9831_s28  ;;  %5008 = vrot.lane.b32.xlu0 %v9298_v51, %s9835_s3 }
 0xd25   : > { %v9325_v33 = vpop.permute.xlu0 %5022  ;;  %v9327_v29 = vpop.permute.xlu1 %5096 }
 0xd27   : > { %5266 = vrot.lane.b32.xlu1 %v9163_v52, %s9829_s24  ;;  %5124 = vrot.lane.b32.xlu0 %v9194_v7, %s9855_s0  ;;  %v5333_v7 = vrot.slane %v9353_v37, %v9861_v14 }
 0xd29   : > { %v9333_v40 = vpop.permute.xlu0 %5190  ;;  %v9335_v56 = vpop.permute.xlu1 %5048  ;;  %5492 = vmatprep.mubr.f32.mxu1 %v5333_v7 }
 0xd2a   : > { %9857 = vst [vmem:[#allocation35_spill] sm:$0xff] %v9333_v40  ;;  %v5307_v40 = vld [vmem:[#allocation2] sm:$0x1] }
 0xd2b   : > { %5218 = vrot.lane.b32.xlu1 %v9163_v52, %s9831_s28  ;;  %5170 = vrot.lane.b32.xlu0 %v9163_v52, %s9832_s18 }
 0xd2d   : > { %v9341_v50 = vpop.permute.xlu0 %5142  ;;  %v9343_v16 = vpop.permute.xlu1 %5024 }
 0xd2e   : > { %9858 = vst [vmem:[#allocation36_spill] sm:$0xff] %v9341_v50 }
 0xd2f   : > { %5264 = vrot.lane.b32.xlu1 %v9136_v5, %s9829_s24  ;;  %4984 = vrot.lane.b32.xlu0 %v9298_v51, %s9822_s30 }
 0xd31   : > { %v9349_v42 = vpop.permute.xlu0 %5000  ;;  %v9351_v61 = vpop.permute.xlu1 %5288 }
 0xd32   : > { %9859 = vst [vmem:[#allocation37_spill] sm:$0xff] %v9351_v61 }
 0xd33   : > { %5032 = vrot.lane.b32.xlu1 %v9298_v51, %s9839_s27  ;;  %5080 = vrot.lane.b32.xlu0 %v9298_v51, %s9838_s19 }
 0xd35   : > { %v9364_v28 = vpop.permute.xlu0 %4952  ;;  %v9366_v44 = vpop.permute.xlu1 %5240 }
 0xd36   : > { %9862 = vst [vmem:[#allocation38_spill] sm:$0xff] %v9366_v44 }
 0xd37   : > { %5200 = vrot.lane.b32.xlu1 %v9298_v51, %s9840_s25  ;;  %5122 = vrot.lane.b32.xlu0 %v9163_v52, %s9855_s0 }
 0xd39   : > { %v9372_v15 = vpop.permute.xlu0 %4976  ;;  %v9374_v60 = vpop.permute.xlu1 %5098 }
 0xd3b   : > { %5168 = vrot.lane.b32.xlu0 %v9136_v5, %s9832_s18  ;;  %5152 = vrot.lane.b32.xlu1 %v9298_v51, %s9841_s22 }
 0xd3d   : > { %v9380_v3 = vpop.permute.xlu0 %5072  ;;  %v9382_v13 = vpop.permute.xlu1 %5050 }
 0xd3f   : > { %5120 = vrot.lane.b32.xlu0 %v9136_v5, %s9855_s0  ;;  %5296 = vrot.lane.b32.xlu1 %v9298_v51, %s9836_s23 }
 0xd41   : > { %v9388_v52 = vpop.permute.xlu0 %5192  ;;  %v9390_v14 = vpop.permute.xlu1 %4978 }
 0xd42   : > { %9863 = vst [vmem:[#allocation39_spill] sm:$0xff] %v9388_v52 }
 0xd43   : > { %5166 = vrot.lane.b32.xlu0 %v9105_v36, %s9832_s18  ;;  %5248 = vrot.lane.b32.xlu1 %v9298_v51, %s9830_s1 }
 0xd45   : > { %v9396_v7 = vpop.permute.xlu0 %5144  ;;  %v9398_v18 = vpop.permute.xlu1 %5074 }
 0xd46   : > { %9864 = vst [vmem:[#allocation40_spill] sm:$0xff] %v9396_v7 }
 0xd47   : > { %5118 = vrot.lane.b32.xlu0 %v9105_v36, %s9855_s0  ;;  %5216 = vrot.lane.b32.xlu1 %v9136_v5, %s9831_s28 }
 0xd49   : > { %v9404_v24 = vpop.permute.xlu0 %5002  ;;  %v9406_v54 = vpop.permute.xlu1 %5290 }
 0xd4a   : > { %9865 = vst [vmem:[#allocation41_spill] sm:$0xff] %v9406_v54 }
 0xd4b   : > { %5164 = vrot.lane.b32.xlu0 %v9078_v0, %s9832_s18  ;;  %5262 = vrot.lane.b32.xlu1 %v9105_v36, %s9829_s24 }
 0xd4d   : > { %v9412_v31 = vpop.permute.xlu0 %4954  ;;  %v9414_v38 = vpop.permute.xlu1 %5242 }
 0xd4e   : > { %9866 = vst [vmem:[#allocation42_spill] sm:$0xff] %v9414_v38 }
 0xd4f   : > { %5176 = vrot.lane.b32.xlu0 %v9298_v51, %s9832_s18  ;;  %5272 = vrot.lane.b32.xlu1 %v9298_v51, %s9829_s24 }
 0xd51   : > { %v9420_v5 = vpop.permute.xlu0 %5026  ;;  %v5101_v47 = vpop.permute.xlu1 %5100 }
 0xd53   : > { %5128 = vrot.lane.b32.xlu0 %v9298_v51, %s9855_s0  ;;  %5224 = vrot.lane.b32.xlu1 %v9298_v51, %s9831_s28 }
 0xd55   : > { %v9426_v57 = vpop.permute.xlu0 %5194  ;;  %v5053_v2 = vpop.permute.xlu1 %5052 }
 0xd56   : > { %9867 = vst [vmem:[#allocation43_spill] sm:$0xff] %v9426_v57 }
 0xd57   : > { %5116 = vrot.lane.b32.xlu0 %v9078_v0, %s9855_s0  ;;  %5214 = vrot.lane.b32.xlu1 %v9105_v36, %s9831_s28 }
 0xd59   : > { %v9432_v32 = vpop.permute.xlu0 %5146  ;;  %v9434_v62 = vpop.permute.xlu1 %5028 }
 0xd5a   : > { %9868 = vst [vmem:[#allocation44_spill] sm:$0xff] %v9432_v32 }
 0xd5b   : > { %5162 = vrot.lane.b32.xlu0 %v9055_v26, %s9832_s18  ;;  %5260 = vrot.lane.b32.xlu1 %v9078_v0, %s9829_s24 }
 0xd5d   : > { %v5005_v51 = vpop.permute.xlu0 %5004  ;;  %v9440_v50 = vpop.permute.xlu1 %5292 }
 0xd5e   : > { %9869 = vst [vmem:[#allocation45_spill] sm:$0xff] %v9440_v50 }
 0xd5f   : > { %5114 = vrot.lane.b32.xlu0 %v9055_v26, %s9855_s0  ;;  %5212 = vrot.lane.b32.xlu1 %v9078_v0, %s9831_s28 }
 0xd61   : > { %v4957_v36 = vpop.permute.xlu0 %4956  ;;  %v9446_v48 = vpop.permute.xlu1 %5244 }
 0xd62   : > { %9870 = vst [vmem:[#allocation46_spill] sm:$0xff] %v9446_v48 }
 0xd63   : > { %5258 = vrot.lane.b32.xlu0 %v9055_v26, %s9829_s24  ;;  %5210 = vrot.lane.b32.xlu1 %v9055_v26, %s9831_s28  ;;  %s639_s24 = scalar_lea.vmem %s9648_s17, %s9921_s29 }
 0xd65   : > { %v9452_v44 = vpop.permute.xlu0 %4980  ;;  %v5103_v7 = vpop.permute.xlu1 %5102 }
 0xd67   : > { %5310 = vperm.xlu0 %6638, %v5307_v40  }
 0xd69   : > { %v9454_v61 = vpop.permute.xlu0 %5076  ;;  %v5055_v52 = vpop.permute.xlu1 %5054 }
 0xd6d   : > { %v9456_v38 = vpop.permute.xlu0 %5196  ;;  %v9458_v0 = vpop.permute.xlu1 %4982 }
 0xd6e   : > { %9871 = vst [vmem:[#allocation47_spill] sm:$0xff] %v9456_v38 }
 0xd71   : > { %v9460_v32 = vpop.permute.xlu0 %5148  ;;  %v9462_v54 = vpop.permute.xlu1 %5078 }
 0xd72   : > { %9872 = vst [vmem:[#allocation48_spill] sm:$0xff] %v9460_v32 }
 0xd75   : > { %v9464_v57 = vpop.permute.xlu0 %5172  ;;  %v9466_v48 = vpop.permute.xlu1 %5294 }
 0xd76   : > { %9873 = vst [vmem:[#allocation49_spill] sm:$0xff] %v9464_v57  ;;  %9874 = vst [vmem:[#allocation50_spill] sm:$0xff] %v9466_v48 }
 0xd79   : > { %v5007_v26 = vpop.permute.xlu0 %5006  ;;  %v9468_v50 = vpop.permute.xlu1 %5246 }
 0xd7a   : > { %9875 = vst [vmem:[#allocation51_spill] sm:$0xff] %v9468_v50 }
 0xd7d   : > { %v4959_v20 = vpop.permute.xlu0 %4958  ;;  %v9470_v40 = vpop.permute.xlu1 %5270 }
 0xd7e   : > { %9876 = vst [vmem:[#allocation52_spill] sm:$0xff] %v9470_v40 }
 0xd81   : > { %v5031_v30 = vpop.permute.xlu0 %5030  ;;  %v9472_v6 = vpop.permute.xlu1 %5222 }
 0xd82   : > { %9877 = vst [vmem:[#allocation53_spill] sm:$0xff] %v9472_v6 }
 0xd85   : > { %v9474_v38 = vpop.permute.xlu0 %5198  ;;  %v9476_v9 = vpop.permute.xlu1 %5268 }
 0xd86   : > { %9878 = vst [vmem:[#allocation54_spill] sm:$0xff] %v9476_v9 }
 0xd89   : > { %v9478_v32 = vpop.permute.xlu0 %5150  ;;  %v4961_v4 = vpop.permute.xlu1 %4960 }
 0xd8d   : > { %v9480_v22 = vpop.permute.xlu0 %5174  ;;  %v5105_v57 = vpop.permute.xlu1 %5104 }
 0xd8e   : > { %6315 = vmatprep.subr.mxu1 %v5105_v57 }
 0xd91   : > { %v9482_v48 = vpop.permute.xlu0 %5126  ;;  %v5057_v50 = vpop.permute.xlu1 %5056 }
 0xd92   : > { %6316 = vmatpush3.msra.mxu1 %v5057_v50  ;;  %v9897_v50 = vld [vmem:[#allocation40_spill] sm:$0xff] }
 0xd93   : > { %6317 = vmatprep.subr.mxu1 %v5103_v7  ;;  %v9907_v7 = vld [vmem:[#allocation26_spill] sm:$0xff] }
 0xd94   : > { %6318 = vmatpush3.msra.mxu1 %v5055_v52  ;;  %v9905_v52 = vld [vmem:[#allocation32_spill] sm:$0xff] }
 0xd95   : > { %v5009_v40 = vpop.permute.xlu0 %5008  ;;  %6319 = vmatprep.subr.mxu1 %v5101_v47  ;;  %v9484_v6 = vpop.permute.xlu1 %5220 }
 0xd96   : > { %6280 = vmatprep.subr.mxu0 %v5009_v40  ;;  %6320 = vmatpush3.msra.mxu1 %v5053_v2  ;;  %v9883_v2 = vld [vmem:[#allocation20_spill] sm:$0xff] }
 0xd97   : > { %6281 = vmatpush3.msra.mxu0 %v4961_v4  ;;  %6321 = vmatprep.subr.mxu1 %v9374_v60  ;;  %v9911_v40 = vld [vmem:[#allocation52_spill] sm:$0xff] }
 0xd98   : > { %6282 = vmatprep.subr.mxu0 %v5007_v26  ;;  %6322 = vmatpush3.msra.mxu1 %v9382_v13  ;;  %v9904_v13 = vld [vmem:[#allocation29_spill] sm:$0xff]  ;;  %v9910_v26 = vld [vmem:[#allocation24_spill] sm:$0xff] }
 0xd99   : > { %v9488_v9 = vpop.permute.xlu0 %5124  ;;  %6283 = vmatpush3.msra.mxu0 %v4959_v20  ;;  %6323 = vmatprep.subr.mxu1 %v9327_v29  ;;  %v9491_v57 = vpop.permute.xlu1 %5266  ;;  %v9894_v29 = vld [vmem:[#allocation42_spill] sm:$0xff] }
 0xd9a   : > { %6284 = vmatprep.subr.mxu0 %v5005_v51  ;;  %6324 = vmatpush3.msra.mxu1 %v9335_v56  ;;  %v9896_v56 = vld [vmem:[#allocation37_spill] sm:$0xff] }
 0xd9b   : > { %6285 = vmatpush3.msra.mxu0 %v4957_v36  ;;  %6325 = vmatprep.subr.mxu1 %v9278_v27 }
 0xd9c   : > { %6286 = vmatprep.subr.mxu0 %v9404_v24  ;;  %6326 = vmatpush3.msra.mxu1 %v9284_v12  ;;  %v9887_v12 = vld [vmem:[#allocation47_spill] sm:$0xff] }
 0xd9d   : > { %v9497_v4 = vpop.permute.xlu0 %5170  ;;  %6287 = vmatpush3.msra.mxu0 %v9412_v31  ;;  %6327 = vmatprep.subr.mxu1 %v9245_v49  ;;  %v9501_v60 = vpop.permute.xlu1 %5218 }
 0xd9e   : > { %6288 = vmatprep.subr.mxu0 %v9349_v42  ;;  %6328 = vmatpush3.msra.mxu1 %v9252_v17  ;;  %v9899_v42 = vld [vmem:[#allocation35_spill] sm:$0xff] }
 0xd9f   : > { %6289 = vmatpush3.msra.mxu0 %v9364_v28  ;;  %6329 = vmatprep.subr.mxu1 %v9210_v39 }
 0xda0   : > { %6290 = vmatprep.subr.mxu0 %v9310_v63  ;;  %6330 = vmatpush3.msra.mxu1 %v9227_v58  ;;  %v9880_v58 = vld [vmem:[#allocation19_spill] sm:$0xff] }
 0xda1   : > { %v4985_v24 = vpop.permute.xlu0 %4984  ;;  %6291 = vmatpush3.msra.mxu0 %v9317_v11  ;;  %v9510_v31 = vpop.permute.xlu1 %5264  ;;  %v5329_v17 = vrot.slane %v9353_v37, %v9880_v58  ;;  %v9891_v63 = vld [vmem:[#allocation43_spill] sm:$0xff] }
 0xda2   : > { %6292 = vmatprep.subr.mxu0 %v9264_v53 }
 0xda3   : > { %6293 = vmatpush3.msra.mxu0 %v9270_v21  ;;  %v9884_v21 = vld [vmem:[#allocation25_spill] sm:$0xff] }
 0xda4   : > { %6294 = vmatprep.subr.mxu0 %v9208_v46 }
 0xda5   : > { %v5081_v20 = vpop.permute.xlu0 %5080  ;;  %6295 = vmatpush3.msra.mxu0 %v9216_v25  ;;  %v5033_v49 = vpop.permute.xlu1 %5032 }
 0xda6   : > { %6296 = vmatprep.subr.mxu0 %v4985_v24  ;;  %6331 = vmatprep.subr.mxu1 %v5081_v20 }
 0xda7   : > { %6297 = vmatpush3.msk.msra.mxu0 %vm4929_vm13, %v9287_v19  ;;  %6332 = vmatpush3.msra.mxu1 %v5033_v49  ;;  %v9888_v19 = vld [vmem:[#allocation45_spill] sm:$0xff] }
 0xda8   : > { %6298 = vmatprep.subr.mxu0 %v9458_v0  ;;  %6333 = vmatprep.subr.mxu1 %v9462_v54  ;;  %v9881_v54 = vld [vmem:[#allocation21_spill] sm:$0xff]  ;;  %v9909_v0 = vld [vmem:[#allocation27_spill] sm:$0xff] }
 0xda9   : > { %v9520_v39 = vpop.permute.xlu0 %5122  ;;  %6299 = vmatpush3.msk.msra.mxu0 %vm4929_vm13, %v9221_v23  ;;  %6334 = vmatpush3.msra.mxu1 %v5031_v30  ;;  %v5201_v46 = vpop.permute.xlu1 %5200  ;;  %v9879_v23 = vld [vmem:[#allocation28_spill] sm:$0xff]  ;;  %v9912_v49 = vld [vmem:[#allocation53_spill] sm:$0xff] }
 0xdaa   : > { %6300 = vmatprep.subr.mxu0 %v9452_v44  ;;  %6335 = vmatprep.subr.mxu1 %v9454_v61  ;;  %v9900_v61 = vld [vmem:[#allocation33_spill] sm:$0xff]  ;;  %v9901_v44 = vld [vmem:[#allocation36_spill] sm:$0xff] }
 0xdab   : > { %6301 = vmatpush3.msk.msra.mxu0 %vm4929_vm13, %v9186_v41  ;;  %6336 = vmatpush3.msra.mxu1 %v9434_v62 }
 0xdac   : > { %6302 = vmatprep.subr.mxu0 %v9390_v14  ;;  %6337 = vmatprep.subr.mxu1 %v9398_v18  ;;  %v9906_v14 = vld [vmem:[#allocation30_spill] sm:$0xff] }
 0xdad   : > { %v9531_v25 = vpop.permute.xlu0 %5168  ;;  %6303 = vmatpush3.msk.msra.mxu0 %vm4929_vm13, %v9155_v59  ;;  %6338 = vmatpush3.msra.mxu1 %v9420_v5  ;;  %v5153_v30 = vpop.permute.xlu1 %5152  ;;  %v9908_v5 = vld [vmem:[#allocation22_spill] sm:$0xff] }
 0xdae   : > { %6304 = vmatprep.subr.mxu0 %v9372_v15  ;;  %6339 = vmatprep.subr.mxu1 %v9380_v3  ;;  %v9902_v15 = vld [vmem:[#allocation34_spill] sm:$0xff]  ;;  %v9903_v3 = vld [vmem:[#allocation31_spill] sm:$0xff] }
 0xdaf   : > { %6305 = vmatpush3.msk.msra.mxu0 %vm4929_vm13, %v9128_v55  ;;  %6340 = vmatpush3.msra.mxu1 %v9343_v16  ;;  %v5321_v55 = vrot.slane %v9353_v37, %v7163_v8  ;;  %v9898_v16 = vld [vmem:[#allocation38_spill] sm:$0xff] }
 0xdb0   : > { %6306 = vmatprep.subr.mxu0 %v9294_v43  ;;  %6341 = vmatprep.subr.mxu1 %v9305_v1  ;;  %v9889_v43 = vld [vmem:[#allocation48_spill] sm:$0xff]  ;;  %v9890_v1 = vld [vmem:[#allocation46_spill] sm:$0xff] }
 0xdb1   : > { %v9543_v41 = vpop.permute.xlu0 %5120  ;;  %6307 = vmatpush3.msk.msra.mxu0 %vm4929_vm13, %v9097_v35  ;;  %6342 = vmatpush3.msra.mxu1 %v9325_v33  ;;  %v5297_v59 = vpop.permute.xlu1 %5296  ;;  %v9882_v35 = vld [vmem:[#allocation23_spill] sm:$0xff]  ;;  %v9893_v33 = vld [vmem:[#allocation44_spill] sm:$0xff] }
 0xdb2   : > { %6308 = vmatprep.subr.mxu0 %v9276_v45  ;;  %6343 = vmatprep.subr.mxu1 %v9282_v10  ;;  %v9886_v10 = vld [vmem:[#allocation51_spill] sm:$0xff] }
 0xdb3   : > { %6309 = vmatpush3.msk.msra.mxu0 %vm4929_vm13, %v9070_v34  ;;  %6344 = vmatpush3.msra.mxu1 %v9879_v23  ;;  %v9885_v34 = vld [vmem:[#allocation50_spill] sm:$0xff] }
 0xdb4   : > { %6310 = vmatprep.subr.mxu0 %v9881_v54  ;;  %6345 = vmatprep.subr.mxu1 %v9882_v35 }
 0xdb5   : > { %v9559_v53 = vpop.permute.xlu0 %5166  ;;  %6311 = vmatpush3.msk.msra.mxu0 %vm4929_vm13, %v9883_v2  ;;  %6346 = vmatpush3.msra.mxu1 %v9884_v21  ;;  %v5249_v47 = vpop.permute.xlu1 %5248 }
 0xdb6   : > { %5423 = vmatmul.mubr.f32.vlgmr.msra.gmra.mxu0 %v5321_v55  ;;  %6350 = vmatprep.subr.mxu0 %v5201_v46  ;;  %v9913_v46 = vld [vmem:[#allocation49_spill] sm:$0xff] }
 0xdb7   : > { %6385 = vmatprep.subr.mxu1 %v5297_v59  ;;  %5493 = vmatmul.mubr.f32.vlgmr.msra.gmra.mxu1 %v5329_v17 }
 0xdb8   : > { %6351 = vmatpush3.msra.mxu0 %v5153_v30  ;;  %6386 = vmatpush3.msra.mxu1 %v5249_v47  ;;  %v9914_v30 = vld [vmem:[#allocation54_spill] sm:$0xff] }
 0xdb9   : > { %6352 = vmatprep.subr.mxu0 %v9474_v38  ;;  %6387 = vmatprep.subr.mxu1 %v9885_v34  ;;  %v9566_v45 = vpop.permute.xlu0 %5118  ;;  %v5217_v27 = vpop.permute.xlu1 %5216  ;;  %v9892_v38 = vld [vmem:[#allocation41_spill] sm:$0xff] }
 0xdba   : > { %6353 = vmatpush3.msra.mxu0 %v9478_v32  ;;  %6388 = vmatpush3.msra.mxu1 %v9886_v10  ;;  %v9895_v32 = vld [vmem:[#allocation39_spill] sm:$0xff] }
 0xdbb   : > { %6354 = vmatprep.subr.mxu0 %v9887_v12  ;;  %6389 = vmatprep.subr.mxu1 %v9888_v19 }
 0xdbc   : > { %6355 = vmatpush3.msra.mxu0 %v9889_v43  ;;  %6390 = vmatpush3.msra.mxu1 %v9890_v1 }
 0xdbd   : > { %6356 = vmatprep.subr.mxu0 %v9891_v63  ;;  %6391 = vmatprep.subr.mxu1 %v9892_v38  ;;  %v5165_v11 = vpop.permute.xlu0 %5164  ;;  %v5263_v62 = vpop.permute.xlu1 %5262 }
 0xdbe   : > { %6357 = vmatpush3.msra.mxu0 %v9893_v33  ;;  %6392 = vmatpush3.msra.mxu1 %v9894_v29 }
 0xdbf   : > { %6358 = vmatprep.subr.mxu0 %v9895_v32  ;;  %6393 = vmatprep.subr.mxu1 %v9896_v56 }
 0xdc0   : > { %6359 = vmatpush3.msra.mxu0 %v9897_v50  ;;  %6394 = vmatpush3.msra.mxu1 %v9898_v16 }
 0xdc1   : > { %6360 = vmatprep.subr.mxu0 %v9899_v42  ;;  %6395 = vmatprep.subr.mxu1 %v9900_v61  ;;  %v5177_v18 = vpop.permute.xlu0 %5176  ;;  %v5273_v28 = vpop.permute.xlu1 %5272 }
 0xdc2   : > { %6361 = vmatpush3.msra.mxu0 %v9901_v44  ;;  %6396 = vmatpush3.msra.mxu1 %v9902_v15 }
 0xdc3   : > { %6362 = vmatprep.subr.mxu0 %v9903_v3  ;;  %6397 = vmatprep.subr.mxu1 %v9904_v13 }
 0xdc4   : > { %6363 = vmatpush3.msra.mxu0 %v9905_v52  ;;  %6398 = vmatpush3.msra.mxu1 %v9906_v14 }
 0xdc5   : > { %6364 = vmatprep.subr.mxu0 %v9907_v7  ;;  %6399 = vmatprep.subr.mxu1 %v9908_v5  ;;  %v5129_v51 = vpop.permute.xlu0 %5128  ;;  %v5225_v36 = vpop.permute.xlu1 %5224 }
 0xdc6   : > { %6365 = vmatpush3.msra.mxu0 %v9909_v0  ;;  %6400 = vmatpush3.msra.mxu1 %v9910_v26 }
 0xdc7   : > { %6366 = vmatprep.subr.mxu0 %v5177_v18  ;;  %6401 = vmatprep.subr.mxu1 %v5273_v28 }
 0xdc8   : > { %6367 = vmatpush3.msra.mxu0 %v5129_v51  ;;  %6402 = vmatpush3.msra.mxu1 %v5225_v36 }
 0xdc9   : > { %6368 = vmatprep.subr.mxu0 %v9480_v22  ;;  %6403 = vmatprep.subr.mxu1 %v9911_v40  ;;  %v5117_v24 = vpop.permute.xlu0 %5116  ;;  %v5215_v20 = vpop.permute.xlu1 %5214 }
 0xdca   : > { %6369 = vmatpush3.msra.mxu0 %v9482_v48  ;;  %6404 = vmatpush3.msra.mxu1 %v9912_v49  ;;  %v9915_v48 = vld [vmem:[#allocation18_spill] sm:$0xff] }
 0xdcb   : > { %6370 = vmatprep.subr.mxu0 %v9913_v46  ;;  %6405 = vmatprep.subr.mxu1 %v9914_v30  ;;  %v9919_v23 = vsub.s32 6, %v9915_v48 }
 0xdcc   : > { %6371 = vmatpush3.msra.mxu0 %v9488_v9  ;;  %6406 = vmatpush3.msra.mxu1 %v9484_v6 }
 0xdcd   : > { %6372 = vmatprep.subr.mxu0 %v9497_v4  ;;  %6407 = vmatprep.subr.mxu1 %v9491_v57  ;;  %v5163_v22 = vpop.permute.xlu0 %5162  ;;  %v5261_v59 = vpop.permute.xlu1 %5260  ;;  %v9916_v57 = vsub.s32 5, %v9915_v48  ;;  %v5345_v58 = vrot.slane %v9353_v37, %v9919_v23 }
 0xdce   : > { %6373 = vmatpush3.msra.mxu0 %v9520_v39  ;;  %6408 = vmatpush3.msra.mxu1 %v9501_v60  ;;  %v9917_v60 = vsub.s32 4, %v9915_v48  ;;  %v9918_v39 = vsub.s32 7, %v9915_v48 }
 0xdcf   : > { %6374 = vmatprep.subr.mxu0 %v9531_v25  ;;  %6409 = vmatprep.subr.mxu1 %v9510_v31  ;;  %v5341_v4 = vrot.slane %v9353_v37, %v9916_v57 }
 0xdd0   : > { %6375 = vmatpush3.msra.mxu0 %v9543_v41  ;;  %6410 = vmatpush3.msra.mxu1 %v5217_v27  ;;  %v5337_v31 = vrot.slane %v9353_v37, %v9917_v60  ;;  %v5349_v25 = vrot.slane %v9353_v37, %v9918_v39 }
 0xdd1   : > { %6376 = vmatprep.subr.mxu0 %v9559_v53  ;;  %6411 = vmatprep.subr.mxu1 %v5263_v62  ;;  %v5115_v9 = vpop.permute.xlu0 %5114  ;;  %v5213_v6 = vpop.permute.xlu1 %5212 }
 0xdd2   : > { %6377 = vmatpush3.msra.mxu0 %v9566_v45  ;;  %6412 = vmatpush3.msra.mxu1 %v5215_v20 }
 0xdd3   : > { %6378 = vmatprep.subr.mxu0 %v5165_v11  ;;  %6413 = vmatprep.subr.mxu1 %v5261_v59 }
 0xdd4   : > { %6379 = vmatpush3.msra.mxu0 %v5117_v24  ;;  %6414 = vmatpush3.msra.mxu1 %v5213_v6 }
 0xdd5   : > { %6380 = vmatprep.subr.mxu0 %v5163_v22  ;;  %v5259_v41 = vpop.permute.xlu0 %5258  ;;  %5562 = vmatprep.mubr.f32.mxu0 %v5341_v4  ;;  %v5211_v55 = vpop.permute.xlu1 %5210 }
 0xdd6   : > { %6381 = vmatpush3.msra.mxu0 %v5115_v9  ;;  %6415 = vmatprep.subr.mxu1 %v5259_v41 }
 0xdd7   : > { %5563 = vmatmul.mubr.f32.vlgmr.msra.gmra.mxu0 %v5337_v31  ;;  %6416 = vmatpush3.msra.mxu1 %v5211_v55 }
 0xdd8   : > { %5632 = vmatprep.mubr.f32.mxu1 %v5349_v25 }
 0xdd9   : > { %5633 = vmatmul.mubr.f32.vlgmr.msra.gmra.mxu1 %v5345_v58 }
 0xde2   : > { %v5311_v53 = vpop.permute.xlu0 %5310 }
 0xde3   : > { %v5316_v47 = vrot.slane %v5311_v53, %v7163_v8 }
 0xe76   : > { %v6312_v17 = vpop.f32.mrf.mxu0 }
 0xe77   : > { %v6347_v35 = vpop.f32.mrf.mxu1 }
 0xe78   : > { %v6313_v54 = vpop.f32.mrf.mxu0 }
 0xe79   : > { %v6314_v2 = vadd.f32 %v6313_v54, %v6312_v17  ;;  %v6348_v21 = vpop.f32.mrf.mxu1 }
 0xe7a   : > { %v6349_v45 = vadd.f32 %v6348_v21, %v6347_v35 }
 0xe7b   : > { %v5425_v34 = vadd.f32 %v6314_v2, %v5316_v47 }
 0xe7d   : > { %v5495_v12 = vadd.f32 %v6349_v45, %v5425_v34 }
 0xe97   : > { %v6382_v27 = vpop.f32.mrf.mxu0 }
 0xe99   : > { %v6383_v10 = vpop.f32.mrf.mxu0  ;;  %v6417_v37 = vpop.f32.mrf.mxu1 }
 0xe9a   : > { %v6384_v19 = vadd.f32 %v6383_v10, %v6382_v27 }
 0xe9b   : > { %v6418_v43 = vpop.f32.mrf.mxu1 }
 0xe9c   : > { %v5565_v1 = vadd.f32 %v6384_v19, %v5495_v12  ;;  %v6419_v63 = vadd.f32 %v6418_v43, %v6417_v37 }
 0xe9e   : > { %v5635_v38 = vadd.f32 %v6419_v63, %v5565_v1 }
 0xea0   : > { %5639 = vst.msk [vmem:[%s639_s24] sm:$0x1] %vm5638_vm0, %v5635_v38 }
 0xea1 PF: > { %s33_s26 = sadd.s32 1, %s6871_s26  }
 0xea2   : > { %p30_p4 = scmp.ge.s32.totalorder %s33_s26, 4  }
 0xea4   :  { %32 = sbr.rel (!%p30_p4) target bundleno = 9 (0x9), region = 147 }
 0xea9   :  { %5657 = vsyncpa [#allocation4], 1 }
 0xeaa   :  { %5659 = vsyncpa [#allocation4 + $0x1], 1 }
 0xeab   :  { %5660 = vsyncpa [#allocation6], 1 }
 0xeac   :  { %5661 = vsyncpa [#allocation9], 1 }
 0xead   :  { %5662 = vsyncpa [#allocation12], 1 }

</bundles_post_ra>
